<compile_context>
chip_gen: v6e
topology: v6e:2x2x1
jax: 0.10.0
libtpu: 0.0.40
codegen_flags: <defaults>
</compile_context>

<pallas_src>
import collections

import jax
import jax.numpy as jnp
import numpy as np
from jax import lax
from jax.experimental import pallas as pl
from jax.experimental.pallas import tpu as pltpu

BlockArg = collections.namedtuple(
    "BlockArg",
    ["input_filters", "output_filters", "expand_ratio", "kernel_size",
     "stride", "se_ratio"],
)


# --------------------------------------------------------------------------
# Fused MBConv kernel (one batch element per grid step)
# --------------------------------------------------------------------------
def make_fused_kernel(*, H, W, Cin, Cmid, Cout, k, stride, pad, Ho, Wo,
                      has_expand, use_se, residual, compute_dtype):
    def kernel(*refs):
        it = iter(refs)
        x_ref = next(it)                                  # (1, H, W, Cin) f32
        w_exp_ref = next(it) if has_expand else None      # (Cin, Cmid) bf16
        b0_ref = next(it) if has_expand else None         # (1, Cmid)    f32
        wdw_ref = next(it)                                # (k*k, Cmid)  f32 (BN1 folded)
        b1_ref = next(it)                                 # (1, Cmid)    f32
        w1_ref = next(it) if use_se else None             # (Cmid, hid)  bf16
        w2_ref = next(it) if use_se else None             # (hid, Cmid)  bf16
        wpw_ref = next(it)                                # (Cmid, Cout) bf16 (BN2 folded)
        b2_ref = next(it)                                 # (1, Cout)    f32
        o_ref = next(it)                                  # (1, Ho, Wo, Cout)
        xpad = next(it)                                   # VMEM scratch (Hp, Wp, Cmid) f32

        # Zero the padded scratch every step (border must stay zero; do not
        # rely on program_id==0 because a parallel grid axis may be split
        # across cores, each with its own scratch instance).
        xpad[...] = jnp.zeros_like(xpad)

        x = x_ref[0]                                      # (H, W, Cin) f32

        # ---- expand 1x1 conv (BN0 scale folded into weight) + bias + SiLU ----
        if has_expand:
            x2d = x.reshape(H * W, Cin).astype(compute_dtype)
            y = jnp.dot(x2d, w_exp_ref[...],
                        preferred_element_type=jnp.float32)      # (H*W, Cmid)
            y = y + b0_ref[...]
            y = y * jax.nn.sigmoid(y)                            # SiLU
            xpad[pad:pad + H, pad:pad + W, :] = y.reshape(H, W, Cmid)
        else:
            xpad[pad:pad + H, pad:pad + W, :] = x

        # ---- depthwise kxk conv (BN1 scale folded) + bias + SiLU ------------
        xp = xpad[...]                                           # (Hp, Wp, Cmid)
        acc = jnp.zeros((Ho, Wo, Cmid), jnp.float32)
        for dh in range(k):
            for dw in range(k):
                if stride == 1:
                    patch = lax.slice(xp, (dh, dw, 0), (dh + Ho, dw + Wo, Cmid))
                else:
                    # TODO(synk): deinterleave even/odd columns instead of
                    # strided slicing (XLU gathers) for stride=2 blocks.
                    patch = lax.slice(
                        xp, (dh, dw, 0),
                        (dh + stride * (Ho - 1) + 1,
                         dw + stride * (Wo - 1) + 1, Cmid),
                        (stride, stride, 1))
                acc = acc + patch * wdw_ref[dh * k + dw, :]
        y = acc + b1_ref[...]
        y = y * jax.nn.sigmoid(y)                                # SiLU

        # ---- squeeze-excite --------------------------------------------------
        if use_se:
            pooled = jnp.mean(y, axis=(0, 1)).reshape(1, Cmid)
            h = jnp.dot(pooled.astype(compute_dtype), w1_ref[...],
                        preferred_element_type=jnp.float32)
            h = jnp.maximum(h, 0.0)                              # ReLU
            gate = jax.nn.sigmoid(
                jnp.dot(h.astype(compute_dtype), w2_ref[...],
                        preferred_element_type=jnp.float32))
            y = y * gate.reshape(1, 1, Cmid)

        # ---- pointwise 1x1 conv (BN2 scale folded) + bias --------------------
        y2 = jnp.dot(y.reshape(Ho * Wo, Cmid).astype(compute_dtype),
                     wpw_ref[...], preferred_element_type=jnp.float32)
        y2 = y2 + b2_ref[...]                                    # (Ho*Wo, Cout)

        # ---- residual --------------------------------------------------------
        if residual:
            y2 = y2 + x.reshape(H * W, Cin)

        o_ref[0] = y2.reshape(Ho, Wo, Cout)

    return kernel


# --------------------------------------------------------------------------
# Parameter construction (deterministic) and one-time kernel-layout prep
# --------------------------------------------------------------------------
def init_params(key, arg):
    Cin = arg.input_filters
    Cmid = Cin * arg.expand_ratio
    Cout = arg.output_filters
    k = arg.kernel_size
    hid = int(Cmid * arg.se_ratio) if arg.se_ratio else 0
    keys = jax.random.split(key, 17)
    eps = 1e-5

    def bn(kg, kb, km, kv, c):
        gamma = jax.random.uniform(kg, (c,), jnp.float32, 0.5, 1.5)
        beta = jax.random.normal(kb, (c,), jnp.float32) * 0.1
        rmean = jax.random.normal(km, (c,), jnp.float32) * 0.1
        rvar = jax.random.uniform(kv, (c,), jnp.float32, 0.5, 1.5)
        scale = gamma / jnp.sqrt(rvar + eps)
        bias = beta - rmean * scale
        return scale.reshape(1, c), bias.reshape(1, c)

    p = {}
    if arg.expand_ratio != 1:
        p["w_exp"] = jax.random.normal(keys[0], (Cmid, Cin), jnp.float32) * 0.2   # OI
        p["bn0"] = bn(keys[1], keys[2], keys[3], keys[4], Cmid)
    p["w_dw"] = jax.random.normal(keys[5], (Cmid, k, k), jnp.float32) * 0.2       # (C,k,k)
    p["bn1"] = bn(keys[6], keys[7], keys[8], keys[9], Cmid)
    if arg.se_ratio:
        p["w_fc1"] = jax.random.normal(keys[10], (hid, Cmid), jnp.float32) * 0.2
        p["w_fc2"] = jax.random.normal(keys[11], (Cmid, hid), jnp.float32) * 0.2
    p["w_pw"] = jax.random.normal(keys[12], (Cout, Cmid), jnp.float32) * 0.2      # OI
    p["bn2"] = bn(keys[13], keys[14], keys[15], keys[16], Cout)
    return p


def prepare_params(params, arg, compute_dtype=jnp.bfloat16):
    """Fold BN scales into conv weights, transpose to matmul layout, cast the
    MXU operands to compute_dtype.  Called ONCE, outside the forward."""
    Cin = arg.input_filters
    Cmid = Cin * arg.expand_ratio
    Cout = arg.output_filters
    k = arg.kernel_size

    prep = {}
    if arg.expand_ratio != 1:
        s0, b0 = params["bn0"]
        w = params["w_exp"] * s0.reshape(Cmid, 1)            # fold BN0 scale (per out-chan)
        prep["w_exp"] = jnp.asarray(w.T, compute_dtype)      # (Cin, Cmid)
        prep["b0"] = jnp.asarray(b0, jnp.float32)            # (1, Cmid)
    s1, b1 = params["bn1"]
    wdw = params["w_dw"] * s1.reshape(Cmid, 1, 1)            # fold BN1 scale
    prep["w_dw"] = jnp.asarray(wdw.reshape(Cmid, k * k).T, jnp.float32)   # (k*k, Cmid)
    prep["b1"] = jnp.asarray(b1, jnp.float32)                # (1, Cmid)
    if arg.se_ratio:
        prep["w_fc1"] = jnp.asarray(params["w_fc1"].T, compute_dtype)     # (Cmid, hid)
        prep["w_fc2"] = jnp.asarray(params["w_fc2"].T, compute_dtype)     # (hid, Cmid)
    s2, b2 = params["bn2"]
    wpw = params["w_pw"] * s2.reshape(Cout, 1)               # fold BN2 scale
    prep["w_pw"] = jnp.asarray(wpw.T, compute_dtype)         # (Cmid, Cout)
    prep["b2"] = jnp.asarray(b2, jnp.float32)                # (1, Cout)
    return prep


# --------------------------------------------------------------------------
# Wrapper
# --------------------------------------------------------------------------
def mbconv_forward(x_nchw, prep, arg, compute_dtype=jnp.bfloat16):
    Cin = arg.input_filters
    Cout = arg.output_filters
    k = arg.kernel_size
    s = arg.stride
    pad = (k - 1) // 2
    Cmid = Cin * arg.expand_ratio
    has_expand = arg.expand_ratio != 1
    use_se = bool(arg.se_ratio)
    residual = (Cin == Cout) and (s == 1)

    x = jnp.transpose(x_nchw, (0, 2, 3, 1)).astype(jnp.float32)   # NHWC
    B, H, W, _ = x.shape
    Hp, Wp = H + 2 * pad, W + 2 * pad
    Ho = (Hp - k) // s + 1
    Wo = (Wp - k) // s + 1
    hid = prep["w_fc1"].shape[1] if use_se else 0

    kernel = make_fused_kernel(
        H=H, W=W, Cin=Cin, Cmid=Cmid, Cout=Cout, k=k, stride=s, pad=pad,
        Ho=Ho, Wo=Wo, has_expand=has_expand, use_se=use_se,
        residual=residual, compute_dtype=compute_dtype)

    def const(shape):                       # full-array (replicated) operand
        return pl.BlockSpec(shape, lambda b, _n=len(shape): (0,) * _n)

    in_specs = [pl.BlockSpec((1, H, W, Cin), lambda b: (b, 0, 0, 0))]
    args = [x]
    if has_expand:
        in_specs += [const((Cin, Cmid)), const((1, Cmid))]
        args += [prep["w_exp"], prep["b0"]]
    in_specs += [const((k * k, Cmid)), const((1, Cmid))]
    args += [prep["w_dw"], prep["b1"]]
    if use_se:
        in_specs += [const((Cmid, hid)), const((hid, Cmid))]
        args += [prep["w_fc1"], prep["w_fc2"]]
    in_specs += [const((Cmid, Cout)), const((1, Cout))]
    args += [prep["w_pw"], prep["b2"]]

    out_nhwc = pl.pallas_call(
        kernel,
        grid=(B,),
        in_specs=in_specs,
        out_specs=pl.BlockSpec((1, Ho, Wo, Cout), lambda b: (b, 0, 0, 0)),
        out_shape=jax.ShapeDtypeStruct((B, Ho, Wo, Cout), jnp.float32),
        scratch_shapes=[pltpu.VMEM((Hp, Wp, Cmid), jnp.float32)],
        compiler_params=pltpu.CompilerParams(
            dimension_semantics=("parallel",),
            vmem_limit_bytes=64 * 1024 * 1024),
    )(*args)

    return jnp.transpose(out_nhwc, (0, 3, 1, 2))                  # back to NCHW


# --------------------------------------------------------------------------
# Pure-JAX reference (NCHW, lax.conv) for correctness validation
# --------------------------------------------------------------------------
def mbconv_reference(x, params, arg):
    Cmid = arg.input_filters * arg.expand_ratio
    k = arg.kernel_size
    s = arg.stride
    pad = (k - 1) // 2
    dn = ("NCHW", "OIHW", "NCHW")

    def bn(y, sc_bi):
        sc, bi = sc_bi
        return y * sc.reshape(1, -1, 1, 1) + bi.reshape(1, -1, 1, 1)

    silu = lambda v: v * jax.nn.sigmoid(v)

    y = x
    if arg.expand_ratio != 1:
        y = lax.conv_general_dilated(
            x, params["w_exp"][:, :, None, None], (1, 1), "VALID",
            dimension_numbers=dn)
        y = silu(bn(y, params["bn0"]))
    y = lax.conv_general_dilated(
        y, params["w_dw"][:, None, :, :], (s, s), [(pad, pad), (pad, pad)],
        feature_group_count=Cmid, dimension_numbers=dn)
    y = silu(bn(y, params["bn1"]))
    if arg.se_ratio:
        pooled = jnp.mean(y, axis=(2, 3))                          # (B, Cmid)
        h = jnp.maximum(pooled @ params["w_fc1"].T, 0.0)
        gate = jax.nn.sigmoid(h @ params["w_fc2"].T)
        y = y * gate[:, :, None, None]
    y = lax.conv_general_dilated(
        y, params["w_pw"][:, :, None, None], (1, 1), "VALID",
        dimension_numbers=dn)
    y = bn(y, params["bn2"])
    if arg.input_filters == arg.output_filters and arg.stride == 1:
        y = y + x
    return y


# --------------------------------------------------------------------------
if __name__ == "__main__":
    arg = BlockArg(input_filters=8, output_filters=8, expand_ratio=4,
                   kernel_size=3, stride=1, se_ratio=0.25)

    key = jax.random.PRNGKey(0)
    kx, kp = jax.random.split(key)
    x = jax.random.normal(kx, (2, 8, 16, 16), jnp.float32)   # NCHW, like PyTorch
    params = init_params(kp, arg)
    prep = prepare_params(params, arg, compute_dtype=jnp.bfloat16)

    out = jax.block_until_ready(mbconv_forward(x, prep, arg,
                                               compute_dtype=jnp.bfloat16))
    ref = jax.block_until_ready(mbconv_reference(x, params, arg))

    assert out.shape == ref.shape, (out.shape, ref.shape)
    # Tolerance accounts for bf16 MXU operands (f32 accumulation) in the kernel.
    if not np.allclose(np.asarray(out), np.asarray(ref), rtol=2e-2, atol=2e-2):
        max_err = float(np.max(np.abs(np.asarray(out) - np.asarray(ref))))
        raise AssertionError(f"Pallas MBConv mismatch, max abs err = {max_err}")

    print("KERNEL_OK")
</pallas_src>

<mosaic_0001>
module attributes {stable_mosaic.version = 11 : i64} {
  func.func @kernel(%arg0: i32, %arg1: memref<1x16x16x8xf32, #tpu.memory_space<vmem>>, %arg2: memref<8x32xbf16, #tpu.memory_space<vmem>>, %arg3: memref<1x32xf32, #tpu.memory_space<vmem>>, %arg4: memref<9x32xf32, #tpu.memory_space<vmem>>, %arg5: memref<1x32xf32, #tpu.memory_space<vmem>>, %arg6: memref<32x8xbf16, #tpu.memory_space<vmem>>, %arg7: memref<8x32xbf16, #tpu.memory_space<vmem>>, %arg8: memref<32x8xbf16, #tpu.memory_space<vmem>>, %arg9: memref<1x8xf32, #tpu.memory_space<vmem>>, %arg10: memref<1x16x16x8xf32, #tpu.memory_space<vmem>>, %arg11: memref<18x18x32xf32, #tpu.memory_space<vmem>>) attributes {dimension_semantics = [#tpu.dimension_semantics<parallel>], iteration_bounds = array<i64: 2>, scalar_prefetch = 0 : i64, scratch_operands = 1 : i64, tpu.core_type = #tpu.core_type<tc>, window_params = [{transform_indices = @transform_0, window_bounds = array<i64: 1, 16, 16, 8>}, {pipeline_mode = #tpu.pipeline_mode<synchronous>, transform_indices = @transform_1, window_bounds = array<i64: 8, 32>}, {pipeline_mode = #tpu.pipeline_mode<synchronous>, transform_indices = @transform_2, window_bounds = array<i64: 1, 32>}, {pipeline_mode = #tpu.pipeline_mode<synchronous>, transform_indices = @transform_3, window_bounds = array<i64: 9, 32>}, {pipeline_mode = #tpu.pipeline_mode<synchronous>, transform_indices = @transform_4, window_bounds = array<i64: 1, 32>}, {pipeline_mode = #tpu.pipeline_mode<synchronous>, transform_indices = @transform_5, window_bounds = array<i64: 32, 8>}, {pipeline_mode = #tpu.pipeline_mode<synchronous>, transform_indices = @transform_6, window_bounds = array<i64: 8, 32>}, {pipeline_mode = #tpu.pipeline_mode<synchronous>, transform_indices = @transform_7, window_bounds = array<i64: 32, 8>}, {pipeline_mode = #tpu.pipeline_mode<synchronous>, transform_indices = @transform_8, window_bounds = array<i64: 1, 8>}, {transform_indices = @transform_9, window_bounds = array<i64: 1, 16, 16, 8>}]} {
    %cst = arith.constant 0.000000e+00 : f32
    %0 = vector.broadcast %cst : f32 to vector<18x18x32xf32>
    %c0 = arith.constant 0 : index
    %c0_0 = arith.constant 0 : index
    %c0_1 = arith.constant 0 : index
    %1 = vector.load %arg11[%c0, %c0_0, %c0_1] : memref<18x18x32xf32, #tpu.memory_space<vmem>>, vector<18x18x32xf32>
    tpu.vector_store %arg11[%c0, %c0_0, %c0_1], %0 {strides = array<i32>} : memref<18x18x32xf32, #tpu.memory_space<vmem>>, vector<18x18x32xf32>,
    %c0_2 = arith.constant 0 : index
    %c0_3 = arith.constant 0 : index
    %c0_4 = arith.constant 0 : index
    %c0_5 = arith.constant 0 : index
    %2 = vector.load %arg1[%c0_2, %c0_3, %c0_4, %c0_5] : memref<1x16x16x8xf32, #tpu.memory_space<vmem>>, vector<1x16x16x8xf32>
    %3 = vector.shape_cast %2 : vector<1x16x16x8xf32> to vector<16x16x8xf32>
    %4 = vector.shape_cast %3 : vector<16x16x8xf32> to vector<256x8xf32>
    %5 = arith.truncf %4 : vector<256x8xf32> to vector<256x8xbf16>
    %c0_6 = arith.constant 0 : index
    %c0_7 = arith.constant 0 : index
    %6 = vector.load %arg2[%c0_6, %c0_7] : memref<8x32xbf16, #tpu.memory_space<vmem>>, vector<8x32xbf16>
    %cst_8 = arith.constant dense<0.000000e+00> : vector<256x32xf32>
    %7 = tpu.matmul %5, %6, %cst_8 {dimension_numbers = #tpu.dot_dimension_numbers<[1], [0], [0], [1], [0, 0, 1, 1], [], []>} : vector<256x8xbf16>, vector<8x32xbf16>, vector<256x32xf32> -> vector<256x32xf32>
    %c0_9 = arith.constant 0 : index
    %c0_10 = arith.constant 0 : index
    %8 = vector.load %arg3[%c0_9, %c0_10] : memref<1x32xf32, #tpu.memory_space<vmem>>, vector<1x32xf32>
    %9 = vector.broadcast %8 : vector<1x32xf32> to vector<256x32xf32>
    %10 = arith.addf %7, %9 : vector<256x32xf32>
    %11 = arith.negf %10 : vector<256x32xf32>
    %12 = math.exp %11 : vector<256x32xf32>
    %cst_11 = arith.constant 1.000000e+00 : f32
    %13 = vector.broadcast %cst_11 : f32 to vector<256x32xf32>
    %14 = arith.addf %13, %12 : vector<256x32xf32>
    %15 = arith.divf %13, %14 : vector<256x32xf32>
    %16 = arith.mulf %10, %15 : vector<256x32xf32>
    %17 = vector.shape_cast %16 : vector<256x32xf32> to vector<16x16x32xf32>
    %c1 = arith.constant 1 : index
    %c1_12 = arith.constant 1 : index
    %c0_13 = arith.constant 0 : index
    %18 = vector.load %arg11[%c1, %c1_12, %c0_13] : memref<18x18x32xf32, #tpu.memory_space<vmem>>, vector<16x16x32xf32>
    tpu.vector_store %arg11[%c1, %c1_12, %c0_13], %17 {strides = array<i32>} : memref<18x18x32xf32, #tpu.memory_space<vmem>>, vector<16x16x32xf32>,
    %c0_14 = arith.constant 0 : index
    %c0_15 = arith.constant 0 : index
    %c0_16 = arith.constant 0 : index
    %19 = vector.load %arg11[%c0_14, %c0_15, %c0_16] : memref<18x18x32xf32, #tpu.memory_space<vmem>>, vector<18x18x32xf32>
    %cst_17 = arith.constant 0.000000e+00 : f32
    %20 = vector.broadcast %cst_17 : f32 to vector<16x16x32xf32>
    %21 = vector.extract_strided_slice %19 {offsets = [0, 0, 0], sizes = [16, 16, 32], strides = [1, 1, 1]} : vector<18x18x32xf32> to vector<16x16x32xf32>
    %c0_18 = arith.constant 0 : index
    %c0_19 = arith.constant 0 : index
    %22 = vector.load %arg4[%c0_18, %c0_19] : memref<9x32xf32, #tpu.memory_space<vmem>>, vector<1x32xf32>
    %23 = vector.shape_cast %22 : vector<1x32xf32> to vector<32xf32>
    %24 = vector.shape_cast %23 : vector<32xf32> to vector<1x1x32xf32>
    %25 = vector.broadcast %24 : vector<1x1x32xf32> to vector<16x16x32xf32>
    %26 = arith.mulf %21, %25 : vector<16x16x32xf32>
    %27 = arith.addf %20, %26 : vector<16x16x32xf32>
    %28 = vector.extract_strided_slice %19 {offsets = [0, 1, 0], sizes = [16, 16, 32], strides = [1, 1, 1]} : vector<18x18x32xf32> to vector<16x16x32xf32>
    %c1_20 = arith.constant 1 : index
    %c0_21 = arith.constant 0 : index
    %29 = vector.load %arg4[%c1_20, %c0_21] : memref<9x32xf32, #tpu.memory_space<vmem>>, vector<1x32xf32>
    %30 = vector.shape_cast %29 : vector<1x32xf32> to vector<32xf32>
    %31 = vector.shape_cast %30 : vector<32xf32> to vector<1x1x32xf32>
    %32 = vector.broadcast %31 : vector<1x1x32xf32> to vector<16x16x32xf32>
    %33 = arith.mulf %28, %32 : vector<16x16x32xf32>
    %34 = arith.addf %27, %33 : vector<16x16x32xf32>
    %35 = vector.extract_strided_slice %19 {offsets = [0, 2, 0], sizes = [16, 16, 32], strides = [1, 1, 1]} : vector<18x18x32xf32> to vector<16x16x32xf32>
    %c2 = arith.constant 2 : index
    %c0_22 = arith.constant 0 : index
    %36 = vector.load %arg4[%c2, %c0_22] : memref<9x32xf32, #tpu.memory_space<vmem>>, vector<1x32xf32>
    %37 = vector.shape_cast %36 : vector<1x32xf32> to vector<32xf32>
    %38 = vector.shape_cast %37 : vector<32xf32> to vector<1x1x32xf32>
    %39 = vector.broadcast %38 : vector<1x1x32xf32> to vector<16x16x32xf32>
    %40 = arith.mulf %35, %39 : vector<16x16x32xf32>
    %41 = arith.addf %34, %40 : vector<16x16x32xf32>
    %42 = vector.extract_strided_slice %19 {offsets = [1, 0, 0], sizes = [16, 16, 32], strides = [1, 1, 1]} : vector<18x18x32xf32> to vector<16x16x32xf32>
    %c3 = arith.constant 3 : index
    %c0_23 = arith.constant 0 : index
    %43 = vector.load %arg4[%c3, %c0_23] : memref<9x32xf32, #tpu.memory_space<vmem>>, vector<1x32xf32>
    %44 = vector.shape_cast %43 : vector<1x32xf32> to vector<32xf32>
    %45 = vector.shape_cast %44 : vector<32xf32> to vector<1x1x32xf32>
    %46 = vector.broadcast %45 : vector<1x1x32xf32> to vector<16x16x32xf32>
    %47 = arith.mulf %42, %46 : vector<16x16x32xf32>
    %48 = arith.addf %41, %47 : vector<16x16x32xf32>
    %49 = vector.extract_strided_slice %19 {offsets = [1, 1, 0], sizes = [16, 16, 32], strides = [1, 1, 1]} : vector<18x18x32xf32> to vector<16x16x32xf32>
    %c4 = arith.constant 4 : index
    %c0_24 = arith.constant 0 : index
    %50 = vector.load %arg4[%c4, %c0_24] : memref<9x32xf32, #tpu.memory_space<vmem>>, vector<1x32xf32>
    %51 = vector.shape_cast %50 : vector<1x32xf32> to vector<32xf32>
    %52 = vector.shape_cast %51 : vector<32xf32> to vector<1x1x32xf32>
    %53 = vector.broadcast %52 : vector<1x1x32xf32> to vector<16x16x32xf32>
    %54 = arith.mulf %49, %53 : vector<16x16x32xf32>
    %55 = arith.addf %48, %54 : vector<16x16x32xf32>
    %56 = vector.extract_strided_slice %19 {offsets = [1, 2, 0], sizes = [16, 16, 32], strides = [1, 1, 1]} : vector<18x18x32xf32> to vector<16x16x32xf32>
    %c5 = arith.constant 5 : index
    %c0_25 = arith.constant 0 : index
    %57 = vector.load %arg4[%c5, %c0_25] : memref<9x32xf32, #tpu.memory_space<vmem>>, vector<1x32xf32>
    %58 = vector.shape_cast %57 : vector<1x32xf32> to vector<32xf32>
    %59 = vector.shape_cast %58 : vector<32xf32> to vector<1x1x32xf32>
    %60 = vector.broadcast %59 : vector<1x1x32xf32> to vector<16x16x32xf32>
    %61 = arith.mulf %56, %60 : vector<16x16x32xf32>
    %62 = arith.addf %55, %61 : vector<16x16x32xf32>
    %63 = vector.extract_strided_slice %19 {offsets = [2, 0, 0], sizes = [16, 16, 32], strides = [1, 1, 1]} : vector<18x18x32xf32> to vector<16x16x32xf32>
    %c6 = arith.constant 6 : index
    %c0_26 = arith.constant 0 : index
    %64 = vector.load %arg4[%c6, %c0_26] : memref<9x32xf32, #tpu.memory_space<vmem>>, vector<1x32xf32>
    %65 = vector.shape_cast %64 : vector<1x32xf32> to vector<32xf32>
    %66 = vector.shape_cast %65 : vector<32xf32> to vector<1x1x32xf32>
    %67 = vector.broadcast %66 : vector<1x1x32xf32> to vector<16x16x32xf32>
    %68 = arith.mulf %63, %67 : vector<16x16x32xf32>
    %69 = arith.addf %62, %68 : vector<16x16x32xf32>
    %70 = vector.extract_strided_slice %19 {offsets = [2, 1, 0], sizes = [16, 16, 32], strides = [1, 1, 1]} : vector<18x18x32xf32> to vector<16x16x32xf32>
    %c7 = arith.constant 7 : index
    %c0_27 = arith.constant 0 : index
    %71 = vector.load %arg4[%c7, %c0_27] : memref<9x32xf32, #tpu.memory_space<vmem>>, vector<1x32xf32>
    %72 = vector.shape_cast %71 : vector<1x32xf32> to vector<32xf32>
    %73 = vector.shape_cast %72 : vector<32xf32> to vector<1x1x32xf32>
    %74 = vector.broadcast %73 : vector<1x1x32xf32> to vector<16x16x32xf32>
    %75 = arith.mulf %70, %74 : vector<16x16x32xf32>
    %76 = arith.addf %69, %75 : vector<16x16x32xf32>
    %77 = vector.extract_strided_slice %19 {offsets = [2, 2, 0], sizes = [16, 16, 32], strides = [1, 1, 1]} : vector<18x18x32xf32> to vector<16x16x32xf32>
    %c8 = arith.constant 8 : index
    %c0_28 = arith.constant 0 : index
    %78 = vector.load %arg4[%c8, %c0_28] : memref<9x32xf32, #tpu.memory_space<vmem>>, vector<1x32xf32>
    %79 = vector.shape_cast %78 : vector<1x32xf32> to vector<32xf32>
    %80 = vector.shape_cast %79 : vector<32xf32> to vector<1x1x32xf32>
    %81 = vector.broadcast %80 : vector<1x1x32xf32> to vector<16x16x32xf32>
    %82 = arith.mulf %77, %81 : vector<16x16x32xf32>
    %83 = arith.addf %76, %82 : vector<16x16x32xf32>
    %c0_29 = arith.constant 0 : index
    %c0_30 = arith.constant 0 : index
    %84 = vector.load %arg5[%c0_29, %c0_30] : memref<1x32xf32, #tpu.memory_space<vmem>>, vector<1x32xf32>
    %85 = vector.shape_cast %84 : vector<1x32xf32> to vector<1x1x32xf32>
    %86 = vector.broadcast %85 : vector<1x1x32xf32> to vector<16x16x32xf32>
    %87 = arith.addf %83, %86 : vector<16x16x32xf32>
    %88 = arith.negf %87 : vector<16x16x32xf32>
    %89 = math.exp %88 : vector<16x16x32xf32>
    %cst_31 = arith.constant 1.000000e+00 : f32
    %90 = vector.broadcast %cst_31 : f32 to vector<16x16x32xf32>
    %91 = arith.addf %90, %89 : vector<16x16x32xf32>
    %92 = arith.divf %90, %91 : vector<16x16x32xf32>
    %93 = arith.mulf %87, %92 : vector<16x16x32xf32>
    %cst_32 = arith.constant dense<0.000000e+00> : vector<32xf32>
    %94 = vector.multi_reduction <add>, %93, %cst_32 [0, 1] : vector<16x16x32xf32> to vector<32xf32>
    %cst_33 = arith.constant 2.560000e+02 : f32
    %95 = vector.broadcast %cst_33 : f32 to vector<32xf32>
    %96 = arith.divf %94, %95 : vector<32xf32>
    %97 = vector.shape_cast %96 : vector<32xf32> to vector<1x32xf32>
    %98 = arith.truncf %97 : vector<1x32xf32> to vector<1x32xbf16>
    %c0_34 = arith.constant 0 : index
    %c0_35 = arith.constant 0 : index
    %99 = vector.load %arg6[%c0_34, %c0_35] : memref<32x8xbf16, #tpu.memory_space<vmem>>, vector<32x8xbf16>
    %cst_36 = arith.constant dense<0.000000e+00> : vector<1x8xf32>
    %100 = tpu.matmul %98, %99, %cst_36 {dimension_numbers = #tpu.dot_dimension_numbers<[1], [0], [0], [1], [0, 0, 1, 1], [], []>} : vector<1x32xbf16>, vector<32x8xbf16>, vector<1x8xf32> -> vector<1x8xf32>
    %cst_37 = arith.constant 0.000000e+00 : f32
    %101 = vector.broadcast %cst_37 : f32 to vector<1x8xf32>
    %102 = arith.maximumf %100, %101 : vector<1x8xf32>
    %103 = arith.truncf %102 : vector<1x8xf32> to vector<1x8xbf16>
    %c0_38 = arith.constant 0 : index
    %c0_39 = arith.constant 0 : index
    %104 = vector.load %arg7[%c0_38, %c0_39] : memref<8x32xbf16, #tpu.memory_space<vmem>>, vector<8x32xbf16>
    %cst_40 = arith.constant dense<0.000000e+00> : vector<1x32xf32>
    %105 = tpu.matmul %103, %104, %cst_40 {dimension_numbers = #tpu.dot_dimension_numbers<[1], [0], [0], [1], [0, 0, 1, 1], [], []>} : vector<1x8xbf16>, vector<8x32xbf16>, vector<1x32xf32> -> vector<1x32xf32>
    %106 = arith.negf %105 : vector<1x32xf32>
    %107 = math.exp %106 : vector<1x32xf32>
    %cst_41 = arith.constant 1.000000e+00 : f32
    %108 = vector.broadcast %cst_41 : f32 to vector<1x32xf32>
    %109 = arith.addf %108, %107 : vector<1x32xf32>
    %110 = arith.divf %108, %109 : vector<1x32xf32>
    %111 = vector.shape_cast %110 : vector<1x32xf32> to vector<1x1x32xf32>
    %112 = vector.broadcast %111 : vector<1x1x32xf32> to vector<16x16x32xf32>
    %113 = arith.mulf %93, %112 : vector<16x16x32xf32>
    %114 = vector.shape_cast %113 : vector<16x16x32xf32> to vector<256x32xf32>
    %115 = arith.truncf %114 : vector<256x32xf32> to vector<256x32xbf16>
    %c0_42 = arith.constant 0 : index
    %c0_43 = arith.constant 0 : index
    %116 = vector.load %arg8[%c0_42, %c0_43] : memref<32x8xbf16, #tpu.memory_space<vmem>>, vector<32x8xbf16>
    %cst_44 = arith.constant dense<0.000000e+00> : vector<256x8xf32>
    %117 = tpu.matmul %115, %116, %cst_44 {dimension_numbers = #tpu.dot_dimension_numbers<[1], [0], [0], [1], [0, 0, 1, 1], [], []>} : vector<256x32xbf16>, vector<32x8xbf16>, vector<256x8xf32> -> vector<256x8xf32>
    %c0_45 = arith.constant 0 : index
    %c0_46 = arith.constant 0 : index
    %118 = vector.load %arg9[%c0_45, %c0_46] : memref<1x8xf32, #tpu.memory_space<vmem>>, vector<1x8xf32>
    %119 = vector.broadcast %118 : vector<1x8xf32> to vector<256x8xf32>
    %120 = arith.addf %117, %119 : vector<256x8xf32>
    %121 = vector.shape_cast %3 : vector<16x16x8xf32> to vector<256x8xf32>
    %122 = arith.addf %120, %121 : vector<256x8xf32>
    %123 = vector.shape_cast %122 : vector<256x8xf32> to vector<16x16x8xf32>
    %c0_47 = arith.constant 0 : index
    %c0_48 = arith.constant 0 : index
    %c0_49 = arith.constant 0 : index
    %c0_50 = arith.constant 0 : index
    %124 = vector.load %arg10[%c0_47, %c0_48, %c0_49, %c0_50] : memref<1x16x16x8xf32, #tpu.memory_space<vmem>>, vector<1x16x16x8xf32>
    %125 = vector.shape_cast %124 : vector<1x16x16x8xf32> to vector<16x16x8xf32>
    %126 = vector.shape_cast %123 : vector<16x16x8xf32> to vector<1x16x16x8xf32>
    tpu.vector_store %arg10[%c0_47, %c0_48, %c0_49, %c0_50], %126 {strides = array<i32>} : memref<1x16x16x8xf32, #tpu.memory_space<vmem>>, vector<1x16x16x8xf32>,
    return
  }
  func.func @transform_0(%arg0: i32) -> (i32, i32, i32, i32) {
    %c0_i32 = arith.constant 0 : i32
    %c0_i32_0 = arith.constant 0 : i32
    %c0_i32_1 = arith.constant 0 : i32
    %c0_i32_2 = arith.constant 0 : i32
    return %arg0, %c0_i32, %c0_i32_0, %c0_i32_1 : i32, i32, i32, i32
  }
  func.func @transform_1(%arg0: i32) -> (i32, i32) {
    %c0_i32 = arith.constant 0 : i32
    %c0_i32_0 = arith.constant 0 : i32
    %c0_i32_1 = arith.constant 0 : i32
    return %c0_i32, %c0_i32_0 : i32, i32
  }
  func.func @transform_2(%arg0: i32) -> (i32, i32) {
    %c0_i32 = arith.constant 0 : i32
    %c0_i32_0 = arith.constant 0 : i32
    %c0_i32_1 = arith.constant 0 : i32
    return %c0_i32, %c0_i32_0 : i32, i32
  }
  func.func @transform_3(%arg0: i32) -> (i32, i32) {
    %c0_i32 = arith.constant 0 : i32
    %c0_i32_0 = arith.constant 0 : i32
    %c0_i32_1 = arith.constant 0 : i32
    return %c0_i32, %c0_i32_0 : i32, i32
  }
  func.func @transform_4(%arg0: i32) -> (i32, i32) {
    %c0_i32 = arith.constant 0 : i32
    %c0_i32_0 = arith.constant 0 : i32
    %c0_i32_1 = arith.constant 0 : i32
    return %c0_i32, %c0_i32_0 : i32, i32
  }
  func.func @transform_5(%arg0: i32) -> (i32, i32) {
    %c0_i32 = arith.constant 0 : i32
    %c0_i32_0 = arith.constant 0 : i32
    %c0_i32_1 = arith.constant 0 : i32
    return %c0_i32, %c0_i32_0 : i32, i32
  }
  func.func @transform_6(%arg0: i32) -> (i32, i32) {
    %c0_i32 = arith.constant 0 : i32
    %c0_i32_0 = arith.constant 0 : i32
    %c0_i32_1 = arith.constant 0 : i32
    return %c0_i32, %c0_i32_0 : i32, i32
  }
  func.func @transform_7(%arg0: i32) -> (i32, i32) {
    %c0_i32 = arith.constant 0 : i32
    %c0_i32_0 = arith.constant 0 : i32
    %c0_i32_1 = arith.constant 0 : i32
    return %c0_i32, %c0_i32_0 : i32, i32
  }
  func.func @transform_8(%arg0: i32) -> (i32, i32) {
    %c0_i32 = arith.constant 0 : i32
    %c0_i32_0 = arith.constant 0 : i32
    %c0_i32_1 = arith.constant 0 : i32
    return %c0_i32, %c0_i32_0 : i32, i32
  }
  func.func @transform_9(%arg0: i32) -> (i32, i32, i32, i32) {
    %c0_i32 = arith.constant 0 : i32
    %c0_i32_0 = arith.constant 0 : i32
    %c0_i32_1 = arith.constant 0 : i32
    %c0_i32_2 = arith.constant 0 : i32
    return %arg0, %c0_i32, %c0_i32_0, %c0_i32_1 : i32, i32, i32, i32
  }
}

</mosaic_0001>

<bundles_post_ra>
// kernel: tpu_custom_call.1
= control target key start
LH: loop header
LB: loop body
LE: loop exit
PB: predicated region body
PF: predicated region fallthrough
CT: control target
= control target key end

     0   :  { %s4142_s30 = smov 0   ;;  %s6944_s0 = inlined_call_operand.vmem [shape: f32[2,16,16,8], index: 0, kind: input, shape index: {}]   ;;  %s6945_s1 = inlined_call_operand.vmem [shape: bf16[8,32], index: 1, kind: input, shape index: {}]   ;;  %s6946_s2 = inlined_call_operand.vmem [shape: f32[1,32], index: 2, kind: input, shape index: {}]   ;;  %s6947_s3 = inlined_call_operand.vmem [shape: f32[9,32], index: 3, kind: input, shape index: {}]   ;;  %s6948_s4 = inlined_call_operand.vmem [shape: f32[1,32], index: 4, kind: input, shape index: {}]   ;;  %s6949_s5 = inlined_call_operand.vmem [shape: bf16[32,8], index: 5, kind: input, shape index: {}]   ;;  %s6950_s6 = inlined_call_operand.vmem [shape: bf16[8,32], index: 6, kind: input, shape index: {}]   ;;  %s6951_s7 = inlined_call_operand.vmem [shape: bf16[32,8], index: 7, kind: input, shape index: {}]   ;;  %s6952_s8 = inlined_call_operand.vmem [shape: f32[1,8], index: 8, kind: input, shape index: {}]   ;;  %s6953_s9 = inlined_call_operand.vmem [shape: f32[2,16,16,8], index: 9, kind: output, shape index: {}]  }
   0x1 LB: > { %s3502_s10 = sadd.s32 4294967295, %s4088_s30   ;;  %p3506_p0 = scmp.ge.s32.totalorder %s4088_s30, 1  ;;  %s4088_s30 = sphi %s4142_s30, %s19_s30  }
   0x2   : > { %p287_p1 = scmp.lt.s32.totalorder %s4088_s30, 3 }
   0x4   : > { %p288_p2 = pnand %p3506_p0, %p287_p1 }
   0x6   : > { %291 = sbr.rel (%p288_p2) target bundleno = 1367 (0x557), region = 56 }
   0xb   : > { %v438_v0 = vld [vmem:[%s6945_s1] sm:$0xf]  ;;  %vm495_vm0 = vcmask 1043456   ;;  %p323_p3 = scmp.lt.s32.totalorder %s3502_s10, 1  ;;  %vm334_vm1 = vcmask 261120   ;;  %v6954_v2 = vmov 0.0  }
   0xc   : > { %3754 = vmatprep.subr.msk.bf16.mxu0 %vm495_vm0, %v438_v0  ;;  %v497_v1 = vsel %vm495_vm0, %v438_v0, 0  ;;  %342 = vst.msk [vmem:[#allocation2 + $0x30] sm:$0xff] %vm334_vm1, %v6954_v2  ;;  %343 = vst.msk [vmem:[#allocation2 + $0x38] sm:$0xff] %vm334_vm1, %v6954_v2  ;;  %3712 = vmatprep.subr.bf16.mxu1 %v6954_v2  ;;  %vm446_vm2 = vcmask 64512   ;;  %vm337_vm3 = vcmask 254976   ;;  %vm1141_vm4 = vcmask 1046528  }
   0xd   : > { %3671 = vmatpush3.bf16.msra.mxu0 %v497_v1  ;;  %s7317_s10 = smov (!%p323_p3, %s3502_s10), 1  ;;  %335 = vst.msk [vmem:[#allocation2] sm:$0xff] %vm334_vm1, %v6954_v2  ;;  %336 = vst.msk [vmem:[#allocation2 + $0x8] sm:$0xff] %vm334_vm1, %v6954_v2  ;;  %v4326_v51 = vld [vmem:[%s6946_s2] ss:$0 sm:$0xff]  ;;  %vm1387_vm5 = vcmask 1045504  }
   0xe   : > { %339 = vst.msk [vmem:[#allocation2 + $0x18] sm:$0xff] %vm334_vm1, %v6954_v2  ;;  %340 = vst.msk [vmem:[#allocation2 + $0x20] sm:$0xff] %vm334_vm1, %v6954_v2  ;;  %3704 = vmatprep.subr.bf16.mxu0 %v6954_v2  ;;  %s3628_s13 = sshll.u32 %s7317_s10, 8  ;;  %vm4091_vm6 = vmmov 0  }
   0xf   : > { %345 = vst.msk [vmem:[#allocation2 + $0x48] sm:$0xff] %vm334_vm1, %v6954_v2  ;;  %346 = vst.msk [vmem:[#allocation2 + $0x50] sm:$0xff] %vm334_vm1, %v6954_v2  ;;  %s4237_s16 = scalar_lea.vmem %s6944_s0, %s3628_s13  ;;  %s6812_s27 = scalar_lea.vmem %s6953_s9, %s3628_s13 }
  0x10   : > { %348 = vst.msk [vmem:[#allocation2 + $0x60] sm:$0xff] %vm334_vm1, %v6954_v2  ;;  %349 = vst.msk [vmem:[#allocation2 + $0x68] sm:$0xff] %vm334_vm1, %v6954_v2  ;;  %v390_v3 = vld [vmem:[%s4237_s16] sm:$0xff]  ;;  %v391_v4 = vld [vmem:[%s4237_s16 + $0x8] sm:$0xff] }
  0x11   : > { %351 = vst.msk [vmem:[#allocation2 + $0x78] sm:$0xff] %vm334_vm1, %v6954_v2  ;;  %352 = vst.msk [vmem:[#allocation2 + $0x80] sm:$0xff] %vm334_vm1, %v6954_v2  ;;  %v392_v5 = vld [vmem:[%s4237_s16 + $0x10] sm:$0xff]  ;;  %v422_v6 = vpack.c.bf16 %v391_v4, %v390_v3  ;;  %v393_v7 = vld [vmem:[%s4237_s16 + $0x18] sm:$0xff] }
  0x12   : > { %354 = vst.msk [vmem:[#allocation2 + $0x90] sm:$0xff] %vm334_vm1, %v6954_v2  ;;  %355 = vst.msk [vmem:[#allocation2 + $0x98] sm:$0xff] %vm334_vm1, %v6954_v2  ;;  %v394_v8 = vld [vmem:[%s4237_s16 + $0x20] sm:$0xff]  ;;  %v395_v9 = vld [vmem:[%s4237_s16 + $0x28] sm:$0xff]  ;;  %v423_v10 = vpack.c.bf16 %v393_v7, %v392_v5 }
  0x13   : > { %357 = vst.msk [vmem:[#allocation2 + $0xa8] sm:$0xff] %vm334_vm1, %v6954_v2  ;;  %358 = vst.msk [vmem:[#allocation2 + $0xb0] sm:$0xff] %vm334_vm1, %v6954_v2  ;;  %v424_v11 = vpack.c.bf16 %v395_v9, %v394_v8  ;;  %3672 = vmatprep.mubr.msk.bf16.mxu0 %vm446_vm2, %v422_v6  ;;  %v396_v12 = vld [vmem:[%s4237_s16 + $0x30] sm:$0xff]  ;;  %v397_v13 = vld [vmem:[%s4237_s16 + $0x38] sm:$0xff] }
  0x14   : > { %360 = vst.msk [vmem:[#allocation2 + $0xc0] sm:$0xff] %vm334_vm1, %v6954_v2  ;;  %361 = vst.msk [vmem:[#allocation2 + $0xc8] sm:$0xff] %vm334_vm1, %v6954_v2  ;;  %3673 = vmatmul.mubr.msk.bf16.vlgmr.msra.gmra.mxu0 %vm446_vm2, %v423_v10  ;;  %v398_v14 = vld [vmem:[%s4237_s16 + $0x40] sm:$0xff]  ;;  %v399_v15 = vld [vmem:[%s4237_s16 + $0x48] sm:$0xff]  ;;  %v425_v16 = vpack.c.bf16 %v397_v13, %v396_v12 }
  0x15   : > { %363 = vst.msk [vmem:[#allocation2 + $0xd8] sm:$0xff] %vm334_vm1, %v6954_v2  ;;  %364 = vst.msk [vmem:[#allocation2 + $0xe0] sm:$0xff] %vm334_vm1, %v6954_v2  ;;  %3676 = vmatprep.mubr.msk.bf16.mxu0 %vm446_vm2, %v424_v11  ;;  %v426_v17 = vpack.c.bf16 %v399_v15, %v398_v14  ;;  %v400_v18 = vld [vmem:[%s4237_s16 + $0x50] sm:$0xff]  ;;  %v401_v19 = vld [vmem:[%s4237_s16 + $0x58] sm:$0xff] }
  0x16   : > { %366 = vst.msk [vmem:[#allocation2 + $0xf0] sm:$0xff] %vm334_vm1, %v6954_v2  ;;  %367 = vst.msk [vmem:[#allocation2 + $0xf8] sm:$0xff] %vm334_vm1, %v6954_v2  ;;  %v402_v20 = vld [vmem:[%s4237_s16 + $0x60] sm:$0xff]  ;;  %v403_v21 = vld [vmem:[%s4237_s16 + $0x68] sm:$0xff]  ;;  %v427_v22 = vpack.c.bf16 %v401_v19, %v400_v18 }
  0x17   : > { %369 = vst.msk [vmem:[#allocation2 + $0x108] sm:$0xff] %vm334_vm1, %v6954_v2  ;;  %370 = vst.msk [vmem:[#allocation2 + $0x110] sm:$0xff] %vm334_vm1, %v6954_v2  ;;  %v428_v23 = vpack.c.bf16 %v403_v21, %v402_v20  ;;  %v404_v24 = vld [vmem:[%s4237_s16 + $0x70] sm:$0xff]  ;;  %v405_v25 = vld [vmem:[%s4237_s16 + $0x78] sm:$0xff] }
  0x18   : > { %372 = vst.msk [vmem:[#allocation2 + $0x120] sm:$0xff] %vm334_vm1, %v6954_v2  ;;  %373 = vst.msk [vmem:[#allocation2 + $0x128] sm:$0xff] %vm334_vm1, %v6954_v2  ;;  %v406_v26 = vld [vmem:[%s4237_s16 + $0x80] sm:$0xff]  ;;  %v407_v27 = vld [vmem:[%s4237_s16 + $0x88] sm:$0xff]  ;;  %v429_v28 = vpack.c.bf16 %v405_v25, %v404_v24 }
  0x19   : > { %375 = vst.msk [vmem:[#allocation2 + $0x138] sm:$0xff] %vm334_vm1, %v6954_v2  ;;  %376 = vst.msk [vmem:[#allocation2 + $0x140] sm:$0xff] %vm334_vm1, %v6954_v2  ;;  %v430_v29 = vpack.c.bf16 %v407_v27, %v406_v26  ;;  %v408_v30 = vld [vmem:[%s4237_s16 + $0x90] sm:$0xff]  ;;  %v409_v31 = vld [vmem:[%s4237_s16 + $0x98] sm:$0xff] }
  0x1a   : > { %378 = vst.msk [vmem:[#allocation2 + $0x150] sm:$0xff] %vm334_vm1, %v6954_v2  ;;  %379 = vst.msk [vmem:[#allocation2 + $0x158] sm:$0xff] %vm334_vm1, %v6954_v2  ;;  %v410_v32 = vld [vmem:[%s4237_s16 + $0xa0] sm:$0xff]  ;;  %v411_v33 = vld [vmem:[%s4237_s16 + $0xa8] sm:$0xff]  ;;  %v431_v34 = vpack.c.bf16 %v409_v31, %v408_v30 }
  0x1b   : > { %381 = vst.msk [vmem:[#allocation2 + $0x168] sm:$0xff] %vm334_vm1, %v6954_v2  ;;  %382 = vst.msk [vmem:[#allocation2 + $0x170] sm:$0xff] %vm334_vm1, %v6954_v2  ;;  %v432_v35 = vpack.c.bf16 %v411_v33, %v410_v32  ;;  %v412_v36 = vld [vmem:[%s4237_s16 + $0xb0] sm:$0xff]  ;;  %v413_v37 = vld [vmem:[%s4237_s16 + $0xb8] sm:$0xff] }
  0x1c   : > { %384 = vst.msk [vmem:[#allocation2 + $0x180] sm:$0xff] %vm334_vm1, %v6954_v2  ;;  %385 = vst.msk [vmem:[#allocation2 + $0x188] sm:$0xff] %vm334_vm1, %v6954_v2  ;;  %3677 = vmatmul.mubr.msk.bf16.gmra.mxu0 %vm446_vm2, %v425_v16  ;;  %v414_v38 = vld [vmem:[%s4237_s16 + $0xc0] sm:$0xff]  ;;  %v415_v39 = vld [vmem:[%s4237_s16 + $0xc8] sm:$0xff]  ;;  %v433_v40 = vpack.c.bf16 %v413_v37, %v412_v36 }
  0x1d   : > { %387 = vst.msk [vmem:[#allocation2 + $0x198] sm:$0xff] %vm334_vm1, %v6954_v2  ;;  %388 = vst.msk [vmem:[#allocation2 + $0x1a0] sm:$0xff] %vm334_vm1, %v6954_v2  ;;  %3680 = vmatprep.mubr.msk.bf16.mxu0 %vm446_vm2, %v426_v17  ;;  %v434_v41 = vpack.c.bf16 %v415_v39, %v414_v38  ;;  %v416_v42 = vld [vmem:[%s4237_s16 + $0xd0] sm:$0xff]  ;;  %v417_v43 = vld [vmem:[%s4237_s16 + $0xd8] sm:$0xff] }
  0x1e   : > { %v418_v44 = vld [vmem:[%s4237_s16 + $0xe0] sm:$0xff]  ;;  %v419_v45 = vld [vmem:[%s4237_s16 + $0xe8] sm:$0xff]  ;;  %v435_v46 = vpack.c.bf16 %v417_v43, %v416_v42  ;;  %v420_v48 = vld [vmem:[%s4237_s16 + $0xf0] sm:$0xff]  ;;  %344 = vst.msk [vmem:[#allocation2 + $0x40] sm:$0x3] %vm337_vm3, %v6954_v2 }
  0x1f   : > { %v436_v47 = vpack.c.bf16 %v419_v45, %v418_v44  ;;  %v421_v49 = vld [vmem:[%s4237_s16 + $0xf8] sm:$0xff]  ;;  %338 = vst.msk [vmem:[#allocation2 + $0x10] sm:$0x3] %vm337_vm3, %v6954_v2  ;;  %341 = vst.msk [vmem:[#allocation2 + $0x28] sm:$0x3] %vm337_vm3, %v6954_v2 }
  0x20   : > { %v437_v50 = vpack.c.bf16 %v421_v49, %v420_v48  ;;  %347 = vst.msk [vmem:[#allocation2 + $0x58] sm:$0x3] %vm337_vm3, %v6954_v2  ;;  %350 = vst.msk [vmem:[#allocation2 + $0x70] sm:$0x3] %vm337_vm3, %v6954_v2  ;;  %v4369_v45 = vld [vmem:[%s6947_s3 + $0x1] ss:$0 sm:$0xff] }
  0x21   : > { %353 = vst.msk [vmem:[#allocation2 + $0x88] sm:$0x3] %vm337_vm3, %v6954_v2  ;;  %356 = vst.msk [vmem:[#allocation2 + $0xa0] sm:$0x3] %vm337_vm3, %v6954_v2  ;;  %v918_v48 = vld [vmem:[#allocation2 + $0x8] sm:$0xff] }
  0x22   : > { %359 = vst.msk [vmem:[#allocation2 + $0xb8] sm:$0x3] %vm337_vm3, %v6954_v2  ;;  %362 = vst.msk [vmem:[#allocation2 + $0xd0] sm:$0x3] %vm337_vm3, %v6954_v2 }
  0x23   : > { %365 = vst.msk [vmem:[#allocation2 + $0xe8] sm:$0x3] %vm337_vm3, %v6954_v2  ;;  %368 = vst.msk [vmem:[#allocation2 + $0x100] sm:$0x3] %vm337_vm3, %v6954_v2 }
  0x24   : > { %3681 = vmatmul.mubr.msk.bf16.gmra.mxu0 %vm446_vm2, %v427_v22  ;;  %371 = vst.msk [vmem:[#allocation2 + $0x118] sm:$0x3] %vm337_vm3, %v6954_v2  ;;  %374 = vst.msk [vmem:[#allocation2 + $0x130] sm:$0x3] %vm337_vm3, %v6954_v2 }
  0x25   : > { %3684 = vmatprep.mubr.msk.bf16.mxu0 %vm446_vm2, %v428_v23  ;;  %377 = vst.msk [vmem:[#allocation2 + $0x148] sm:$0x3] %vm337_vm3, %v6954_v2  ;;  %380 = vst.msk [vmem:[#allocation2 + $0x160] sm:$0x3] %vm337_vm3, %v6954_v2 }
  0x26   : > { %383 = vst.msk [vmem:[#allocation2 + $0x178] sm:$0x3] %vm337_vm3, %v6954_v2  ;;  %386 = vst.msk [vmem:[#allocation2 + $0x190] sm:$0x3] %vm337_vm3, %v6954_v2 }
  0x27   : > { %389 = vst.msk [vmem:[#allocation2 + $0x1a8] sm:$0x3] %vm337_vm3, %v6954_v2 }
  0x2c   : > { %3685 = vmatmul.mubr.msk.bf16.gmra.mxu0 %vm446_vm2, %v429_v28 }
  0x2d   : > { %3688 = vmatprep.mubr.msk.bf16.mxu0 %vm446_vm2, %v430_v29 }
  0x34   : > { %3689 = vmatmul.mubr.msk.bf16.gmra.mxu0 %vm446_vm2, %v431_v34 }
  0x35   : > { %3692 = vmatprep.mubr.msk.bf16.mxu0 %vm446_vm2, %v432_v35 }
  0x3c   : > { %3693 = vmatmul.mubr.msk.bf16.gmra.mxu0 %vm446_vm2, %v433_v40 }
  0x3d   : > { %3696 = vmatprep.mubr.msk.bf16.mxu0 %vm446_vm2, %v434_v41 }
  0x44   : > { %3697 = vmatmul.mubr.msk.bf16.gmra.mxu0 %vm446_vm2, %v435_v46  ;;  %v917_v46 = vld [vmem:[#allocation2] sm:$0xff] }
  0x45   : > { %3700 = vmatprep.mubr.msk.bf16.mxu0 %vm446_vm2, %v436_v47 }
  0x4c   : > { %3701 = vmatmul.mubr.msk.bf16.gmra.mxu0 %vm446_vm2, %v437_v50 }
  0xd4   : > { %v3674_v52 = vpop.f32.mrf.mxu0 }
  0xd5   : > { %v542_v53 = vadd.f32 %v3674_v52, %v4326_v51  ;;  %v1045_v52 = vmul.f32 %v4369_v45, %v917_v46 }
  0xd6   : > { %v533_v54 = vpop.f32.mrf.mxu0 }
  0xd7   : > { %v3530_v55 = vmul.f32 -1.442695, %v542_v53  ;;  %v534_v56 = vadd.f32 %v4326_v51, %v533_v54 }
  0xd8   : > { %v3675_v57 = vpop.f32.mrf.mxu0 }
  0xd9   : > { %3769 = vpow2.f32 %v3530_v55  ;;  %v3528_v58 = vmul.f32 -1.442695, %v534_v56  ;;  %v545_v59 = vadd.f32 %v3675_v57, %v4326_v51  ;;  %v1046_v55 = vmul.f32 %v4369_v45, %v918_v48 }
  0xda   : > { %v536_v60 = vpop.f32.mrf.mxu0 }
  0xdb   : > { %3771 = vpow2.f32 %v3528_v58  ;;  %v3531_v61 = vmul.f32 -1.442695, %v545_v59  ;;  %v537_v62 = vadd.f32 %v4326_v51, %v536_v60  ;;  %v4376_v58 = vld [vmem:[%s6947_s3 + $0x2] ss:$0 sm:$0xff] }
  0xdc   : > { %v3678_v63 = vpop.f32.mrf.mxu0 }
  0xdd   : > { %3773 = vpow2.f32 %v3531_v61  ;;  %v3529_v0 = vmul.f32 -1.442695, %v537_v62  ;;  %v558_v1 = vadd.f32 %v3678_v63, %v4326_v51 }
  0xde   : > { %v549_v3 = vpop.f32.mrf.mxu0 }
  0xdf   : > { %3775 = vpow2.f32 %v3529_v0  ;;  %v3534_v4 = vmul.f32 -1.442695, %v558_v1  ;;  %v4334_v20 = vadd.f32 %v4326_v51, %v549_v3  ;;  %v1142_v0 = vrot.slane %v1045_v52, 1 }
  0xe0   : > { %v3679_v5 = vpop.f32.mrf.mxu0  ;;  %v1143_v3 = vrot.slane %v1046_v55, 1 }
  0xe1   : > { %3777 = vpow2.f32 %v3534_v4  ;;  %v4337_v21 = vadd.f32 %v3679_v5, %v4326_v51  ;;  %v3532_v25 = vmul.f32 -1.442695, %v4334_v20  ;;  %v1291_v4 = vmul.f32 %v4376_v58, %v917_v46 }
  0xe2   : > { %v552_v6 = vpop.f32.mrf.mxu0 }
  0xe3   : > { %v4340_v22 = vadd.f32 %v4326_v51, %v552_v6  ;;  %v3535_v28 = vmul.f32 -1.442695, %v4337_v21 }
  0xe4   : > { %v3682_v10 = vpop.f32.mrf.mxu0 }
  0xe5   : > { %v4343_v23 = vadd.f32 %v3682_v10, %v4326_v51  ;;  %v3533_v31 = vmul.f32 -1.442695, %v4340_v22 }
  0xe6   : > { %v3770_v7 = vpop.eup %3769  ;;  %v565_v15 = vpop.f32.mrf.mxu0 }
  0xe7   : > { %v758_v8 = vadd.f32 1.0, %v3770_v7  ;;  %v4347_v26 = vadd.f32 %v4326_v51, %v565_v15  ;;  %v3538_v34 = vmul.f32 -1.442695, %v4343_v23  ;;  %v4383_v7 = vld [vmem:[%s6947_s3] ss:$0 sm:$0xff] }
  0xe8   : > { %v3772_v9 = vpop.eup %3771  ;;  %v3683_v19 = vpop.f32.mrf.mxu0 }
  0xe9   : > { %3779 = vrcp.f32 %v758_v8  ;;  %v756_v11 = vadd.f32 1.0, %v3772_v9  ;;  %v4351_v29 = vadd.f32 %v3683_v19, %v4326_v51  ;;  %v3536_v36 = vmul.f32 -1.442695, %v4347_v26 }
  0xea   : > { %v3774_v12 = vpop.eup %3773  ;;  %v568_v24 = vpop.f32.mrf.mxu0  ;;  %v1292_v8 = vmul.f32 %v4376_v58, %v918_v48  ;;  %v977_v19 = vmul.f32 %v4383_v7, %v918_v48  ;;  %v4424_v48 = vld [vmem:[%s6947_s3 + $0x5] ss:$0 sm:$0xff] }
  0xeb   : > { %3781 = vrcp.f32 %v756_v11  ;;  %v759_v13 = vadd.f32 1.0, %v3774_v12  ;;  %v4355_v32 = vadd.f32 %v4326_v51, %v568_v24  ;;  %v3539_v38 = vmul.f32 -1.442695, %v4351_v29 }
  0xec   : > { %v3776_v14 = vpop.eup %3775  ;;  %v3686_v6 = vpop.f32.mrf.mxu0 }
  0xed   : > { %3783 = vrcp.f32 %v759_v13  ;;  %v757_v16 = vadd.f32 1.0, %v3776_v14  ;;  %v3537_v40 = vmul.f32 -1.442695, %v4355_v32  ;;  %v976_v13 = vmul.f32 %v4383_v7, %v917_v46 }
  0xee   : > { %v3778_v17 = vpop.eup %3777  ;;  %v1144_v14 = vsel %vm1141_vm4, %v1142_v0, %v1143_v3  ;;  %v581_v15 = vpop.f32.mrf.mxu0 }
  0xef   : > { %3785 = vrcp.f32 %v757_v16  ;;  %v762_v18 = vadd.f32 1.0, %v3778_v17  ;;  %v1388_v16 = vrot.slane %v1291_v4, 2  ;;  %v1389_v17 = vrot.slane %v1292_v8, 2 }
  0xf1   : > { %3787 = vrcp.f32 %v762_v18 }
  0xf2   : > { %3789 = vpow2.f32 %v3532_v25 }
  0xf3   : > { %3791 = vpow2.f32 %v3535_v28 }
  0xf4   : > { %3793 = vpow2.f32 %v3533_v31  ;;  %v1254_v31 = vadd.f32 %v1144_v14, %v976_v13 }
  0xf5   : > { %3795 = vpow2.f32 %v3538_v34  ;;  %v3687_v34 = vpop.f32.mrf.mxu0 }
  0xf6   : > { %v3780_v27 = vpop.eup %3779  ;;  %3797 = vpow2.f32 %v3536_v36 }
  0xf7   : > { %v854_v30 = vmul.f32 %v3780_v27, %v542_v53  ;;  %3799 = vpow2.f32 %v3539_v38  ;;  %v919_v53 = vld [vmem:[#allocation2 + $0x10] sm:$0x3]  ;;  %v4396_v27 = vld [vmem:[%s6947_s3 + $0x4] ss:$0 sm:$0xff]  ;;  %v584_v46 = vpop.f32.mrf.mxu0 }
  0xf8   : > { %v3782_v33 = vpop.eup %3781  ;;  %3801 = vpow2.f32 %v3537_v40  ;;  %v1047_v61 = vmul.f32 %v4369_v45, %v919_v53  ;;  %v1293_v11 = vmul.f32 %v4376_v58, %v919_v53 }
  0xf9   : > { %887 = vst.msk [vmem:[#allocation2 + $0x31] sm:$0xff] %vm334_vm1, %v854_v30  ;;  %v852_v35 = vmul.f32 %v3782_v33, %v534_v56 }
  0xfa   : > { %v3784_v37 = vpop.eup %3783  ;;  %v1145_v10 = vrot.slane %v1047_v61, 1  ;;  %v1391_v25 = vrot.slane %v1293_v11, 2 }
  0xfb   : > { %885 = vst.msk [vmem:[#allocation2 + $0x19] sm:$0xff] %vm334_vm1, %v852_v35  ;;  %v855_v39 = vmul.f32 %v3784_v37, %v545_v59  ;;  %v1390_v35 = vsel %vm1387_vm5, %v1388_v16, %v1389_v17  ;;  %v4406_v37 = vadd.f32 %v3686_v6, %v4326_v51 }
  0xfc   : > { %v3786_v41 = vpop.eup %3785  ;;  %v1146_v24 = vsel %vm1141_vm4, %v1143_v3, %v1145_v10 }
  0xfd   : > { %888 = vst.msk [vmem:[#allocation2 + $0x39] sm:$0xff] %vm334_vm1, %v855_v39  ;;  %v853_v42 = vmul.f32 %v3786_v41, %v537_v62  ;;  %v1255_v36 = vadd.f32 %v1146_v24, %v977_v19  ;;  %v1392_v39 = vsel %vm1387_vm5, %v1389_v17, %v1391_v25  ;;  %v4414_v41 = vadd.f32 %v4326_v51, %v581_v15  ;;  %v4456_v24 = vld [vmem:[%s6947_s3 + $0x7] ss:$0 sm:$0xff] }
  0xfe   : > { %v3788_v43 = vpop.eup %3787  ;;  %v3542_v53 = vmul.f32 -1.442695, %v4406_v37 }
  0xff   : > { %886 = vst.msk [vmem:[#allocation2 + $0x21] sm:$0xff] %vm334_vm1, %v853_v42  ;;  %v858_v44 = vmul.f32 %v3788_v43, %v558_v1  ;;  %v3790_v47 = vpop.eup %3789  ;;  %v1500_v42 = vadd.f32 %v1390_v35, %v1254_v31  ;;  %v4419_v43 = vld [vmem:[%s6947_s3 + $0x3] ss:$0 sm:$0xff]  ;;  %v3540_v61 = vmul.f32 -1.442695, %v4414_v41 }
 0x100   : > { %v3792_v49 = vpop.eup %3791  ;;  %v760_v56 = vadd.f32 1.0, %v3790_v47  ;;  %v4451_v19 = vld [vmem:[#allocation2 + $0x30] sm:$0xff] }
 0x101   : > { %891 = vst.msk [vmem:[#allocation2 + $0x61] sm:$0xff] %vm334_vm1, %v858_v44  ;;  %v3794_v50 = vpop.eup %3793  ;;  %v763_v59 = vadd.f32 1.0, %v3792_v49 }
 0x102   : > { %v3796_v54 = vpop.eup %3795  ;;  %v761_v62 = vadd.f32 1.0, %v3794_v50  ;;  %3803 = vrcp.f32 %v760_v56  ;;  %v4398_v28 = vld [vmem:[#allocation2 + $0x18] sm:$0xff]  ;;  %v1501_v50 = vadd.f32 %v1392_v39, %v1255_v36 }
 0x103   : > { %v3798_v57 = vpop.eup %3797  ;;  %v766_v1 = vadd.f32 1.0, %v3796_v54  ;;  %3805 = vrcp.f32 %v763_v59  ;;  %v1606_v38 = vmul.f32 %v4396_v27, %v4398_v28  ;;  %v1537_v49 = vmul.f32 %v4419_v43, %v4398_v28 }
 0x104   : > { %v3800_v60 = vpop.eup %3799  ;;  %v764_v5 = vadd.f32 1.0, %v3798_v57  ;;  %3807 = vrcp.f32 %v761_v62  ;;  %v4434_v59 = vadd.f32 %v3687_v34, %v4326_v51  ;;  %v4438_v62 = vadd.f32 %v4326_v51, %v584_v46  ;;  %v4447_v14 = vld [vmem:[#allocation2 + $0x38] sm:$0xff]  ;;  %v4460_v35 = vld [vmem:[#allocation2 + $0x40] sm:$0x3]  ;;  %v4487_v46 = vld [vmem:[%s6947_s3 + $0x8] ss:$0 sm:$0xff] }
 0x105   : > { %v3802_v63 = vpop.eup %3801  ;;  %v767_v9 = vadd.f32 1.0, %v3800_v60  ;;  %3809 = vrcp.f32 %v766_v1  ;;  %v1702_v55 = vrot.slane %v1606_v38, 1  ;;  %v1851_v0 = vmul.f32 %v4424_v48, %v4398_v28 }
 0x106   : > { %v765_v12 = vadd.f32 1.0, %v3802_v63  ;;  %3811 = vrcp.f32 %v764_v5  ;;  %v4389_v18 = vld [vmem:[#allocation2 + $0x20] sm:$0xff]  ;;  %v4400_v30 = vld [vmem:[#allocation2 + $0x28] sm:$0x3]  ;;  %7022 = vst [vmem:[#allocation3_spill] sm:$0xff] %v4434_v59  ;;  %7023 = vst [vmem:[#allocation4_spill] sm:$0xff] %v4438_v62  ;;  %v1569_v5 = vadd.f32 %v1537_v49, %v1500_v42 }
 0x107   : > { %3813 = vrcp.f32 %v767_v9  ;;  %v1607_v33 = vmul.f32 %v4396_v27, %v4389_v18  ;;  %v1608_v40 = vmul.f32 %v4396_v27, %v4400_v30  ;;  %v1538_v52 = vmul.f32 %v4419_v43, %v4389_v18 }
 0x108   : > { %3815 = vrcp.f32 %v765_v12  ;;  %v1852_v57 = vmul.f32 %v4424_v48, %v4389_v18  ;;  %v1853_v3 = vmul.f32 %v4424_v48, %v4400_v30  ;;  %v3543_v11 = vmul.f32 -1.442695, %v4434_v59  ;;  %v3690_v12 = vpop.f32.mrf.mxu0 }
 0x109   : > { %v1703_v44 = vrot.slane %v1607_v33, 1  ;;  %v1705_v56 = vrot.slane %v1608_v40, 1  ;;  %v1570_v6 = vadd.f32 %v1538_v52, %v1501_v50  ;;  %3817 = vpow2.f32 %v3542_v53 }
 0x10a   : > { %v1948_v10 = vrot.slane %v1852_v57, 2  ;;  %3819 = vpow2.f32 %v3540_v61  ;;  %v3541_v17 = vmul.f32 -1.442695, %v4438_v62  ;;  %v1947_v25 = vrot.slane %v1851_v0, 2 }
 0x10b   : > { %v1704_v1 = vsel %vm1141_vm4, %v1702_v55, %v1703_v44  ;;  %v1706_v9 = vsel %vm1141_vm4, %v1703_v44, %v1705_v56  ;;  %v1950_v31 = vrot.slane %v1853_v3, 2  ;;  %v4466_v39 = vadd.f32 %v3690_v12, %v4326_v51 }
 0x10c   : > { %v1814_v15 = vadd.f32 %v1704_v1, %v1569_v5  ;;  %v1815_v36 = vadd.f32 %v1706_v9, %v1570_v6  ;;  %v2166_v40 = vmul.f32 %v4456_v24, %v4447_v14  ;;  %v1949_v42 = vsel %vm1387_vm5, %v1947_v25, %v1948_v10 }
 0x10d   : > { %7024 = vst [vmem:[#allocation5_spill] sm:$0xff] %v4466_v39  ;;  %3821 = vpow2.f32 %v3543_v11  ;;  %v1951_v49 = vsel %vm1387_vm5, %v1948_v10, %v1950_v31  ;;  %v1048_v50 = vmul.f32 %v4369_v45, %v4398_v28  ;;  %v2411_v56 = vmul.f32 %v4487_v46, %v4447_v14 }
 0x10e   : > { %v2059_v44 = vadd.f32 %v1949_v42, %v1814_v15  ;;  %v2060_v52 = vadd.f32 %v1951_v49, %v1815_v36  ;;  %v2262_v55 = vrot.slane %v2166_v40, 1  ;;  %3823 = vpow2.f32 %v3541_v17 }
 0x10f   : > { %v3804_v47 = vpop.eup %3803  ;;  %v2412_v1 = vmul.f32 %v4487_v46, %v4460_v35  ;;  %v1051_v5 = vmul.f32 %v4369_v45, %v4451_v19  ;;  %v1147_v6 = vrot.slane %v1048_v50, 1  ;;  %v2507_v9 = vrot.slane %v2411_v56, 2 }
 0x110   : > { %v3806_v54 = vpop.eup %3805  ;;  %v856_v16 = vmul.f32 %v3804_v47, %v4334_v20  ;;  %v2167_v47 = vmul.f32 %v4456_v24, %v4460_v35  ;;  %v1295_v10 = vmul.f32 %v4376_v58, %v4389_v18  ;;  %v1296_v11 = vmul.f32 %v4376_v58, %v4400_v30 }
 0x111   : > { %v3808_v60 = vpop.eup %3807  ;;  %v859_v33 = vmul.f32 %v3806_v54, %v4337_v21  ;;  %v4474_v21 = vld [vmem:[%s6947_s3 + $0x6] ss:$0 sm:$0xff]  ;;  %v3546_v54 = vmul.f32 -1.442695, %v4466_v39  ;;  %v1052_v17 = vmul.f32 %v4369_v45, %v4447_v14  ;;  %v979_v40 = vmul.f32 %v4383_v7, %v4389_v18 }
 0x112   : > { %v3810_v63 = vpop.eup %3809  ;;  %v857_v34 = vmul.f32 %v3808_v60, %v4340_v22  ;;  %889 = vst.msk [vmem:[#allocation2 + $0x49] sm:$0xff] %vm334_vm1, %v856_v16  ;;  %v2096_v53 = vmul.f32 %v4474_v21, %v4451_v19  ;;  %v2410_v60 = vmul.f32 %v4487_v46, %v4451_v19  ;;  %v2097_v61 = vmul.f32 %v4474_v21, %v4447_v14 }
 0x113   : > { %v3812_v4 = vpop.eup %3811  ;;  %v862_v20 = vmul.f32 %v3810_v63, %v4343_v23  ;;  %892 = vst.msk [vmem:[#allocation2 + $0x69] sm:$0xff] %vm334_vm1, %v859_v33  ;;  %v2264_v0 = vrot.slane %v2167_v47, 1  ;;  %3825 = vpow2.f32 %v3546_v54  ;;  %v1294_v16 = vmul.f32 %v4376_v58, %v4398_v28  ;;  %v4548_v54 = vld [vmem:[%s6948_s4] ss:$0 sm:$0xff] }
 0x114   : > { %v3814_v8 = vpop.eup %3813  ;;  %v860_v38 = vmul.f32 %v3812_v4, %v4347_v26  ;;  %890 = vst.msk [vmem:[#allocation2 + $0x51] sm:$0xff] %vm334_vm1, %v857_v34  ;;  %v2165_v26 = vmul.f32 %v4456_v24, %v4451_v19  ;;  %v2128_v63 = vadd.f32 %v2096_v53, %v2059_v44  ;;  %v2506_v15 = vrot.slane %v2410_v60, 2 }
 0x115   : > { %v3816_v13 = vpop.eup %3815  ;;  %v863_v22 = vmul.f32 %v3814_v8, %v4351_v29  ;;  %895 = vst.msk [vmem:[#allocation2 + $0x91] sm:$0xff] %vm334_vm1, %v862_v20  ;;  %v1049_v29 = vmul.f32 %v4369_v45, %v4389_v18  ;;  %v2129_v8 = vadd.f32 %v2097_v61, %v2060_v52  ;;  %v2265_v33 = vsel %vm1141_vm4, %v2262_v55, %v2264_v0 }
 0x116   : > { %v861_v23 = vmul.f32 %v3816_v13, %v4355_v32  ;;  %893 = vst.msk [vmem:[#allocation2 + $0x79] sm:$0xff] %vm334_vm1, %v860_v38  ;;  %v1050_v32 = vmul.f32 %v4369_v45, %v4400_v30  ;;  %v2261_v57 = vrot.slane %v2165_v26, 1  ;;  %v4518_v13 = vpop.eup %3817  ;;  %v2509_v34 = vrot.slane %v2412_v1, 2 }
 0x117   : > { %896 = vst.msk [vmem:[#allocation2 + $0x99] sm:$0xff] %vm334_vm1, %v863_v22  ;;  %v1148_v3 = vrot.slane %v1049_v29, 1  ;;  %v4524_v31 = vpop.eup %3819  ;;  %v978_v20 = vmul.f32 %v4383_v7, %v4398_v28  ;;  %v1053_v38 = vmul.f32 %v4369_v45, %v4460_v35  ;;  %v2374_v42 = vadd.f32 %v2265_v33, %v2129_v8 }
 0x118   : > { %894 = vst.msk [vmem:[#allocation2 + $0x81] sm:$0xff] %vm334_vm1, %v861_v23  ;;  %v1150_v4 = vrot.slane %v1050_v32, 1  ;;  %v2263_v12 = vsel %vm1141_vm4, %v2261_v57, %v2262_v55  ;;  %v980_v22 = vmul.f32 %v4383_v7, %v4451_v19  ;;  %v1394_v23 = vrot.slane %v1295_v10, 2 }
 0x119   : > { %v2373_v25 = vadd.f32 %v2263_v12, %v2128_v63  ;;  %v1149_v36 = vsel %vm1141_vm4, %v1147_v6, %v1148_v3  ;;  %v1396_v26 = vrot.slane %v1296_v11, 2  ;;  %v2508_v44 = vsel %vm1387_vm5, %v2506_v15, %v2507_v9 }
 0x11a   : > { %v1151_v30 = vsel %vm1141_vm4, %v1148_v3, %v1150_v4  ;;  %v1297_v47 = vmul.f32 %v4376_v58, %v4451_v19  ;;  %v1256_v29 = vadd.f32 %v1149_v36, %v978_v20  ;;  %v4540_v49 = vpop.eup %3821  ;;  %v1609_v50 = vmul.f32 %v4396_v27, %v4451_v19 }
 0x11b   : > { %v1257_v32 = vadd.f32 %v1151_v30, %v979_v40  ;;  %v2618_v28 = vadd.f32 %v2508_v44, %v2373_v25  ;;  %v1393_v18 = vrot.slane %v1294_v16, 2  ;;  %v1153_v52 = vrot.slane %v1052_v17, 1  ;;  %v4558_v3 = vpop.eup %3823 }
 0x11c   : > { %v2510_v53 = vsel %vm1387_vm5, %v2507_v9, %v2509_v34  ;;  %v1152_v55 = vrot.slane %v1051_v5, 1  ;;  %v1155_v56 = vrot.slane %v1053_v38, 1  ;;  %v1298_v57 = vmul.f32 %v4376_v58, %v4447_v14 }
 0x11d   : > { %v2619_v60 = vadd.f32 %v2510_v53, %v2374_v42  ;;  %v1610_v61 = vmul.f32 %v4396_v27, %v4447_v14  ;;  %v1611_v63 = vmul.f32 %v4396_v27, %v4460_v35  ;;  %v1395_v0 = vsel %vm1387_vm5, %v1393_v18, %v1394_v23  ;;  %v929_v18 = vld [vmem:[#allocation2 + $0x60] sm:$0xff] }
 0x11e   : > { %v1397_v1 = vsel %vm1387_vm5, %v1394_v23, %v1396_v26  ;;  %v1299_v4 = vmul.f32 %v4376_v58, %v4460_v35  ;;  %v1502_v5 = vadd.f32 %v1395_v0, %v1256_v29  ;;  %v4563_v8 = vadd.f32 %v4548_v54, %v2618_v28 }
 0x11f   : > { %v1503_v6 = vadd.f32 %v1397_v1, %v1257_v32  ;;  %v1398_v9 = vrot.slane %v1297_v47, 2  ;;  %v981_v10 = vmul.f32 %v4383_v7, %v4447_v14  ;;  %v1154_v11 = vsel %vm1141_vm4, %v1152_v55, %v1153_v52 }
 0x120   : > { %v1539_v12 = vmul.f32 %v4419_v43, %v4451_v19  ;;  %v1156_v15 = vsel %vm1141_vm4, %v1153_v52, %v1155_v56  ;;  %v1399_v16 = vrot.slane %v1298_v57, 2  ;;  %v1540_v17 = vmul.f32 %v4419_v43, %v4447_v14  ;;  %v3826_v33 = vpop.eup %3825  ;;  %v597_v52 = vpop.f32.mrf.mxu0 }
 0x121   : > { %v4574_v25 = vadd.f32 %v4548_v54, %v2619_v60  ;;  %v1708_v34 = vrot.slane %v1610_v61, 1  ;;  %v1710_v36 = vrot.slane %v1611_v63, 1  ;;  %v1855_v30 = vmul.f32 %v4424_v48, %v4447_v14 }
 0x122   : > { %v1856_v20 = vmul.f32 %v4424_v48, %v4460_v35  ;;  %v1401_v38 = vrot.slane %v1299_v4, 2  ;;  %v1571_v40 = vadd.f32 %v1539_v12, %v1502_v5  ;;  %v1572_v42 = vadd.f32 %v1540_v17, %v1503_v6  ;;  %v3691_v4 = vpop.f32.mrf.mxu0 }
 0x123   : > { %v3570_v23 = vmul.f32 -1.442695, %v4563_v8  ;;  %v1707_v26 = vrot.slane %v1609_v50, 1  ;;  %v1854_v44 = vmul.f32 %v4424_v48, %v4451_v19  ;;  %v1258_v47 = vadd.f32 %v1154_v11, %v980_v22 }
 0x124   : > { %v1259_v29 = vadd.f32 %v1156_v15, %v981_v10  ;;  %v1400_v32 = vsel %vm1387_vm5, %v1398_v9, %v1399_v16  ;;  %v3571_v28 = vmul.f32 -1.442695, %v4574_v25  ;;  %v770_v14 = vadd.f32 1.0, %v4518_v13 }
 0x125   : > { %v1711_v35 = vsel %vm1141_vm4, %v1708_v34, %v1710_v36  ;;  %v1953_v53 = vrot.slane %v1855_v30, 2  ;;  %v1955_v55 = vrot.slane %v1856_v20, 2  ;;  %v1709_v56 = vsel %vm1141_vm4, %v1707_v26, %v1708_v34  ;;  %v4635_v26 = vld [vmem:[#allocation2 + $0x58] sm:$0x3] }
 0x126   : > { %v1402_v50 = vsel %vm1387_vm5, %v1399_v16, %v1401_v38  ;;  %v1816_v57 = vadd.f32 %v1709_v56, %v1571_v40  ;;  %v1817_v19 = vadd.f32 %v1711_v35, %v1572_v42  ;;  %3827 = vpow2.f32 %v3570_v23  ;;  %v4616_v16 = vld [vmem:[#allocation2 + $0x50] sm:$0xff] }
 0x127   : > { %v1952_v22 = vrot.slane %v1854_v44, 2  ;;  %v1504_v60 = vadd.f32 %v1400_v32, %v1258_v47  ;;  %v4589_v61 = vadd.f32 %v1402_v50, %v1259_v29  ;;  %v4592_v63 = vmul.f32 %v4369_v45, %v929_v18  ;;  %v4683_v32 = vld [vmem:[#allocation2 + $0x68] sm:$0xff] }
 0x128   : > { %3829 = vpow2.f32 %v3571_v28  ;;  %v4595_v13 = vmul.f32 %v4376_v58, %v929_v18  ;;  %v4598_v0 = vmul.f32 %v4396_v27, %v929_v18  ;;  %v4601_v1 = vmul.f32 %v4424_v48, %v929_v18 }
 0x129   : > { %v1956_v5 = vsel %vm1387_vm5, %v1953_v53, %v1955_v55  ;;  %v1954_v6 = vsel %vm1387_vm5, %v1952_v22, %v1953_v53  ;;  %v4606_v9 = vmul.f32 %v4383_v7, %v929_v18  ;;  %v4609_v10 = vmul.f32 %v4456_v24, %v929_v18 }
 0x12a   : > { %v2061_v11 = vadd.f32 %v1954_v6, %v1816_v57  ;;  %v4611_v12 = vadd.f32 %v1956_v5, %v1817_v19  ;;  %v4614_v15 = vmul.f32 %v4487_v46, %v929_v18  ;;  %v768_v17 = vadd.f32 1.0, %v4524_v31  ;;  %v926_v31 = vld [vmem:[#allocation2 + $0x48] sm:$0xff] }
 0x12b   : > { %v4621_v36 = vmul.f32 %v4419_v43, %v929_v18  ;;  %v4624_v30 = vadd.f32 %v4326_v51, %v597_v52  ;;  %v4627_v20 = vadd.f32 %v3691_v4, %v4326_v51  ;;  %v4633_v23 = vmul.f32 %v4474_v21, %v929_v18  ;;  %v600_v18 = vpop.f32.mrf.mxu0 }
 0x12c   : > { %v1613_v47 = vmul.f32 %v4396_v27, %v4616_v16  ;;  %3831 = vrcp.f32 %v770_v14  ;;  %v771_v29 = vadd.f32 1.0, %v4540_v49  ;;  %v4643_v28 = vadd.f32 1.0, %v4558_v3 }
 0x12d   : > { %7025 = vst [vmem:[#allocation6_spill] sm:$0xff] %v4624_v30  ;;  %7026 = vst [vmem:[#allocation7_spill] sm:$0xff] %v4627_v20  ;;  %3833 = vrcp.f32 %v768_v17  ;;  %v4645_v52 = vadd.f32 1.0, %v3826_v33  ;;  %v1612_v35 = vmul.f32 %v4396_v27, %v926_v31  ;;  %v1614_v53 = vmul.f32 %v4396_v27, %v4635_v26 }
 0x12e   : > { %7027 = vst [vmem:[#allocation8_spill] sm:$0xff] %v4643_v28  ;;  %v4651_v55 = vmul.f32 -1.442695, %v4624_v30  ;;  %v4654_v14 = vmul.f32 -1.442695, %v4627_v20  ;;  %v4657_v49 = vmul.f32 %v4369_v45, %v926_v31  ;;  %v4660_v3 = vmul.f32 %v4376_v58, %v926_v31 }
 0x12f   : > { %7028 = vst [vmem:[#allocation9_spill] sm:$0xff] %v4645_v52  ;;  %v1541_v33 = vmul.f32 %v4419_v43, %v926_v31  ;;  %v1857_v56 = vmul.f32 %v4424_v48, %v926_v31  ;;  %v1713_v50 = vrot.slane %v1613_v47, 1  ;;  %v4666_v57 = vmul.f32 %v4456_v24, %v4616_v16 }
 0x130   : > { %7029 = vst [vmem:[#allocation10_spill] sm:$0xff] %v4651_v55  ;;  %7030 = vst [vmem:[#allocation11_spill] sm:$0xff] %v4654_v14  ;;  %3835 = vrcp.f32 %v771_v29  ;;  %v4669_v19 = vadd.f32 %v4326_v51, %v600_v18  ;;  %v4672_v22 = vmul.f32 %v4383_v7, %v926_v31  ;;  %v2098_v4 = vmul.f32 %v4474_v21, %v926_v31 }
 0x131   : > { %v2168_v5 = vmul.f32 %v4456_v24, %v926_v31  ;;  %v1542_v6 = vmul.f32 %v4419_v43, %v4616_v16  ;;  %v1712_v47 = vrot.slane %v1612_v35, 1  ;;  %v2413_v2 = vmul.f32 %v4487_v46, %v926_v31 }
 0x132   : > { %7031 = vst [vmem:[#allocation12_spill] sm:$0xff] %v4669_v19  ;;  %v1715_v42 = vrot.slane %v1614_v53, 1  ;;  %v1858_v29 = vmul.f32 %v4424_v48, %v4616_v16  ;;  %v1573_v40 = vadd.f32 %v1541_v33, %v1504_v60  ;;  %v1957_v38 = vrot.slane %v1857_v56, 2 }
 0x133   : > { %v3828_v17 = vpop.eup %3827  ;;  %v1714_v44 = vsel %vm1141_vm4, %v1712_v47, %v1713_v50  ;;  %v1859_v35 = vmul.f32 %v4424_v48, %v4635_v26  ;;  %v2267_v31 = vrot.slane %v4666_v57, 1  ;;  %v2414_v53 = vmul.f32 %v4487_v46, %v4616_v16 }
 0x134   : > { %v2785_v20 = vadd.f32 1.0, %v3828_v17  ;;  %v2130_v30 = vadd.f32 %v2098_v4, %v2061_v11  ;;  %v2266_v51 = vrot.slane %v2168_v5, 1  ;;  %v1574_v18 = vadd.f32 %v1542_v6, %v4589_v61 }
 0x135   : > { %v3830_v34 = vpop.eup %3829  ;;  %v2511_v60 = vrot.slane %v2413_v2, 2  ;;  %v1716_v33 = vsel %vm1141_vm4, %v1713_v50, %v1715_v42  ;;  %v1958_v56 = vrot.slane %v1858_v29, 2  ;;  %v2170_v47 = vmul.f32 %v4456_v24, %v4635_v26 }
 0x136   : > { %v2786_v14 = vadd.f32 1.0, %v3830_v34  ;;  %v4697_v55 = vmul.f32 %v4383_v7, %v4683_v32  ;;  %v4701_v57 = vmul.f32 %v4369_v45, %v4683_v32  ;;  %v1818_v11 = vadd.f32 %v1714_v44, %v1573_v40  ;;  %v931_v34 = vld [vmem:[#allocation2 + $0x70] sm:$0x3] }
 0x137   : > { %v2172_v61 = vmul.f32 %v4456_v24, %v4683_v32  ;;  %v1960_v2 = vrot.slane %v1859_v35, 2  ;;  %v2268_v42 = vsel %vm1141_vm4, %v2266_v51, %v2267_v31  ;;  %v2512_v50 = vrot.slane %v2414_v53, 2 }
 0x138   : > { %3837 = vrcp.f32 %v2785_v20  ;;  %v1819_v5 = vadd.f32 %v1716_v33, %v1574_v18  ;;  %v2099_v6 = vmul.f32 %v4474_v21, %v4616_v16  ;;  %v2375_v17 = vadd.f32 %v2268_v42, %v2130_v30 }
 0x139   : > { %v4706_v4 = vpop.eup %3831  ;;  %v1055_v40 = vmul.f32 %v4369_v45, %v4616_v16  ;;  %v1959_v44 = vsel %vm1387_vm5, %v1957_v38, %v1958_v56  ;;  %v2269_v35 = vrot.slane %v2170_v47, 1  ;;  %v2415_v51 = vmul.f32 %v4487_v46, %v4635_v26 }
 0x13a   : > { %v4710_v29 = vpop.eup %3833  ;;  %3839 = vrcp.f32 %v2786_v14  ;;  %v1056_v20 = vmul.f32 %v4369_v45, %v4635_v26  ;;  %v2063_v18 = vadd.f32 %v1959_v44, %v1818_v11  ;;  %v2131_v53 = vadd.f32 %v2099_v6, %v4611_v12 }
 0x13b   : > { %7032 = vst [vmem:[#allocation13_spill] sm:$0xff] %v4710_v29  ;;  %v1059_v30 = vmul.f32 %v4369_v45, %v931_v34  ;;  %v2173_v33 = vmul.f32 %v4456_v24, %v931_v34  ;;  %v1961_v42 = vsel %vm1387_vm5, %v1958_v56, %v1960_v2  ;;  %v2513_v19 = vsel %vm1387_vm5, %v2511_v60, %v2512_v50 }
 0x13c   : > { %v4728_v47 = vmul.f32 %v4376_v58, %v4683_v32  ;;  %v2417_v14 = vmul.f32 %v4487_v46, %v4683_v32  ;;  %v2064_v11 = vadd.f32 %v1961_v42, %v1819_v5  ;;  %v2620_v44 = vadd.f32 %v2513_v19, %v2375_v17 }
 0x13d   : > { %v4724_v38 = vpop.eup %3835  ;;  %v2272_v12 = vrot.slane %v2172_v61, 1  ;;  %v1158_v6 = vrot.slane %v1055_v40, 1  ;;  %v2270_v39 = vsel %vm1141_vm4, %v2267_v31, %v2269_v35  ;;  %v2514_v62 = vrot.slane %v2415_v51, 2 }
 0x13e   : > { %7033 = vst [vmem:[#allocation14_spill] sm:$0xff] %v4724_v38  ;;  %v1160_v52 = vrot.slane %v1056_v20, 1  ;;  %v2101_v60 = vmul.f32 %v4474_v21, %v4683_v32  ;;  %v2132_v56 = vadd.f32 %v4633_v23, %v2063_v18  ;;  %v2376_v2 = vadd.f32 %v2270_v39, %v2131_v53 }
 0x13f   : > { %v1305_v28 = vmul.f32 %v4376_v58, %v931_v34  ;;  %v4739_v38 = vmul.f32 %v4396_v27, %v4683_v32  ;;  %v2274_v5 = vrot.slane %v2173_v33, 1  ;;  %v2418_v19 = vmul.f32 %v4487_v46, %v931_v34 }
 0x140   : > { %v1301_v31 = vmul.f32 %v4376_v58, %v4616_v16  ;;  %v1302_v61 = vmul.f32 %v4376_v58, %v4635_v26  ;;  %v2133_v17 = vadd.f32 %v2101_v60, %v2064_v11  ;;  %v4747_v40 = vadd.f32 %v4548_v54, %v2620_v44 }
 0x141   : > { %v1617_v39 = vmul.f32 %v4396_v27, %v931_v34  ;;  %v7034_v23 = vrot.slane %v4609_v10, 1  ;;  %v2517_v51 = vrot.slane %v2417_v14, 2  ;;  %v2515_v20 = vsel %vm1387_vm5, %v2512_v50, %v2514_v62 }
 0x142   : > { %v1163_v18 = vrot.slane %v4701_v57, 1  ;;  %v1161_v53 = vsel %vm1141_vm4, %v1158_v6, %v1160_v52  ;;  %v2621_v42 = vadd.f32 %v2515_v20, %v2376_v2  ;;  %v1165_v26 = vrot.slane %v1059_v30, 1 }
 0x143   : > { %v2273_v35 = vsel %vm1141_vm4, %v7034_v23, %v2272_v12  ;;  %v2275_v11 = vsel %vm1141_vm4, %v2272_v12, %v2274_v5  ;;  %v2519_v44 = vrot.slane %v2418_v19, 2  ;;  %v983_v60 = vmul.f32 %v4383_v7, %v4616_v16 }
 0x144   : > { %v2377_v33 = vadd.f32 %v2273_v35, %v2132_v56  ;;  %v1404_v59 = vrot.slane %v1301_v31, 2  ;;  %v1406_v10 = vrot.slane %v1302_v61, 2  ;;  %v2378_v29 = vadd.f32 %v2275_v11, %v2133_v17 }
 0x145   : > { %v3572_v14 = vmul.f32 -1.442695, %v4747_v40  ;;  %v3838_v23 = vpop.eup %3837  ;;  %v1861_v62 = vmul.f32 %v4424_v48, %v4683_v32  ;;  %v1862_v52 = vmul.f32 %v4424_v48, %v931_v34  ;;  %v7035_v57 = vrot.slane %v4614_v15, 2 }
 0x146   : > { %v1261_v30 = vadd.f32 %v1161_v53, %v983_v60  ;;  %v1409_v12 = vrot.slane %v4728_v47, 2  ;;  %v7036_v16 = vrot.slane %v4657_v49, 1  ;;  %v4771_v5 = vadd.f32 %v4548_v54, %v2621_v42 }
 0x147   : > { %v2518_v50 = vsel %vm1387_vm5, %v7035_v57, %v2517_v51  ;;  %v3840_v19 = vpop.eup %3839  ;;  %v7037_v31 = vrot.slane %v4592_v63, 1  ;;  %v1411_v61 = vrot.slane %v1305_v28, 2  ;;  %v1718_v15 = vrot.slane %v4739_v38, 1 }
 0x148   : > { %v1159_v56 = vsel %vm1141_vm4, %v7036_v16, %v1158_v6  ;;  %v2622_v2 = vadd.f32 %v2518_v50, %v2377_v33  ;;  %v2520_v17 = vsel %vm1387_vm5, %v2517_v51, %v2519_v44  ;;  %v1166_v47 = vsel %vm1141_vm4, %v1163_v18, %v1165_v26 }
 0x149   : > { %v1164_v34 = vsel %vm1141_vm4, %v7037_v31, %v1163_v18  ;;  %v1407_v49 = vsel %vm1387_vm5, %v1404_v59, %v1406_v10  ;;  %v2623_v35 = vadd.f32 %v2520_v17, %v2378_v29  ;;  %3841 = vpow2.f32 %v3572_v14 }
 0x14a   : > { %v4781_v6 = vmul.f32 %v3838_v23, %v4563_v8  ;;  %v1720_v20 = vrot.slane %v1617_v39, 1  ;;  %v1260_v53 = vadd.f32 %v1159_v56, %v4672_v22  ;;  %v1507_v63 = vadd.f32 %v1407_v49, %v1261_v30  ;;  %v935_v39 = vld [vmem:[#allocation2 + $0x90] sm:$0xff]  ;;  %v932_v56 = vld [vmem:[#allocation2 + $0x78] sm:$0xff] }
 0x14b   : > { %v4785_v33 = vmul.f32 %v3840_v19, %v4574_v25  ;;  %v1963_v28 = vrot.slane %v1861_v62, 2  ;;  %v4788_v38 = vadd.f32 %v4548_v54, %v2622_v2  ;;  %v3573_v51 = vmul.f32 -1.442695, %v4771_v5  ;;  %v4830_v2 = vld [vmem:[#allocation2 + $0x80] sm:$0xff] }
 0x14c   : > { %7038 = vst [vmem:[#allocation15_spill] sm:$0xff] %v4781_v6  ;;  %v1262_v18 = vadd.f32 %v1164_v34, %v4606_v9  ;;  %v1263_v29 = vadd.f32 %v1166_v47, %v4697_v55  ;;  %v1965_v42 = vrot.slane %v1862_v52, 2  ;;  %v1544_v8 = vmul.f32 %v4419_v43, %v4683_v32  ;;  %v4847_v47 = vld [vmem:[#allocation2 + $0x88] sm:$0x3] }
 0x14d   : > { %7039 = vst [vmem:[#allocation16_spill] sm:$0xff] %v4785_v33  ;;  %v7040_v22 = vrot.slane %v4595_v13, 2  ;;  %v1412_v26 = vsel %vm1387_vm5, %v1409_v12, %v1411_v61  ;;  %v7041_v11 = vrot.slane %v4660_v3, 2  ;;  %v4803_v60 = vadd.f32 %v4548_v54, %v2623_v35 }
 0x14e   : > { %v2913_v9 = vsel %vm334_vm1, %v4781_v6, 0.0  ;;  %v7042_v55 = vrot.slane %v4598_v0, 1  ;;  %v1576_v13 = vadd.f32 %v1544_v8, %v1507_v63  ;;  %v2914_v14 = vsel %vm334_vm1, %v4785_v33, 0.0  ;;  %v7046_v33 = vld [vmem:[#allocation14_spill] sm:$0xff] }
 0x14f   : > { %v1410_v25 = vsel %vm1387_vm5, %v7040_v22, %v1409_v12  ;;  %v1405_v44 = vsel %vm1387_vm5, %v7041_v11, %v1404_v59  ;;  %3843 = vpow2.f32 %v3573_v51  ;;  %v3574_v3 = vmul.f32 -1.442695, %v4788_v38 }
 0x150   : > { %v1719_v32 = vsel %vm1141_vm4, %v7042_v55, %v1718_v15  ;;  %v1506_v10 = vadd.f32 %v1405_v44, %v1260_v53  ;;  %v4814_v59 = vmul.f32 %v4369_v45, %v935_v39  ;;  %v1508_v23 = vadd.f32 %v1410_v25, %v1262_v18  ;;  %v4894_v53 = vld [vmem:[#allocation2 + $0xa0] sm:$0x3] }
 0x151   : > { %v1721_v62 = vsel %vm1141_vm4, %v1718_v15, %v1720_v20  ;;  %v7043_v52 = vrot.slane %v4601_v1, 2  ;;  %v4821_v57 = vsel %vm1387_vm5, %v1963_v28, %v1965_v42  ;;  %v1509_v50 = vadd.f32 %v1412_v26, %v1263_v29  ;;  %v7045_v15 = vld [vmem:[#allocation3_spill] sm:$0xff] }
 0x152   : > { %v3575_v30 = vmul.f32 -1.442695, %v4803_v60  ;;  %v4825_v12 = vmul.f32 %v4376_v58, %v935_v39  ;;  %v4828_v16 = vmul.f32 %v4396_v27, %v935_v39  ;;  %v4832_v19 = vadd.f32 %v2914_v14, %v2913_v9 }
 0x153   : > { %v1964_v0 = vsel %vm1387_vm5, %v7043_v52, %v1963_v28  ;;  %v1575_v1 = vadd.f32 %v4621_v36, %v1506_v10  ;;  %v4835_v31 = vadd.f32 %v1721_v62, %v1576_v13  ;;  %v4838_v34 = vmul.f32 %v4424_v48, %v935_v39 }
 0x154   : > { %3845 = vpow2.f32 %v3574_v3  ;;  %v4841_v61 = vmul.f32 %v4383_v7, %v935_v39  ;;  %v4845_v17 = vmul.f32 %v4419_v43, %v935_v39  ;;  %v4850_v49 = vmul.f32 %v4456_v24, %v935_v39  ;;  %v4884_v3 = vld [vmem:[#allocation2 + $0x98] sm:$0xff] }
 0x155   : > { %v4853_v36 = vmul.f32 %v4487_v46, %v935_v39  ;;  %v4856_v35 = vmul.f32 %v4369_v45, %v932_v56  ;;  %v1619_v20 = vmul.f32 %v4396_v27, %v4830_v2  ;;  %3847 = vpow2.f32 %v3575_v30 }
 0x156   : > { %v4863_v28 = vmul.f32 %v4376_v58, %v932_v56  ;;  %v3842_v51 = vpop.eup %3841  ;;  %v4867_v29 = vmul.f32 %v4474_v21, %v935_v39  ;;  %v1618_v42 = vmul.f32 %v4396_v27, %v932_v56  ;;  %v1620_v8 = vmul.f32 %v4396_v27, %v4847_v47 }
 0x157   : > { %v4873_v22 = vmul.f32 %v4383_v7, %v932_v56  ;;  %v1545_v25 = vmul.f32 %v4419_v43, %v932_v56  ;;  %v1820_v26 = vadd.f32 %v1719_v32, %v1575_v1  ;;  %v1863_v11 = vmul.f32 %v4424_v48, %v932_v56 }
 0x158   : > { %v1723_v55 = vrot.slane %v1619_v20, 1  ;;  %v2787_v10 = vadd.f32 1.0, %v3842_v51  ;;  %v4882_v14 = vmul.f32 %v4456_v24, %v932_v56  ;;  %v1546_v32 = vmul.f32 %v4419_v43, %v4830_v2 }
 0x159   : > { %v1722_v62 = vrot.slane %v1618_v42, 1  ;;  %v2102_v52 = vmul.f32 %v4474_v21, %v932_v56  ;;  %v1725_v30 = vrot.slane %v1620_v8, 1  ;;  %v1864_v1 = vmul.f32 %v4424_v48, %v4830_v2 }
 0x15a   : > { %v1577_v18 = vadd.f32 %v1545_v25, %v1508_v23  ;;  %v1967_v20 = vrot.slane %v1863_v11, 2  ;;  %v2065_v51 = vadd.f32 %v1964_v0, %v1820_v26  ;;  %v4892_v63 = vmul.f32 %v4487_v46, %v932_v56 }
 0x15b   : > { %v4898_v39 = vmul.f32 %v4383_v7, %v4884_v3  ;;  %v4902_v43 = vmul.f32 %v4369_v45, %v4884_v3  ;;  %v1724_v42 = vsel %vm1141_vm4, %v1722_v62, %v1723_v55  ;;  %v1865_v23 = vmul.f32 %v4424_v48, %v4847_v47 }
 0x15c   : > { %v3844_v13 = vpop.eup %3843  ;;  %3849 = vrcp.f32 %v2787_v10  ;;  %v1578_v56 = vadd.f32 %v1546_v32, %v1509_v50  ;;  %v866_v8 = vmul.f32 %v4706_v4, %v4406_v37  ;;  %v4912_v7 = vmul.f32 %v4369_v45, %v4894_v53  ;;  %v7044_v50 = vld [vmem:[#allocation13_spill] sm:$0xff] }
 0x15d   : > { %v4916_v25 = vmul.f32 %v4376_v58, %v4884_v3  ;;  %v1726_v26 = vsel %vm1141_vm4, %v1723_v55, %v1725_v30  ;;  %v1968_v11 = vrot.slane %v1864_v1, 2  ;;  %v2788_v62 = vadd.f32 1.0, %v3844_v13  ;;  %v4988_v1 = vpop.f32.mrf.mxu0 }
 0x15e   : > { %v1822_v9 = vadd.f32 %v1724_v42, %v1577_v18  ;;  %899 = vst.msk [vmem:[#allocation2 + $0xc1] sm:$0xff] %vm334_vm1, %v866_v8  ;;  %v864_v37 = vmul.f32 %v7044_v50, %v4414_v41  ;;  %v4923_v32 = vadd.f32 %v2102_v52, %v2065_v51  ;;  %v2178_v0 = vmul.f32 %v4456_v24, %v4884_v3 }
 0x15f   : > { %v1970_v44 = vrot.slane %v1865_v23, 2  ;;  %v867_v55 = vmul.f32 %v7046_v33, %v7045_v15  ;;  %v6963_v13 = vrot.slane %v4902_v43, 1  ;;  %v4932_v18 = vmul.f32 %v4376_v58, %v4894_v53 }
 0x160   : > { %v2179_v30 = vmul.f32 %v4456_v24, %v4894_v53  ;;  %v1823_v41 = vadd.f32 %v1726_v26, %v1578_v56  ;;  %897 = vst.msk [vmem:[#allocation2 + $0xa9] sm:$0xff] %vm334_vm1, %v864_v37  ;;  %v4941_v33 = vmul.f32 %v4396_v27, %v4884_v3  ;;  %v1969_v15 = vsel %vm1387_vm5, %v1967_v20, %v1968_v11 }
 0x161   : > { %v3846_v4 = vpop.eup %3845  ;;  %900 = vst.msk [vmem:[#allocation2 + $0xc9] sm:$0xff] %vm334_vm1, %v867_v55  ;;  %3851 = vrcp.f32 %v2788_v62  ;;  %v4947_v42 = vmul.f32 %v4396_v27, %v4894_v53  ;;  %v2067_v23 = vadd.f32 %v1969_v15, %v1822_v9  ;;  %v4951_v56 = vmul.f32 %v4424_v48, %v4884_v3 }
 0x162   : > { %v3848_v52 = vpop.eup %3847  ;;  %v2789_v58 = vadd.f32 1.0, %v3846_v4  ;;  %v2282_v8 = vrot.slane %v2178_v0, 1  ;;  %v2423_v26 = vmul.f32 %v4487_v46, %v4884_v3  ;;  %v1971_v50 = vsel %vm1387_vm5, %v1968_v11, %v1970_v44  ;;  %v4970_v44 = vld [vmem:[%s6947_s3 + $0x1] ss:$0 sm:$0xff] }
 0x163   : > { %v2790_v20 = vadd.f32 1.0, %v3848_v52  ;;  %v2284_v37 = vrot.slane %v2179_v30, 1  ;;  %v1061_v62 = vmul.f32 %v4369_v45, %v4830_v2  ;;  %v2068_v4 = vadd.f32 %v1971_v50, %v1823_v41 }
 0x164   : > { %v7047_v27 = vrot.slane %v4814_v59, 1  ;;  %v2424_v0 = vmul.f32 %v4487_v46, %v4894_v53  ;;  %v1062_v11 = vmul.f32 %v4970_v44, %v4847_v47  ;;  %v2175_v45 = vmul.f32 %v4456_v24, %v4830_v2 }
 0x165   : > { %3853 = vrcp.f32 %v2789_v58  ;;  %v2105_v59 = vmul.f32 %v4474_v21, %v4884_v3  ;;  %v2136_v55 = vadd.f32 %v4867_v29, %v2067_v23  ;;  %v2176_v30 = vmul.f32 %v4456_v24, %v4847_v47 }
 0x166   : > { %v4963_v9 = vsel %vm1141_vm4, %v7047_v27, %v6963_v13  ;;  %v7048_v41 = vrot.slane %v4850_v49, 1  ;;  %v2527_v15 = vrot.slane %v2423_v26, 2  ;;  %v2066_v50 = vadd.f32 %v4821_v57, %v4835_v31  ;;  %v7049_v27 = vld [vmem:[#allocation8_spill] sm:$0xff] }
 0x167   : > { %3855 = vrcp.f32 %v7049_v27  ;;  %v2285_v58 = vsel %vm1141_vm4, %v2282_v8, %v2284_v37  ;;  %v1168_v51 = vrot.slane %v1061_v62, 1  ;;  %v2137_v13 = vadd.f32 %v2105_v59, %v2068_v4  ;;  %v5000_v37 = vld [vmem:[%s6947_s3 + $0x2] ss:$0 sm:$0xff] }
 0x168   : > { %v2283_v52 = vsel %vm1141_vm4, %v7048_v41, %v2282_v8  ;;  %3857 = vrcp.f32 %v2790_v20  ;;  %v1170_v23 = vrot.slane %v1062_v11, 1  ;;  %v2103_v24 = vmul.f32 %v4474_v21, %v4830_v2  ;;  %v7050_v20 = vld [vmem:[#allocation9_spill] sm:$0xff] }
 0x169   : > { %v3850_v29 = vpop.eup %3849  ;;  %v2277_v49 = vrot.slane %v2175_v45, 1  ;;  %v2420_v26 = vmul.f32 %v4487_v46, %v4830_v2  ;;  %v2279_v41 = vrot.slane %v2176_v30, 1  ;;  %v2381_v57 = vadd.f32 %v2283_v52, %v2136_v55  ;;  %v5019_v30 = vpop.f32.mrf.mxu0 }
 0x16a   : > { %v2421_v31 = vmul.f32 %v4487_v46, %v4847_v47  ;;  %3859 = vrcp.f32 %v7050_v20  ;;  %v2529_v8 = vrot.slane %v2424_v0, 2  ;;  %v1307_v21 = vmul.f32 %v5000_v37, %v4830_v2  ;;  %v5015_v0 = vld [vmem:[%s6947_s3] ss:$0 sm:$0xff] }
 0x16b   : > { %v1308_v62 = vmul.f32 %v5000_v37, %v4847_v47  ;;  %v2135_v4 = vadd.f32 %v2103_v24, %v2066_v50  ;;  %v5007_v11 = vmul.f32 %v3850_v29, %v4747_v40  ;;  %v7052_v46 = vrot.slane %v4853_v36, 2 }
 0x16c   : > { %v987_v59 = vmul.f32 %v5015_v0, %v4830_v2  ;;  %v2382_v55 = vadd.f32 %v2285_v58, %v2137_v13  ;;  %v7053_v47 = vrot.slane %v4856_v35, 1  ;;  %v1171_v52 = vsel %vm1141_vm4, %v1168_v51, %v1170_v23 }
 0x16d   : > { %7051 = vst [vmem:[#allocation13_spill] sm:$0xff] %v5007_v11  ;;  %v2528_v45 = vsel %vm1387_vm5, %v7052_v46, %v2527_v15  ;;  %v7054_v36 = vrot.slane %v4882_v14, 1  ;;  %v2522_v27 = vrot.slane %v2420_v26, 2  ;;  %v2280_v29 = vsel %vm1141_vm4, %v2277_v49, %v2279_v41  ;;  %v5034_v26 = vpop.f32.mrf.mxu0 }
 0x16e   : > { %v1169_v40 = vsel %vm1141_vm4, %v7053_v47, %v1168_v51  ;;  %v2524_v20 = vrot.slane %v2421_v31, 2  ;;  %v2626_v2 = vadd.f32 %v2528_v45, %v2381_v57  ;;  %v3852_v13 = vpop.eup %3851  ;;  %v2530_v58 = vsel %vm1387_vm5, %v2527_v15, %v2529_v8 }
 0x16f   : > { %v2278_v50 = vsel %vm1141_vm4, %v7054_v36, %v2277_v49  ;;  %v1414_v46 = vrot.slane %v1307_v21, 2  ;;  %v1416_v35 = vrot.slane %v1308_v62, 2  ;;  %v2380_v10 = vadd.f32 %v2280_v29, %v2135_v4 }
 0x170   : > { %v2379_v24 = vadd.f32 %v2278_v50, %v4923_v32  ;;  %v2916_v51 = vsel %vm334_vm1, %v5007_v11, 0.0  ;;  %v1264_v14 = vadd.f32 %v1169_v40, %v4873_v22  ;;  %v1265_v23 = vadd.f32 %v1171_v52, %v987_v59 }
 0x171   : > { %v2627_v47 = vadd.f32 %v2530_v58, %v2382_v55  ;;  %v1421_v49 = vrot.slane %v4932_v18, 2  ;;  %v1728_v32 = vrot.slane %v4941_v33, 1  ;;  %v5040_v41 = vmul.f32 %v4424_v48, %v4894_v53  ;;  %v7066_v58 = vld [vmem:[#allocation4_spill] sm:$0xff] }
 0x172   : > { %v7055_v15 = vrot.slane %v4892_v63, 2  ;;  %v5046_v31 = vmul.f32 %v3852_v13, %v4771_v5  ;;  %v2525_v22 = vsel %vm1387_vm5, %v2522_v27, %v2524_v20  ;;  %v5050_v21 = vadd.f32 %v4548_v54, %v2626_v2  ;;  %v3854_v18 = vpop.eup %3853 }
 0x173   : > { %v2917_v33 = vadd.f32 %v2916_v51, %v4832_v19  ;;  %v7058_v62 = vrot.slane %v4863_v28, 2  ;;  %v1417_v53 = vsel %vm1387_vm5, %v1414_v46, %v1416_v35  ;;  %v2625_v63 = vadd.f32 %v2525_v22, %v2380_v10  ;;  %v616_v19 = vpop.f32.mrf.mxu0 }
 0x174   : > { %v2523_v57 = vsel %vm1387_vm5, %v7055_v15, %v2522_v27  ;;  %7056 = vst [vmem:[#allocation3_spill] sm:$0xff] %v5046_v31  ;;  %7057 = vst [vmem:[#allocation14_spill] sm:$0xff] %v5050_v21  ;;  %v3856_v4 = vpop.eup %3855  ;;  %v7059_v5 = vrot.slane %v4912_v7, 1  ;;  %v7060_v45 = vrot.slane %v4902_v43, 1  ;;  %v1511_v40 = vadd.f32 %v1417_v53, %v1265_v23  ;;  %v5076_v27 = vld [vmem:[%s6947_s3 + $0x3] ss:$0 sm:$0xff] }
 0x175   : > { %v2624_v8 = vadd.f32 %v2523_v57, %v2379_v24  ;;  %v1415_v48 = vsel %vm1387_vm5, %v7058_v62, %v1414_v46  ;;  %v5063_v52 = vadd.f32 %v4548_v54, %v2627_v47  ;;  %v3858_v36 = vpop.eup %3857  ;;  %v1266_v28 = vadd.f32 %v4963_v9, %v4841_v61  ;;  %v3698_v23 = vpop.f32.mrf.mxu0 }
 0x176   : > { %v1176_v59 = vsel %vm1141_vm4, %v7060_v45, %v7059_v5  ;;  %v1510_v55 = vadd.f32 %v1415_v48, %v1264_v14  ;;  %v7062_v50 = vrot.slane %v4916_v25, 2  ;;  %v7063_v10 = vrot.slane %v4825_v12, 2 }
 0x177   : > { %7061 = vst [vmem:[#allocation8_spill] sm:$0xff] %v5063_v52  ;;  %v1730_v43 = vrot.slane %v4947_v42, 1  ;;  %v1548_v29 = vmul.f32 %v5076_v27, %v4884_v3  ;;  %v5081_v24 = vmul.f32 %v3854_v18, %v4788_v38  ;;  %v2918_v61 = vsel %vm334_vm1, %v5046_v31, 0.0  ;;  %v3860_v42 = vpop.eup %3859 }
 0x178   : > { %v1420_v7 = vsel %vm1387_vm5, %v7063_v10, %v7062_v50  ;;  %v5086_v12 = vadd.f32 %v4548_v54, %v2624_v8  ;;  %v3578_v9 = vmul.f32 -1.442695, %v5050_v21  ;;  %v2919_v20 = vadd.f32 %v2918_v61, %v2917_v33  ;;  %v3766_v33 = vld [vmem:[%s6949_s5] sm:$0xff]   ;;  %v7077_v10 = vld [vmem:[#allocation12_spill] sm:$0xff] }
 0x179   : > { %7064 = vst [vmem:[#allocation9_spill] sm:$0xff] %v5081_v24  ;;  %v1267_v2 = vadd.f32 %v1176_v59, %v4898_v39  ;;  %v5091_v13 = vadd.f32 %v4548_v54, %v2625_v63  ;;  %v865_v3 = vmul.f32 %v3856_v4, %v7066_v58  ;;  %v7067_v38 = vmov %v7062_v50  ;;  %v629_v63 = vpop.f32.mrf.mxu0  ;;  %v5184_v58 = vld [vmem:[%s6947_s3 + $0x5] ss:$0 sm:$0xff] }
 0x17a   : > { %v1422_v46 = vsel %vm1387_vm5, %v7067_v38, %v1421_v49  ;;  %v1579_v35 = vadd.f32 %v4845_v17, %v1510_v55  ;;  %v1580_v51 = vadd.f32 %v1548_v29, %v1511_v40  ;;  %v3579_v14 = vmul.f32 -1.442695, %v5063_v52  ;;  %v3765_v17 = vld [vmem:[%s6949_s5 + $0x8] sm:$0xff]   ;;  %v7070_v49 = vld [vmem:[#allocation5_spill] sm:$0xff] }
 0x17b   : > { %7065 = vst [vmem:[#allocation17_spill] sm:$0xff] %v5091_v13  ;;  %v5100_v47 = vmul.f32 %v3858_v36, %v4803_v60  ;;  %v5102_v15 = vadd.f32 %v1420_v7, %v1266_v28  ;;  %v7069_v54 = vrot.slane %v4828_v16, 1  ;;  %v1973_v57 = vrot.slane %v4951_v56, 2  ;;  %898 = vst.msk [vmem:[#allocation2 + $0xb1] sm:$0xff] %vm334_vm1, %v865_v3  ;;  %3705 = vmatpush3.bf16.msra.mxu0 %v3765_v17  ;;  %v938_v38 = vld [vmem:[#allocation2 + $0xa8] sm:$0xff] }
 0x17c   : > { %v2920_v25 = vsel %vm334_vm1, %v5081_v24, 0.0  ;;  %v3576_v60 = vmul.f32 -1.442695, %v5086_v12  ;;  %3861 = vpow2.f32 %v3578_v9  ;;  %v870_v22 = vmul.f32 %v3860_v42, %v7070_v49  ;;  %v5212_v17 = vld [vmem:[%s6947_s3 + $0x6] ss:$0 sm:$0xff] }
 0x17d   : > { %7068 = vst [vmem:[#allocation4_spill] sm:$0xff] %v5100_v47  ;;  %v1729_v39 = vsel %vm1141_vm4, %v7069_v54, %v1728_v32  ;;  %v2921_v8 = vadd.f32 %v2920_v25, %v2919_v20  ;;  %v1731_v16 = vsel %vm1141_vm4, %v1728_v32, %v1730_v43  ;;  %v1975_v18 = vrot.slane %v5040_v41, 2  ;;  %v941_v32 = vld [vmem:[#allocation2 + $0xc0] sm:$0xff]  ;;  %v3699_v43 = vpop.f32.mrf.mxu0 }
 0x17e   : > { %v3577_v56 = vmul.f32 -1.442695, %v5091_v13  ;;  %v5122_v62 = vadd.f32 %v1422_v46, %v1267_v2  ;;  %v1825_v48 = vadd.f32 %v1731_v16, %v1580_v51  ;;  %3863 = vpow2.f32 %v3579_v14  ;;  %903 = vst.msk [vmem:[#allocation2 + $0xf1] sm:$0xff] %vm334_vm1, %v870_v22  ;;  %v5129_v41 = vld [vmem:[%s6946_s2] ss:$0 sm:$0xff]  ;;  %v5225_v22 = vld [vmem:[#allocation2 + $0xc8] sm:$0xff] }
 0x17f   : > { %v1824_v53 = vadd.f32 %v1729_v39, %v1579_v35  ;;  %v7071_v4 = vmov 0.0   ;;  %v5133_v5 = vadd.f32 %v5129_v41, %v4988_v1  ;;  %v5137_v45 = vadd.f32 %v5129_v41, %v5019_v30  ;;  %v5176_v20 = vld [vmem:[%s6947_s3 + $0x4] ss:$0 sm:$0xff] }
 0x180   : > { %3706 = vmatprep.subr.bf16.mxu0 %v7071_v4  ;;  %v5141_v59 = vadd.f32 %v5129_v41, %v5034_v26  ;;  %v7073_v55 = vrot.slane %v4838_v34, 2  ;;  %3865 = vpow2.f32 %v3576_v60  ;;  %v2922_v36 = vsel %vm334_vm1, %v5100_v47, 0.0  ;;  %3708 = vmatprep.mubr.msk.bf16.mxu0 %vm4091_vm6, %v7071_v4  ;;  %v5220_v60 = vld [vmem:[%s6947_s3 + $0x7] ss:$0 sm:$0xff] }
 0x181   : > { %v5149_v28 = vadd.f32 %v5129_v41, %v616_v19  ;;  %3714 = vmatprep.mubr.msk.bf16.mxu1 %vm4091_vm6, %v7071_v4  ;;  %v1976_v1 = vsel %vm1387_vm5, %v1973_v57, %v1975_v18  ;;  %3867 = vpow2.f32 %v3577_v56  ;;  %v5154_v30 = vadd.f32 %v2922_v36, %v2921_v8  ;;  %3707 = vmatpush3.bf16.msra.mxu0 %v3766_v33  ;;  %v5230_v8 = vld [vmem:[%s6947_s3 + $0x8] ss:$0 sm:$0xff]  ;;  %v5241_v33 = vld [vmem:[#allocation2 + $0xd0] sm:$0x3] }
 0x182   : > { %7072 = vst [vmem:[#allocation5_spill] sm:$0xff] %v5141_v59  ;;  %v1974_v40 = vsel %vm1387_vm5, %v7073_v55, %v1973_v57  ;;  %v5157_v34 = vadd.f32 %v5129_v41, %v3698_v23  ;;  %v5160_v26 = vmul.f32 %v4970_v44, %v941_v32  ;;  %v5163_v19 = vmul.f32 %v5000_v37, %v941_v32  ;;  %v7086_v55 = vld [vmem:[#allocation11_spill] sm:$0xff]  ;;  %v5269_v31 = vld [vmem:[#allocation2 + $0xb8] sm:$0x3] }
 0x183   : > { %7074 = vst [vmem:[#allocation18_spill] sm:$0xff] %v5149_v28  ;;  %7075 = vst [vmem:[#allocation19_spill] sm:$0xff] %v5154_v30  ;;  %v5165_v50 = vadd.f32 %v1974_v40, %v1824_v53  ;;  %v3545_v7 = vmul.f32 -1.442695, %v7077_v10  ;;  %v5168_v29 = vadd.f32 %v1976_v1, %v1825_v48  ;;  %v3550_v61 = vmul.f32 -1.442695, %v5133_v5 }
 0x184   : > { %7076 = vst [vmem:[#allocation20_spill] sm:$0xff] %v5157_v34  ;;  %v3548_v9 = vmul.f32 -1.442695, %v5137_v45  ;;  %v3551_v42 = vmul.f32 -1.442695, %v5141_v59  ;;  %v5179_v2 = vmul.f32 %v5176_v20, %v941_v32  ;;  %v5187_v3 = vmul.f32 %v5184_v58, %v941_v32  ;;  %7084 = vst [vmem:[#allocation26_spill] sm:$0xff] %v5230_v8 }
 0x185   : > { %v5190_v46 = vmul.f32 -1.442695, %v5149_v28  ;;  %v5193_v35 = vadd.f32 %v5129_v41, %v629_v63  ;;  %v5196_v51 = vmul.f32 %v5015_v0, %v941_v32  ;;  %v5199_v14 = vmul.f32 %v5076_v27, %v941_v32  ;;  %v7085_v48 = vld [vmem:[#allocation10_spill] sm:$0xff]  ;;  %v5265_v47 = vld [vmem:[#allocation2 + $0xb0] sm:$0xff] }
 0x186   : > { %v5202_v23 = vmul.f32 -1.442695, %v5157_v34  ;;  %v5205_v54 = vadd.f32 %v5129_v41, %v3699_v43  ;;  %v1182_v39 = vrot.slane %v5160_v26, 1  ;;  %v5215_v25 = vmul.f32 %v5212_v17, %v941_v32 }
 0x187   : > { %7078 = vst [vmem:[#allocation12_spill] sm:$0xff] %v5190_v46  ;;  %7079 = vst [vmem:[#allocation21_spill] sm:$0xff] %v5193_v35  ;;  %v5223_v49 = vmul.f32 %v5220_v60, %v941_v32  ;;  %v5233_v16 = vmul.f32 %v5230_v8, %v941_v32  ;;  %v5236_v18 = vmul.f32 %v5015_v0, %v938_v38  ;;  %3869 = vpow2.f32 %v7085_v48 }
 0x188   : > { %7080 = vst [vmem:[#allocation22_spill] sm:$0xff] %v5199_v14  ;;  %7081 = vst [vmem:[#allocation23_spill] sm:$0xff] %v5202_v23  ;;  %v5239_v56 = vmul.f32 %v4970_v44, %v938_v38  ;;  %v5247_v4 = vmul.f32 %v5000_v37, %v938_v38  ;;  %3871 = vpow2.f32 %v7086_v55  ;;  %v1549_v40 = vmul.f32 %v5076_v27, %v938_v38 }
 0x189   : > { %7082 = vst [vmem:[#allocation24_spill] sm:$0xff] %v5205_v54  ;;  %7083 = vst [vmem:[#allocation25_spill] sm:$0xff] %v5215_v25  ;;  %v3862_v32 = vpop.eup %3861  ;;  %v5252_v36 = vmul.f32 %v5176_v20, %v938_v38  ;;  %v1070_v1 = vmul.f32 %v4970_v44, %v5225_v22  ;;  %3873 = vpow2.f32 %v3545_v7  ;;  %v5258_v43 = vmul.f32 %v5184_v58, %v938_v38 }
 0x18a   : > { %v1071_v48 = vmul.f32 %v4970_v44, %v5241_v33  ;;  %3875 = vpow2.f32 %v3550_v61  ;;  %v2180_v57 = vmul.f32 %v5220_v60, %v938_v38  ;;  %v2793_v7 = vadd.f32 1.0, %v3862_v32 }
 0x18b   : > { %v3864_v55 = vpop.eup %3863  ;;  %3877 = vpow2.f32 %v3548_v9  ;;  %v2106_v24 = vmul.f32 %v5212_v17, %v938_v38  ;;  %v5272_v61 = vadd.f32 %v1549_v40, %v5102_v15  ;;  %v1183_v53 = vrot.slane %v1070_v1, 1 }
 0x18c   : > { %3879 = vpow2.f32 %v3551_v42  ;;  %v1316_v6 = vmul.f32 %v5000_v37, %v5225_v22  ;;  %v2425_v32 = vmul.f32 %v5230_v8, %v938_v38  ;;  %v1185_v26 = vrot.slane %v1071_v48, 1 }
 0x18d   : > { %v3866_v11 = vpop.eup %3865  ;;  %v2181_v34 = vmul.f32 %v5220_v60, %v5265_v47  ;;  %v2794_v42 = vadd.f32 1.0, %v3864_v55  ;;  %v2138_v28 = vadd.f32 %v2106_v24, %v5165_v50  ;;  %v2286_v15 = vrot.slane %v2180_v57, 1 }
 0x18e   : > { %v3868_v52 = vpop.eup %3867  ;;  %v2182_v40 = vmul.f32 %v5220_v60, %v5269_v31  ;;  %3881 = vrcp.f32 %v2793_v7  ;;  %v1317_v1 = vmul.f32 %v5000_v37, %v5241_v33  ;;  %v1628_v9 = vmul.f32 %v5176_v20, %v5225_v22 }
 0x18f   : > { %v1629_v38 = vmul.f32 %v5176_v20, %v5241_v33  ;;  %v2791_v48 = vadd.f32 1.0, %v3866_v11  ;;  %v2792_v63 = vadd.f32 1.0, %v3868_v52  ;;  %v1184_v55 = vsel %vm1141_vm4, %v1182_v39, %v1183_v53 }
 0x190   : > { %v1429_v14 = vrot.slane %v1316_v6, 2  ;;  %v1186_v24 = vsel %vm1141_vm4, %v1183_v53, %v1185_v26  ;;  %v2107_v50 = vmul.f32 %v5212_v17, %v5265_v47  ;;  %v2287_v57 = vrot.slane %v2181_v34, 1 }
 0x191   : > { %v2426_v7 = vmul.f32 %v5230_v8, %v5265_v47  ;;  %3883 = vrcp.f32 %v2794_v42  ;;  %v993_v30 = vmul.f32 %v5015_v0, %v5225_v22  ;;  %v2289_v21 = vrot.slane %v2182_v40, 1 }
 0x192   : > { %v2427_v11 = vmul.f32 %v5230_v8, %v5269_v31  ;;  %v1270_v6 = vadd.f32 %v1184_v55, %v5196_v51  ;;  %v1431_v39 = vrot.slane %v1317_v1, 2  ;;  %v1738_v53 = vrot.slane %v1628_v9, 1 }
 0x193   : > { %v2139_v26 = vadd.f32 %v2107_v50, %v5168_v29  ;;  %3885 = vrcp.f32 %v2791_v48  ;;  %v2531_v34 = vrot.slane %v2425_v32, 2  ;;  %v1271_v25 = vadd.f32 %v1186_v24, %v993_v30 }
 0x194   : > { %v3870_v52 = vpop.eup %3869  ;;  %v7087_v42 = vrot.slane %v5163_v19, 2  ;;  %3887 = vrcp.f32 %v2792_v63  ;;  %v1740_v40 = vrot.slane %v1629_v38, 1  ;;  %v2288_v13 = vsel %vm1141_vm4, %v2286_v15, %v2287_v57 }
 0x195   : > { %v3872_v54 = vpop.eup %3871  ;;  %v2532_v46 = vrot.slane %v2426_v7, 2  ;;  %v2290_v51 = vsel %vm1141_vm4, %v2287_v57, %v2289_v21  ;;  %v2383_v9 = vadd.f32 %v2288_v13, %v2138_v28  ;;  %v2534_v1 = vrot.slane %v2427_v11, 2  ;;  %v5330_v11 = vpop.f32.mrf.mxu0 }
 0x196   : > { %v1430_v35 = vsel %vm1387_vm5, %v7087_v42, %v1429_v14  ;;  %v3874_v23 = vpop.eup %3873  ;;  %v772_v29 = vadd.f32 1.0, %v3870_v52  ;;  %v1432_v32 = vsel %vm1387_vm5, %v1429_v14, %v1431_v39  ;;  %v7089_v19 = vrot.slane %v5179_v2, 1 }
 0x197   : > { %v3876_v59 = vpop.eup %3875  ;;  %v5308_v30 = vadd.f32 %v1430_v35, %v1270_v6  ;;  %v2384_v63 = vadd.f32 %v2290_v51, %v2139_v26  ;;  %v5315_v15 = vadd.f32 %v1432_v32, %v1271_v25  ;;  %v775_v24 = vadd.f32 1.0, %v3872_v54  ;;  %v3702_v32 = vpop.f32.mrf.mxu0 }
 0x198   : > { %v3878_v55 = vpop.eup %3877  ;;  %v5313_v48 = vsel %vm1141_vm4, %v7089_v19, %v1738_v53  ;;  %3889 = vrcp.f32 %v772_v29  ;;  %v773_v21 = vadd.f32 1.0, %v3874_v23  ;;  %v1873_v13 = vmul.f32 %v5184_v58, %v5225_v22 }
 0x199   : > { %7088 = vst [vmem:[#allocation10_spill] sm:$0xff] %v5308_v30  ;;  %v3880_v38 = vpop.eup %3879  ;;  %7090 = vst [vmem:[#allocation11_spill] sm:$0xff] %v5315_v15  ;;  %v1874_v28 = vmul.f32 %v5184_v58, %v5241_v33  ;;  %v2533_v35 = vsel %vm1387_vm5, %v2531_v34, %v2532_v46  ;;  %v778_v14 = vadd.f32 1.0, %v3876_v59  ;;  %v5323_v2 = vsel %vm1141_vm4, %v1738_v53, %v1740_v40  ;;  %v5351_v40 = vld [vmem:[%s6948_s4] ss:$0 sm:$0xff] }
 0x19a   : > { %v2535_v50 = vsel %vm1387_vm5, %v2532_v46, %v2534_v1  ;;  %v2628_v57 = vadd.f32 %v2533_v35, %v2383_v9  ;;  %v776_v25 = vadd.f32 1.0, %v3878_v55  ;;  %v5328_v54 = vmul.f32 %v5220_v60, %v5225_v22  ;;  %7091 = vst [vmem:[#allocation27_spill] sm:$0xff] %v5351_v40 }
 0x19b   : > { %v2629_v23 = vadd.f32 %v2535_v50, %v2384_v63  ;;  %3891 = vrcp.f32 %v775_v24  ;;  %v779_v7 = vadd.f32 1.0, %v3880_v38  ;;  %v5332_v52 = vpop.eup %3881  ;;  %v2185_v59 = vmul.f32 %v5220_v60, %v5241_v33 }
 0x19c   : > { %v1067_v6 = vmul.f32 %v4970_v44, %v5265_v47  ;;  %v1068_v46 = vmul.f32 %v4970_v44, %v5269_v31  ;;  %3893 = vrcp.f32 %v773_v21  ;;  %v5342_v39 = vmul.f32 %v5230_v8, %v5225_v22 }
 0x19d   : > { %v1625_v53 = vmul.f32 %v5176_v20, %v5265_v47  ;;  %v1626_v26 = vmul.f32 %v5176_v20, %v5269_v31  ;;  %3895 = vrcp.f32 %v778_v14  ;;  %v1983_v34 = vrot.slane %v1873_v13, 2 }
 0x19e   : > { %v1985_v42 = vrot.slane %v1874_v28, 2  ;;  %v5354_v51 = vadd.f32 %v5351_v40, %v2628_v57  ;;  %3897 = vrcp.f32 %v776_v25  ;;  %v5356_v9 = vpop.eup %3883  ;;  %v2292_v1 = vrot.slane %v5328_v54, 1 }
 0x19f   : > { %7093 = vst [vmem:[#allocation29_spill] sm:$0xff] %v5356_v9  ;;  %v5361_v29 = vmul.f32 %v5230_v8, %v5241_v33  ;;  %v5364_v55 = vadd.f32 %v5351_v40, %v2629_v23  ;;  %3899 = vrcp.f32 %v779_v7  ;;  %v2294_v19 = vrot.slane %v2185_v59, 1 }
 0x1a0   : > { %7092 = vst [vmem:[#allocation28_spill] sm:$0xff] %v5354_v51  ;;  %v1178_v63 = vrot.slane %v1067_v6, 1  ;;  %v1180_v38 = vrot.slane %v1068_v46, 1  ;;  %v1550_v24 = vmul.f32 %v5076_v27, %v5265_v47  ;;  %v3886_v21 = vpop.eup %3885  ;;  %v1313_v28 = vmul.f32 %v5000_v37, %v5265_v47  ;;  %v645_v46 = vpop.f32.mrf.mxu0 }
 0x1a1   : > { %7094 = vst [vmem:[#allocation30_spill] sm:$0xff] %v5364_v55  ;;  %v1733_v35 = vrot.slane %v1625_v53, 1  ;;  %v1735_v33 = vrot.slane %v1626_v26, 1  ;;  %v3888_v14 = vpop.eup %3887  ;;  %v7095_v50 = vrot.slane %v5187_v3, 2  ;;  %v1314_v25 = vmul.f32 %v5000_v37, %v5269_v31 }
 0x1a2   : > { %v5380_v54 = vmul.f32 %v5076_v27, %v5225_v22  ;;  %v3580_v23 = vmul.f32 -1.442695, %v5354_v51  ;;  %v5384_v7 = vsel %vm1387_vm5, %v1983_v34, %v1985_v42  ;;  %v1870_v59 = vmul.f32 %v5184_v58, %v5265_v47 }
 0x1a3   : > { %v5374_v57 = vsel %vm1387_vm5, %v7095_v50, %v1983_v34  ;;  %v1871_v3 = vmul.f32 %v5184_v58, %v5269_v31  ;;  %v3581_v6 = vmul.f32 -1.442695, %v5364_v55  ;;  %v2539_v53 = vrot.slane %v5361_v29, 2 }
 0x1a4   : > { %v1181_v26 = vsel %vm1141_vm4, %v1178_v63, %v1180_v38  ;;  %v1582_v50 = vadd.f32 %v1550_v24, %v5122_v62  ;;  %v2109_v13 = vmul.f32 %v5212_v17, %v5225_v22  ;;  %v991_v42 = vmul.f32 %v5015_v0, %v5265_v47  ;;  %v7098_v62 = vld [vmem:[#allocation6_spill] sm:$0xff]  ;;  %v3703_v47 = vpop.f32.mrf.mxu0 }
 0x1a5   : > { %v3890_v34 = vpop.eup %3889  ;;  %v1424_v51 = vrot.slane %v1313_v28, 2  ;;  %v7096_v9 = vrot.slane %v5252_v36, 1  ;;  %v1736_v55 = vsel %vm1141_vm4, %v1733_v35, %v1735_v33  ;;  %v7097_v29 = vrot.slane %v5239_v56, 1 }
 0x1a6   : > { %v1426_v40 = vrot.slane %v1314_v25, 2  ;;  %3901 = vpow2.f32 %v3580_v23  ;;  %v868_v24 = vmul.f32 %v3890_v34, %v7098_v62  ;;  %v1269_v22 = vadd.f32 %v1181_v26, %v991_v42 }
 0x1a7   : > { %v1734_v31 = vsel %vm1141_vm4, %v7096_v9, %v1733_v35  ;;  %v1179_v38 = vsel %vm1141_vm4, %v7097_v29, %v1178_v63  ;;  %v1978_v15 = vrot.slane %v1870_v59, 2  ;;  %v1980_v30 = vrot.slane %v1871_v3, 2  ;;  %v7103_v3 = vld [vmem:[#allocation7_spill] sm:$0xff] }
 0x1a8   : > { %3903 = vpow2.f32 %v3581_v6  ;;  %v3892_v28 = vpop.eup %3891  ;;  %v7099_v36 = vrot.slane %v5223_v49, 1  ;;  %v2295_v35 = vsel %vm1141_vm4, %v2292_v1, %v2294_v19  ;;  %v1826_v56 = vadd.f32 %v1734_v31, %v5272_v61  ;;  %901 = vst.msk [vmem:[#allocation2 + $0xd9] sm:$0xff] %vm334_vm1, %v868_v24  ;;  %v7113_v24 = vld [vmem:[#allocation17_spill] sm:$0xff] }
 0x1a9   : > { %v1827_v33 = vadd.f32 %v1736_v55, %v1582_v50  ;;  %v3894_v63 = vpop.eup %3893  ;;  %v7100_v25 = vrot.slane %v5342_v39, 2  ;;  %v7101_v23 = vrot.slane %v5233_v16, 2  ;;  %v871_v6 = vmul.f32 %v3892_v28, %v7103_v3  ;;  %v7120_v3 = vld [vmem:[#allocation24_spill] sm:$0xff] }
 0x1aa   : > { %v2293_v9 = vsel %vm1141_vm4, %v7099_v36, %v2292_v1  ;;  %v5422_v49 = vadd.f32 %v5129_v41, %v5330_v11  ;;  %v5425_v1 = vadd.f32 %v5129_v41, %v3702_v32  ;;  %v3896_v61 = vpop.eup %3895  ;;  %v5428_v55 = vmul.f32 %v3886_v21, %v5086_v12  ;;  %v648_v12 = vpop.f32.mrf.mxu0 }
 0x1ab   : > { %v5417_v59 = vsel %vm1387_vm5, %v7101_v23, %v7100_v25  ;;  %v1268_v19 = vadd.f32 %v1179_v38, %v5236_v18  ;;  %v1427_v16 = vsel %vm1387_vm5, %v1424_v51, %v1426_v40  ;;  %v869_v26 = vmul.f32 %v3894_v63, %v7077_v10  ;;  %v3898_v50 = vpop.eup %3897  ;;  %904 = vst.msk [vmem:[#allocation2 + $0xf9] sm:$0xff] %vm334_vm1, %v871_v6  ;;  %v947_v23 = vld [vmem:[#allocation2 + $0xf0] sm:$0xff] }
 0x1ac   : > { %7102 = vst [vmem:[#allocation6_spill] sm:$0xff] %v5417_v59  ;;  %7104 = vst [vmem:[#allocation7_spill] sm:$0xff] %v5422_v49  ;;  %v1515_v34 = vadd.f32 %v1427_v16, %v1269_v22  ;;  %v7107_v42 = vrot.slane %v5258_v43, 2  ;;  %v1981_v31 = vsel %vm1387_vm5, %v1978_v15, %v1980_v30  ;;  %v874_v32 = vmul.f32 %v3896_v61, %v5133_v5  ;;  %v3900_v21 = vpop.eup %3899  ;;  %v7110_v30 = vld [vmem:[#allocation5_spill] sm:$0xff]  ;;  %v7111_v5 = vld [vmem:[#allocation12_spill] sm:$0xff] }
 0x1ad   : > { %7105 = vst [vmem:[#allocation31_spill] sm:$0xff] %v5425_v1  ;;  %7106 = vst [vmem:[#allocation32_spill] sm:$0xff] %v5428_v55  ;;  %v2072_v18 = vadd.f32 %v1981_v31, %v1827_v33  ;;  %v872_v10 = vmul.f32 %v3898_v50, %v5137_v45  ;;  %v5442_v40 = vadd.f32 %v5129_v41, %v645_v46  ;;  %v7109_v43 = vrot.slane %v5247_v4, 2  ;;  %v7115_v46 = vld [vmem:[#allocation23_spill] sm:$0xff]  ;;  %v7119_v33 = vld [vmem:[#allocation25_spill] sm:$0xff] }
 0x1ae   : > { %v1979_v11 = vsel %vm1387_vm5, %v7107_v42, %v1978_v15  ;;  %902 = vst.msk [vmem:[#allocation2 + $0xe1] sm:$0xff] %vm334_vm1, %v869_v26  ;;  %907 = vst.msk [vmem:[#allocation2 + $0x121] sm:$0xff] %vm334_vm1, %v874_v32  ;;  %v875_v15 = vmul.f32 %v3900_v21, %v7110_v30  ;;  %3905 = vpow2.f32 %v7111_v5  ;;  %v5451_v62 = vadd.f32 %v5129_v41, %v3703_v47  ;;  %v7121_v61 = vld [vmem:[#allocation14_spill] sm:$0xff]  ;;  %v7123_v16 = vld [vmem:[#allocation19_spill] sm:$0xff] }
 0x1af   : > { %v2071_v29 = vadd.f32 %v1979_v11, %v1826_v56  ;;  %7108 = vst [vmem:[#allocation33_spill] sm:$0xff] %v5442_v40  ;;  %v1425_v38 = vsel %vm1387_vm5, %v7109_v43, %v1424_v51  ;;  %v5454_v22 = vmul.f32 %v3888_v14, %v7113_v24  ;;  %905 = vst.msk [vmem:[#allocation2 + $0x109] sm:$0xff] %vm334_vm1, %v872_v10  ;;  %3907 = vpow2.f32 %v7115_v46  ;;  %v7118_v14 = vld [vmem:[#allocation21_spill] sm:$0xff]  ;;  %v7126_v50 = vld [vmem:[#allocation22_spill] sm:$0xff] }
 0x1b0   : > { %7112 = vst [vmem:[#allocation5_spill] sm:$0xff] %v5451_v62  ;;  %v1514_v45 = vadd.f32 %v1425_v38, %v1268_v19  ;;  %v5459_v4 = vadd.f32 %v5129_v41, %v648_v12  ;;  %v2924_v51 = vsel %vm334_vm1, %v5428_v55, 0.0  ;;  %v7117_v28 = vmov %v7100_v25  ;;  %908 = vst.msk [vmem:[#allocation2 + $0x129] sm:$0xff] %vm334_vm1, %v875_v15 }
 0x1b1   : > { %7114 = vst [vmem:[#allocation12_spill] sm:$0xff] %v5454_v22  ;;  %v2540_v36 = vsel %vm1387_vm5, %v7117_v28, %v2539_v53  ;;  %v1584_v47 = vadd.f32 %v5380_v54, %v1515_v34  ;;  %v3552_v56 = vmul.f32 -1.442695, %v7118_v14  ;;  %v2140_v63 = vadd.f32 %v7119_v33, %v2071_v29  ;;  %v5523_v28 = vld [vmem:[#allocation2 + $0x198] sm:$0xff]  ;;  %v7142_v33 = vld [vmem:[#allocation10_spill] sm:$0xff] }
 0x1b2   : > { %7116 = vst [vmem:[#allocation17_spill] sm:$0xff] %v5459_v4  ;;  %v2141_v25 = vadd.f32 %v2109_v13, %v2072_v18  ;;  %v3555_v41 = vmul.f32 -1.442695, %v7120_v3  ;;  %v3553_v6 = vmul.f32 -1.442695, %v5422_v49  ;;  %v5474_v19 = vmul.f32 %v5332_v52, %v7121_v61  ;;  %7134 = vst [vmem:[#allocation39_spill] sm:$0xff] %v5523_v28 }
 0x1b3   : > { %v3558_v39 = vmul.f32 -1.442695, %v5425_v1  ;;  %v3556_v54 = vmul.f32 -1.442695, %v5442_v40  ;;  %v3559_v53 = vmul.f32 -1.442695, %v5451_v62  ;;  %v5480_v26 = vadd.f32 %v2924_v51, %v7123_v16  ;;  %v3902_v11 = vpop.eup %3901 }
 0x1b4   : > { %7122 = vst [vmem:[#allocation23_spill] sm:$0xff] %v5474_v19  ;;  %v5484_v13 = vsel %vm334_vm1, %v5454_v22, 0.0  ;;  %v1583_v34 = vadd.f32 %v7126_v50, %v1514_v45  ;;  %v3557_v42 = vmul.f32 -1.442695, %v5459_v4  ;;  %v1829_v52 = vadd.f32 %v5323_v2, %v1584_v47  ;;  %v944_v51 = vld [vmem:[#allocation2 + $0xd8] sm:$0xff] }
 0x1b5   : > { %7124 = vst [vmem:[#allocation25_spill] sm:$0xff] %v5480_v26  ;;  %7125 = vst [vmem:[#allocation14_spill] sm:$0xff] %v5484_v13  ;;  %v5490_v31 = vmul.f32 %v4970_v44, %v947_v23  ;;  %v5493_v32 = vmul.f32 %v5000_v37, %v947_v23  ;;  %3909 = vpow2.f32 %v3552_v56  ;;  %v3904_v12 = vpop.eup %3903  ;;  %v5495_v21 = vadd.f32 %v2293_v9, %v2140_v63  ;;  %v5532_v63 = vld [vmem:[#allocation2 + $0x100] sm:$0x3]  ;;  %v5539_v61 = vld [vmem:[#allocation2 + $0x1a8] sm:$0x3] }
 0x1b6   : > { %v2386_v29 = vadd.f32 %v2295_v35, %v2141_v25  ;;  %v5498_v18 = vmul.f32 %v5015_v0, %v947_v23  ;;  %3911 = vpow2.f32 %v3555_v41  ;;  %v5501_v10 = vmul.f32 %v5176_v20, %v947_v23  ;;  %7136 = vst [vmem:[#allocation41_spill] sm:$0xff] %v5539_v61 }
 0x1b7   : > { %7127 = vst [vmem:[#allocation19_spill] sm:$0xff] %v5495_v21  ;;  %v5504_v2 = vmul.f32 %v5184_v58, %v947_v23  ;;  %v5507_v43 = vmul.f32 %v5220_v60, %v947_v23  ;;  %3913 = vpow2.f32 %v3553_v6  ;;  %v2795_v38 = vadd.f32 1.0, %v3902_v11 }
 0x1b8   : > { %v5510_v30 = vmul.f32 %v5230_v8, %v947_v23  ;;  %v1828_v9 = vadd.f32 %v5313_v48, %v1583_v34  ;;  %3915 = vpow2.f32 %v3558_v39  ;;  %v2796_v35 = vadd.f32 1.0, %v3904_v12  ;;  %v5525_v48 = vld [vmem:[#allocation2 + $0x1a0] sm:$0xff] }
 0x1b9   : > { %7128 = vst [vmem:[#allocation22_spill] sm:$0xff] %v5504_v2  ;;  %7129 = vst [vmem:[#allocation34_spill] sm:$0xff] %v5507_v43  ;;  %3917 = vpow2.f32 %v3556_v54  ;;  %v5515_v24 = vadd.f32 %v2540_v36, %v2386_v29  ;;  %v5518_v45 = vmul.f32 %v5076_v27, %v947_v23  ;;  %v5521_v46 = vmul.f32 %v5212_v17, %v947_v23  ;;  %v5530_v36 = vld [vmem:[#allocation2 + $0xf8] sm:$0xff] }
 0x1ba   : > { %7130 = vst [vmem:[#allocation35_spill] sm:$0xff] %v5510_v30  ;;  %3919 = vpow2.f32 %v3559_v53  ;;  %7135 = vst [vmem:[#allocation40_spill] sm:$0xff] %v5525_v48  ;;  %v2073_v41 = vadd.f32 %v5374_v57, %v1828_v9  ;;  %v5537_v6 = vadd.f32 %v5384_v7, %v1829_v52  ;;  %v5542_v54 = vmul.f32 %v4970_v44, %v944_v51 }
 0x1bb   : > { %7131 = vst [vmem:[#allocation36_spill] sm:$0xff] %v5515_v24  ;;  %7132 = vst [vmem:[#allocation37_spill] sm:$0xff] %v5518_v45  ;;  %3921 = vpow2.f32 %v3557_v42  ;;  %v3906_v25 = vpop.eup %3905  ;;  %v5546_v53 = vmul.f32 %v5212_v17, %v5523_v28  ;;  %v5550_v16 = vmul.f32 %v5212_v17, %v5525_v48  ;;  %v5553_v57 = vmul.f32 %v5000_v37, %v944_v51 }
 0x1bc   : > { %7133 = vst [vmem:[#allocation38_spill] sm:$0xff] %v5521_v46  ;;  %3923 = vrcp.f32 %v2795_v38  ;;  %v3908_v39 = vpop.eup %3907  ;;  %v1076_v7 = vmul.f32 %v4970_v44, %v5530_v36  ;;  %v1077_v50 = vmul.f32 %v4970_v44, %v5532_v63  ;;  %v5561_v34 = vmul.f32 %v5220_v60, %v5523_v28 }
 0x1bd   : > { %3925 = vrcp.f32 %v2796_v35  ;;  %7137 = vst [vmem:[#allocation42_spill] sm:$0xff] %v5546_v53  ;;  %7138 = vst [vmem:[#allocation43_spill] sm:$0xff] %v5550_v16  ;;  %v1553_v42 = vmul.f32 %v5076_v27, %v944_v51  ;;  %v5564_v11 = vadd.f32 1.0, %v3906_v25  ;;  %v5568_v52 = vmul.f32 %v5220_v60, %v5525_v48  ;;  %v5583_v35 = vld [vmem:[#allocation2 + $0xe0] sm:$0xff]  ;;  %v5585_v25 = vld [vmem:[#allocation2 + $0xe8] sm:$0x3] }
 0x1be   : > { %7139 = vst [vmem:[#allocation44_spill] sm:$0xff] %v5561_v34  ;;  %v5572_v12 = vmul.f32 %v5220_v60, %v5539_v61  ;;  %v5575_v29 = vmul.f32 %v5015_v0, %v944_v51  ;;  %v5578_v38 = vmul.f32 %v5176_v20, %v944_v51  ;;  %v5581_v9 = vmul.f32 %v5184_v58, %v944_v51 }
 0x1bf   : > { %7140 = vst [vmem:[#allocation45_spill] sm:$0xff] %v5568_v52  ;;  %v5587_v23 = vadd.f32 1.0, %v3908_v39  ;;  %v2110_v56 = vmul.f32 %v5212_v17, %v944_v51  ;;  %v5592_v47 = vmul.f32 %v5220_v60, %v944_v51  ;;  %v1322_v5 = vmul.f32 %v5000_v37, %v5530_v36 }
 0x1c0   : > { %7141 = vst [vmem:[#allocation46_spill] sm:$0xff] %v5572_v12  ;;  %v5600_v55 = vmul.f32 %v5230_v8, %v944_v51  ;;  %v1193_v19 = vrot.slane %v1076_v7, 1  ;;  %v1195_v39 = vrot.slane %v1077_v50, 1  ;;  %v5605_v26 = vadd.f32 %v1553_v42, %v7142_v33 }
 0x1c1   : > { %v1323_v16 = vmul.f32 %v5000_v37, %v5532_v63  ;;  %v5611_v24 = vmul.f32 %v4970_v44, %v5583_v35  ;;  %v1074_v22 = vmul.f32 %v4970_v44, %v5585_v25  ;;  %v5620_v7 = vmul.f32 %v5176_v20, %v5530_v36 }
 0x1c2   : > { %v5596_v15 = vpop.eup %3909  ;;  %v5624_v33 = vmul.f32 %v5176_v20, %v5532_v63  ;;  %v5628_v50 = vmul.f32 %v5184_v58, %v5530_v36  ;;  %v5633_v59 = vadd.f32 %v2110_v56, %v2073_v41  ;;  %v1439_v21 = vrot.slane %v1322_v5, 2 }
 0x1c3   : > { %v5602_v13 = vpop.eup %3911  ;;  %v997_v48 = vmul.f32 %v5015_v0, %v5530_v36  ;;  %v7143_v28 = vrot.slane %v5490_v31, 1  ;;  %v1196_v12 = vsel %vm1141_vm4, %v1193_v19, %v1195_v39  ;;  %v1441_v56 = vrot.slane %v1323_v16, 2 }
 0x1c4   : > { %v5615_v53 = vpop.eup %3913  ;;  %v1880_v41 = vmul.f32 %v5184_v58, %v5532_v63  ;;  %v1188_v5 = vrot.slane %v5611_v24, 1  ;;  %v1190_v51 = vrot.slane %v1074_v22, 1  ;;  %v1748_v61 = vrot.slane %v5620_v7, 1 }
 0x1c5   : > { %v5630_v42 = vpop.eup %3915  ;;  %v1194_v43 = vsel %vm1141_vm4, %v7143_v28, %v1193_v19  ;;  %v1750_v52 = vrot.slane %v5624_v33, 1  ;;  %v5657_v19 = vmul.f32 %v5220_v60, %v5583_v35  ;;  %v1275_v39 = vadd.f32 %v1196_v12, %v997_v48 }
 0x1c6   : > { %v5636_v30 = vpop.eup %3917  ;;  %v5662_v16 = vadd.f32 %v1194_v43, %v5498_v18  ;;  %v7146_v22 = vrot.slane %v5493_v32, 2  ;;  %v2188_v7 = vmul.f32 %v5220_v60, %v5585_v25  ;;  %v5675_v31 = vmul.f32 %v5220_v60, %v5530_v36 }
 0x1c7   : > { %v5645_v46 = vpop.eup %3919  ;;  %v5681_v18 = vmul.f32 %v5000_v37, %v5583_v35  ;;  %v1320_v32 = vmul.f32 %v5000_v37, %v5585_v25  ;;  %v1191_v43 = vsel %vm1141_vm4, %v1188_v5, %v1190_v51  ;;  %v1631_v48 = vmul.f32 %v5176_v20, %v5583_v35 }
 0x1c8   : > { %v5650_v44 = vpop.eup %3921  ;;  %7145 = vst [vmem:[#allocation47_spill] sm:$0xff] %v5662_v16  ;;  %v5667_v24 = vsel %vm1387_vm5, %v7146_v22, %v1439_v21  ;;  %v1632_v12 = vmul.f32 %v5176_v20, %v5585_v25  ;;  %v2111_v22 = vmul.f32 %v5212_v17, %v5583_v35  ;;  %v2299_v34 = vrot.slane %v2188_v7, 1 }
 0x1c9   : > { %v5659_v28 = vpop.eup %3923  ;;  %7147 = vst [vmem:[#allocation48_spill] sm:$0xff] %v5667_v24  ;;  %v5695_v2 = vmul.f32 %v5230_v8, %v5583_v35  ;;  %v2433_v37 = vmul.f32 %v5230_v8, %v5585_v25  ;;  %v5701_v51 = vmul.f32 %v5230_v8, %v5530_v36  ;;  %v2436_v4 = vmul.f32 %v5230_v8, %v5532_v63 }
 0x1ca   : > { %7144 = vst [vmem:[#allocation10_spill] sm:$0xff] %v5659_v28  ;;  %v5671_v33 = vpop.eup %3925  ;;  %v2191_v28 = vmul.f32 %v5220_v60, %v5532_v63  ;;  %v995_v62 = vmul.f32 %v5015_v0, %v5583_v35  ;;  %v1442_v7 = vsel %vm1387_vm5, %v1439_v21, %v1441_v56  ;;  %v1995_v40 = vrot.slane %v1880_v41, 2 }
 0x1cb   : > { %7148 = vst [vmem:[#allocation49_spill] sm:$0xff] %v5671_v33  ;;  %v2143_v33 = vadd.f32 %v2111_v22, %v5537_v6  ;;  %v1554_v16 = vmul.f32 %v5076_v27, %v5583_v35  ;;  %v1434_v45 = vrot.slane %v5681_v18, 2  ;;  %v1436_v49 = vrot.slane %v1320_v32, 2 }
 0x1cc   : > { %v1273_v1 = vadd.f32 %v1191_v43, %v995_v62  ;;  %v1743_v3 = vrot.slane %v1631_v48, 1  ;;  %v1745_v14 = vrot.slane %v1632_v12, 1  ;;  %v7149_v63 = vrot.slane %v5657_v19, 1 }
 0x1cd   : > { %v2542_v6 = vrot.slane %v5695_v2, 2  ;;  %v2544_v22 = vrot.slane %v2433_v37, 2  ;;  %v2304_v21 = vrot.slane %v2191_v28, 1  ;;  %v6996_v56 = vrot.slane %v5701_v51, 2 }
 0x1ce   : > { %v2300_v0 = vsel %vm1141_vm4, %v7149_v63, %v2299_v34  ;;  %v2549_v41 = vrot.slane %v2436_v4, 2  ;;  %v7150_v8 = vrot.slane %v5501_v10, 1  ;;  %v1751_v18 = vsel %vm1141_vm4, %v1748_v61, %v1750_v52 }
 0x1cf   : > { %v2388_v24 = vadd.f32 %v2300_v0, %v2143_v33  ;;  %v1876_v32 = vmul.f32 %v5184_v58, %v5583_v35  ;;  %v1877_v34 = vmul.f32 %v5184_v58, %v5585_v25  ;;  %v5728_v43 = vadd.f32 %v1442_v7, %v1275_v39  ;;  %v7152_v33 = vld [vmem:[#allocation11_spill] sm:$0xff] }
 0x1d0   : > { %v5721_v62 = vsel %vm1141_vm4, %v7150_v8, %v1748_v61  ;;  %v7151_v28 = vrot.slane %v5628_v50, 2  ;;  %v1437_v10 = vsel %vm1387_vm5, %v1434_v45, %v1436_v49  ;;  %v1586_v8 = vadd.f32 %v1554_v16, %v7152_v33 }
 0x1d1   : > { %v7153_v48 = vrot.slane %v5542_v54, 1  ;;  %v1519_v52 = vadd.f32 %v1437_v10, %v1273_v1  ;;  %v1746_v35 = vsel %vm1141_vm4, %v1743_v3, %v1745_v14  ;;  %v2545_v25 = vsel %vm1387_vm5, %v2542_v6, %v2544_v22  ;;  %v5788_v10 = vld [vmem:[#allocation2 + $0x128] sm:$0xff] }
 0x1d2   : > { %v5733_v4 = vsel %vm1387_vm5, %v7151_v28, %v1995_v40  ;;  %v7154_v39 = vrot.slane %v5675_v31, 1  ;;  %v5752_v49 = vsel %vm1387_vm5, %v6996_v56, %v2549_v41  ;;  %v1556_v54 = vmul.f32 %v5076_v27, %v5530_v36  ;;  %v950_v28 = vld [vmem:[#allocation2 + $0x108] sm:$0xff] }
 0x1d3   : > { %v1189_v61 = vsel %vm1141_vm4, %v7153_v48, %v1188_v5  ;;  %7155 = vst [vmem:[#allocation11_spill] sm:$0xff] %v5752_v49  ;;  %v2633_v1 = vadd.f32 %v2545_v25, %v2388_v24  ;;  %v7156_v14 = vrot.slane %v5578_v38, 1  ;;  %v1988_v16 = vrot.slane %v1876_v32, 2  ;;  %v5775_v32 = vld [vmem:[#allocation2 + $0x120] sm:$0xff]  ;;  %v7219_v49 = vld [vmem:[#allocation19_spill] sm:$0xff] }
 0x1d4   : > { %v5747_v40 = vsel %vm1141_vm4, %v7154_v39, %v2304_v21  ;;  %v1990_v12 = vrot.slane %v1877_v34, 2  ;;  %v780_v37 = vadd.f32 1.0, %v5596_v15  ;;  %v1272_v7 = vadd.f32 %v1189_v61, %v5575_v29  ;;  %v7157_v21 = vld [vmem:[#allocation27_spill] sm:$0xff]  ;;  %v5808_v61 = vld [vmem:[%s6947_s3 + $0x2] ss:$0 sm:$0xff] }
 0x1d5   : > { %v1744_v5 = vsel %vm1141_vm4, %v7156_v14, %v1743_v3  ;;  %v1831_v63 = vadd.f32 %v1746_v35, %v1586_v8  ;;  %3927 = vrcp.f32 %v5564_v11  ;;  %v783_v0 = vadd.f32 1.0, %v5602_v13 }
 0x1d6   : > { %v1588_v22 = vadd.f32 %v1556_v54, %v1519_v52  ;;  %3929 = vrcp.f32 %v5587_v23  ;;  %v781_v24 = vadd.f32 1.0, %v5615_v53  ;;  %v786_v38 = vadd.f32 1.0, %v5630_v42 }
 0x1d7   : > { %v1830_v3 = vadd.f32 %v1744_v5, %v5605_v26  ;;  %v5768_v41 = vadd.f32 %v7157_v21, %v2633_v1  ;;  %3931 = vrcp.f32 %v780_v37  ;;  %v784_v15 = vadd.f32 1.0, %v5636_v30 }
 0x1d8   : > { %v7159_v29 = vrot.slane %v5553_v57, 2  ;;  %v1991_v13 = vsel %vm1387_vm5, %v1988_v16, %v1990_v12  ;;  %3933 = vrcp.f32 %v783_v0  ;;  %v787_v23 = vadd.f32 1.0, %v5645_v46 }
 0x1d9   : > { %7158 = vst [vmem:[#allocation27_spill] sm:$0xff] %v5768_v41  ;;  %v2076_v26 = vadd.f32 %v1991_v13, %v1831_v63  ;;  %3935 = vrcp.f32 %v781_v24  ;;  %v785_v42 = vadd.f32 1.0, %v5650_v44  ;;  %v5781_v34 = vadd.f32 %v1751_v18, %v1588_v22  ;;  %v5796_v44 = vld [vmem:[%s6947_s3 + $0x1] ss:$0 sm:$0xff]  ;;  %v955_v18 = vld [vmem:[#allocation2 + $0x130] sm:$0x3] }
 0x1da   : > { %v1435_v11 = vsel %vm1387_vm5, %v7159_v29, %v1434_v45  ;;  %v7160_v30 = vrot.slane %v5581_v9, 2  ;;  %v2113_v45 = vmul.f32 %v5212_v17, %v5530_v36  ;;  %3937 = vrcp.f32 %v786_v38  ;;  %v7176_v63 = vld [vmem:[#allocation48_spill] sm:$0xff] }
 0x1db   : > { %v5778_v53 = vadd.f32 %v1435_v11, %v1272_v7  ;;  %v3585_v33 = vmul.f32 -1.442695, %v5768_v41  ;;  %v1081_v9 = vmul.f32 %v5796_v44, %v5775_v32  ;;  %3939 = vrcp.f32 %v784_v15 }
 0x1dc   : > { %v1989_v57 = vsel %vm1387_vm5, %v7160_v30, %v1988_v16  ;;  %v7161_v36 = vrot.slane %v5657_v19, 1  ;;  %v7162_v8 = vrot.slane %v5592_v47, 1  ;;  %v5812_v52 = vmul.f32 %v5808_v61, %v5775_v32 }
 0x1dd   : > { %v5790_v46 = vadd.f32 %v1989_v57, %v1830_v3  ;;  %v5816_v35 = vmul.f32 %v5176_v20, %v5775_v32  ;;  %3941 = vrcp.f32 %v787_v23  ;;  %v5818_v25 = vadd.f32 %v2113_v45, %v2076_v26  ;;  %v7175_v3 = vld [vmem:[#allocation47_spill] sm:$0xff] }
 0x1de   : > { %v2298_v48 = vsel %vm1141_vm4, %v7162_v8, %v7161_v36  ;;  %v5821_v47 = vmul.f32 %v5796_v44, %v950_v28  ;;  %v1082_v19 = vmul.f32 %v5796_v44, %v5788_v10  ;;  %3943 = vrcp.f32 %v785_v42  ;;  %v7168_v42 = vld [vmem:[#allocation18_spill] sm:$0xff] }
 0x1df   : > { %v5826_v39 = vadd.f32 %v2298_v48, %v5633_v59  ;;  %v7163_v54 = vrot.slane %v5600_v55, 2  ;;  %v5836_v14 = vmul.f32 %v5808_v61, %v950_v28  ;;  %v1083_v5 = vmul.f32 %v5796_v44, %v955_v18  ;;  %v5848_v55 = vld [vmem:[%s6947_s3] ss:$0 sm:$0xff] }
 0x1e0   : > { %3945 = vpow2.f32 %v3585_v33  ;;  %v1202_v16 = vrot.slane %v1081_v9, 1  ;;  %v5840_v12 = vmul.f32 %v5176_v20, %v950_v28  ;;  %v5843_v59 = vmul.f32 %v5184_v58, %v950_v28  ;;  %v7169_v33 = vld [vmem:[#allocation20_spill] sm:$0xff] }
 0x1e1   : > { %v5833_v1 = vsel %vm1387_vm5, %v7163_v54, %v2542_v6  ;;  %v5851_v2 = vmul.f32 %v5848_v55, %v950_v28  ;;  %v5854_v6 = vmul.f32 %v5076_v27, %v950_v28  ;;  %v5857_v37 = vmul.f32 %v5220_v60, %v950_v28  ;;  %v7166_v27 = vld [vmem:[#allocation26_spill] sm:$0xff]  ;;  %v7170_v54 = vld [vmem:[#allocation21_spill] sm:$0xff] }
 0x1e2   : > { %7164 = vst [vmem:[#allocation50_spill] sm:$0xff] %v5843_v59  ;;  %v5860_v7 = vmul.f32 %v5808_v61, %v955_v18  ;;  %v5864_v0 = vmul.f32 %v5212_v17, %v950_v28  ;;  %v1203_v22 = vrot.slane %v1082_v19, 1  ;;  %v5867_v24 = vmul.f32 %v5176_v20, %v955_v18  ;;  %v3928_v38 = vpop.eup %3927 }
 0x1e3   : > { %7165 = vst [vmem:[#allocation51_spill] sm:$0xff] %v5857_v37  ;;  %v5871_v21 = vmul.f32 %v7166_v27, %v950_v28  ;;  %v1205_v15 = vrot.slane %v1083_v5, 1  ;;  %v5874_v29 = vmul.f32 %v5184_v58, %v955_v18  ;;  %v3930_v11 = vpop.eup %3929  ;;  %v5879_v26 = vmul.f32 %v5220_v60, %v955_v18 }
 0x1e4   : > { %v873_v30 = vmul.f32 %v3928_v38, %v7168_v42  ;;  %v3932_v57 = vpop.eup %3931  ;;  %v1451_v28 = vrot.slane %v5860_v7, 2  ;;  %v878_v9 = vmul.f32 %v3930_v11, %v7169_v33  ;;  %v1328_v36 = vmul.f32 %v5808_v61, %v5788_v10  ;;  %v7171_v33 = vld [vmem:[#allocation24_spill] sm:$0xff] }
 0x1e5   : > { %7167 = vst [vmem:[#allocation26_spill] sm:$0xff] %v5871_v21  ;;  %v3934_v8 = vpop.eup %3933  ;;  %v1760_v48 = vrot.slane %v5867_v24, 1  ;;  %v5889_v19 = vmul.f32 %v7166_v27, %v955_v18  ;;  %v876_v5 = vmul.f32 %v3932_v57, %v7170_v54  ;;  %v1204_v38 = vsel %vm1141_vm4, %v1202_v16, %v1203_v22 }
 0x1e6   : > { %906 = vst.msk [vmem:[#allocation2 + $0x111] sm:$0xff] %vm334_vm1, %v873_v30  ;;  %v3936_v42 = vpop.eup %3935  ;;  %v1206_v7 = vsel %vm1141_vm4, %v1203_v22, %v1205_v15  ;;  %911 = vst.msk [vmem:[#allocation2 + $0x151] sm:$0xff] %vm334_vm1, %v878_v9  ;;  %v879_v45 = vmul.f32 %v3934_v8, %v7171_v33  ;;  %v1000_v23 = vmul.f32 %v5848_v55, %v5775_v32  ;;  %v7172_v30 = vld [vmem:[#allocation7_spill] sm:$0xff]  ;;  %v7173_v22 = vld [vmem:[#allocation37_spill] sm:$0xff]  ;;  %v1449_v13 = vrot.slane %v1328_v36, 2 }
 0x1e7   : > { %v3938_v18 = vpop.eup %3937  ;;  %909 = vst.msk [vmem:[#allocation2 + $0x139] sm:$0xff] %vm334_vm1, %v876_v5  ;;  %v877_v57 = vmul.f32 %v3936_v42, %v7172_v30  ;;  %v1001_v16 = vmul.f32 %v5848_v55, %v5788_v10  ;;  %v1587_v15 = vadd.f32 %v7173_v22, %v5778_v53  ;;  %v7174_v9 = vld [vmem:[#allocation31_spill] sm:$0xff]  ;;  %v1520_v56 = vadd.f32 %v7176_v63, %v7175_v3  ;;  %v7177_v5 = vld [vmem:[#allocation33_spill] sm:$0xff] }
 0x1e8   : > { %v3940_v54 = vpop.eup %3939  ;;  %912 = vst.msk [vmem:[#allocation2 + $0x159] sm:$0xff] %vm334_vm1, %v879_v45  ;;  %v882_v8 = vmul.f32 %v3938_v18, %v7174_v9  ;;  %v1278_v33 = vadd.f32 %v1204_v38, %v1000_v23  ;;  %v1640_v11 = vmul.f32 %v5176_v20, %v5788_v10  ;;  %v1885_v53 = vmul.f32 %v5184_v58, %v5788_v10  ;;  %v7178_v23 = vld [vmem:[#allocation5_spill] sm:$0xff] }
 0x1e9   : > { %910 = vst.msk [vmem:[#allocation2 + $0x141] sm:$0xff] %vm334_vm1, %v877_v57  ;;  %v880_v42 = vmul.f32 %v3940_v54, %v7177_v5  ;;  %v1279_v30 = vadd.f32 %v1206_v7, %v1001_v16  ;;  %v1448_v63 = vrot.slane %v5812_v52, 2  ;;  %v5924_v3 = vld [vmem:[%s6947_s3 + $0x3] ss:$0 sm:$0xff]  ;;  %v1884_v52 = vmul.f32 %v5184_v58, %v5775_v32 }
 0x1ea   : > { %v3942_v27 = vpop.eup %3941  ;;  %915 = vst.msk [vmem:[#allocation2 + $0x181] sm:$0xff] %vm334_vm1, %v882_v8  ;;  %v5928_v20 = vmul.f32 %v5924_v3, %v5775_v32  ;;  %v7179_v38 = vld [vmem:[#allocation17_spill] sm:$0xff]  ;;  %v5934_v57 = vmul.f32 %v5924_v3, %v5788_v10  ;;  %v1452_v54 = vsel %vm1387_vm5, %v1449_v13, %v1451_v28  ;;  %v5943_v9 = vadd.f32 %v5854_v6, %v1520_v56 }
 0x1eb   : > { %v3944_v45 = vpop.eup %3943  ;;  %v883_v36 = vmul.f32 %v3942_v27, %v7178_v23  ;;  %913 = vst.msk [vmem:[#allocation2 + $0x169] sm:$0xff] %vm334_vm1, %v880_v42  ;;  %v1832_v27 = vadd.f32 %v5721_v62, %v1587_v15  ;;  %v1450_v22 = vsel %vm1387_vm5, %v1448_v63, %v1449_v13  ;;  %v2196_v8 = vmul.f32 %v5220_v60, %v5788_v10  ;;  %v7181_v23 = vld [vmem:[#allocation22_spill] sm:$0xff] }
 0x1ec   : > { %v881_v7 = vmul.f32 %v3944_v45, %v7179_v38  ;;  %v5948_v5 = vadd.f32 %v1450_v22, %v1278_v33  ;;  %v5950_v62 = vadd.f32 %v1452_v54, %v1279_v30  ;;  %v1758_v58 = vrot.slane %v1640_v11, 1  ;;  %v7188_v38 = vld [vmem:[#allocation45_spill] sm:$0xff] }
 0x1ed   : > { %v3946_v16 = vpop.eup %3945  ;;  %916 = vst.msk [vmem:[#allocation2 + $0x189] sm:$0xff] %vm334_vm1, %v883_v36  ;;  %v2003_v15 = vrot.slane %v1885_v53, 2  ;;  %v1757_v42 = vrot.slane %v5816_v35, 1  ;;  %v7180_v45 = vrot.slane %v5628_v50, 2  ;;  %v7182_v13 = vrot.slane %v7181_v23, 2  ;;  %v5964_v30 = vld [vmem:[#allocation2 + $0x110] sm:$0xff] }
 0x1ee   : > { %914 = vst.msk [vmem:[#allocation2 + $0x171] sm:$0xff] %vm334_vm1, %v881_v7  ;;  %v5960_v6 = vadd.f32 %v5733_v4, %v5781_v34  ;;  %v2195_v28 = vmul.f32 %v5220_v60, %v5775_v32  ;;  %v2800_v33 = vadd.f32 1.0, %v3946_v16  ;;  %7184 = vst [vmem:[#allocation20_spill] sm:$0xff] %v5964_v30  ;;  %v5966_v11 = vld [vmem:[#allocation2 + $0x118] sm:$0x3]  ;;  %v2002_v53 = vrot.slane %v1884_v52, 2 }
 0x1ef   : > { %v1994_v56 = vsel %vm1387_vm5, %v7182_v13, %v7180_v45  ;;  %v5970_v50 = vmul.f32 %v5212_v17, %v5775_v32  ;;  %v5974_v36 = vmul.f32 %v5212_v17, %v5788_v10  ;;  %v2312_v4 = vrot.slane %v2196_v8, 1  ;;  %v7187_v34 = vld [vmem:[#allocation44_spill] sm:$0xff]  ;;  %v7190_v16 = vld [vmem:[#allocation38_spill] sm:$0xff] }
 0x1f0   : > { %7183 = vst [vmem:[#allocation18_spill] sm:$0xff] %v5960_v6  ;;  %v2077_v35 = vadd.f32 %v1994_v56, %v1832_v27  ;;  %v2336_v63 = vrot.slane %v7187_v34, 1  ;;  %v2337_v60 = vrot.slane %v7188_v38, 1  ;;  %v5979_v7 = vsel %vm1141_vm4, %v1757_v42, %v1758_v58  ;;  %v7191_v42 = vld [vmem:[#allocation46_spill] sm:$0xff] }
 0x1f1   : > { %7185 = vst [vmem:[#allocation21_spill] sm:$0xff] %v5970_v50  ;;  %7186 = vst [vmem:[#allocation24_spill] sm:$0xff] %v5974_v36  ;;  %v5984_v27 = vsel %vm1141_vm4, %v1758_v58, %v1760_v48  ;;  %v5987_v52 = vsel %vm1387_vm5, %v2002_v53, %v2003_v15  ;;  %v2144_v17 = vadd.f32 %v7190_v16, %v5790_v46  ;;  %v2311_v8 = vrot.slane %v2195_v28, 1  ;;  %v7196_v23 = vld [vmem:[#allocation34_spill] sm:$0xff] }
 0x1f2   : > { %7189 = vst [vmem:[#allocation7_spill] sm:$0xff] %v5987_v52  ;;  %v5993_v22 = vmul.f32 %v5796_v44, %v5964_v30  ;;  %v1080_v54 = vmul.f32 %v5796_v44, %v5966_v11  ;;  %v2339_v45 = vrot.slane %v7191_v42, 1  ;;  %3947 = vrcp.f32 %v2800_v33 }
 0x1f3   : > { %v7192_v24 = vrot.slane %v5874_v29, 2  ;;  %v6004_v58 = vadd.f32 %v5864_v0, %v2077_v35  ;;  %v7195_v46 = vrot.slane %v5675_v31, 1  ;;  %v7197_v13 = vrot.slane %v7196_v23, 1  ;;  %v6025_v0 = vld [vmem:[%s6947_s3 + $0x8] ss:$0 sm:$0xff] }
 0x1f4   : > { %v6012_v53 = vsel %vm1141_vm4, %v2311_v8, %v2312_v4  ;;  %v7199_v28 = vrot.slane %v5879_v26, 1  ;;  %v6020_v29 = vsel %vm1141_vm4, %v2336_v63, %v2337_v60  ;;  %7202 = vst [vmem:[#allocation5_spill] sm:$0xff] %v6025_v0  ;;  %v2440_v31 = vmul.f32 %v6025_v0, %v5775_v32  ;;  %v7205_v8 = vld [vmem:[#allocation39_spill] sm:$0xff] }
 0x1f5   : > { %v6001_v48 = vsel %vm1387_vm5, %v2003_v15, %v7192_v24  ;;  %7194 = vst [vmem:[#allocation31_spill] sm:$0xff] %v6004_v58  ;;  %v2303_v56 = vsel %vm1141_vm4, %v7197_v13, %v7195_v46  ;;  %7198 = vst [vmem:[#allocation47_spill] sm:$0xff] %v6012_v53  ;;  %v6032_v15 = vld [vmem:[%s6947_s3 + $0x4] ss:$0 sm:$0xff]  ;;  %v6042_v34 = vadd.f32 %v5747_v40, %v5818_v25  ;;  %v6997_v63 = vrot.slane %v5993_v22, 1  ;;  %v7207_v24 = vld [vmem:[#allocation40_spill] sm:$0xff] }
 0x1f6   : > { %7193 = vst [vmem:[#allocation37_spill] sm:$0xff] %v6001_v48  ;;  %v6017_v33 = vsel %vm1141_vm4, %v2312_v4, %v7199_v28  ;;  %7201 = vst [vmem:[#allocation33_spill] sm:$0xff] %v6020_v29  ;;  %v6036_v26 = vmul.f32 %v6032_v15, %v5964_v30  ;;  %v1638_v35 = vmul.f32 %v6032_v15, %v5966_v11  ;;  %v1200_v32 = vrot.slane %v1080_v54, 1  ;;  %v7209_v46 = vld [vmem:[#allocation41_spill] sm:$0xff]  ;;  %v7212_v54 = vld [vmem:[#allocation35_spill] sm:$0xff] }
 0x1f7   : > { %7200 = vst [vmem:[#allocation48_spill] sm:$0xff] %v6017_v33  ;;  %v2389_v4 = vadd.f32 %v2303_v56, %v2144_v17  ;;  %7203 = vst [vmem:[#allocation17_spill] sm:$0xff] %v6042_v34  ;;  %v6046_v38 = vsel %vm1141_vm4, %v2337_v60, %v2339_v45  ;;  %v2441_v16 = vmul.f32 %v6025_v0, %v5788_v10  ;;  %v7211_v25 = vrot.slane %v5701_v51, 2  ;;  %v7220_v34 = vld [vmem:[#allocation6_spill] sm:$0xff] }
 0x1f8   : > { %7204 = vst [vmem:[#allocation22_spill] sm:$0xff] %v6046_v38  ;;  %v6052_v42 = vmul.f32 %v6025_v0, %v7205_v8  ;;  %v6056_v17 = vmul.f32 %v6025_v0, %v7207_v24  ;;  %v6060_v40 = vmul.f32 %v6025_v0, %v7209_v46  ;;  %v7213_v60 = vrot.slane %v7212_v54, 2  ;;  %v6080_v24 = vld [vmem:[%s6947_s3 + $0x5] ss:$0 sm:$0xff]  ;;  %v6107_v38 = vld [vmem:[#allocation2 + $0x160] sm:$0x3] }
 0x1f9   : > { %v6069_v10 = vmul.f32 %v5808_v61, %v5964_v30  ;;  %v1326_v23 = vmul.f32 %v5808_v61, %v5966_v11  ;;  %v2556_v56 = vrot.slane %v2440_v31, 2  ;;  %v1558_v28 = vmul.f32 %v5924_v3, %v5964_v30  ;;  %7214 = vst [vmem:[#allocation46_spill] sm:$0xff] %v6080_v24  ;;  %7218 = vst [vmem:[#allocation41_spill] sm:$0xff] %v6107_v38 }
 0x1fa   : > { %7206 = vst [vmem:[#allocation44_spill] sm:$0xff] %v6052_v42  ;;  %7208 = vst [vmem:[#allocation45_spill] sm:$0xff] %v6056_v17  ;;  %v2548_v45 = vsel %vm1387_vm5, %v7213_v60, %v7211_v25  ;;  %v1755_v51 = vrot.slane %v1638_v35, 1  ;;  %v6084_v46 = vmul.f32 %v6080_v24, %v5964_v30  ;;  %v1201_v25 = vsel %vm1141_vm4, %v6997_v63, %v1200_v32  ;;  %v6094_v35 = vld [vmem:[%s6947_s3 + $0x7] ss:$0 sm:$0xff] }
 0x1fb   : > { %7210 = vst [vmem:[#allocation38_spill] sm:$0xff] %v6060_v40  ;;  %v1883_v31 = vmul.f32 %v6080_v24, %v5966_v11  ;;  %7216 = vst [vmem:[#allocation39_spill] sm:$0xff] %v6094_v35  ;;  %v6098_v54 = vmul.f32 %v6094_v35, %v5964_v30  ;;  %v2194_v60 = vmul.f32 %v6094_v35, %v5966_v11  ;;  %v2557_v18 = vrot.slane %v2441_v16, 2  ;;  %v958_v42 = vld [vmem:[#allocation2 + $0x148] sm:$0x3] }
 0x1fc   : > { %7215 = vst [vmem:[#allocation34_spill] sm:$0xff] %v6084_v46  ;;  %v999_v13 = vmul.f32 %v5848_v55, %v5964_v30  ;;  %v1446_v41 = vrot.slane %v1326_v23, 2  ;;  %v6112_v21 = vadd.f32 %v7220_v34, %v7219_v49  ;;  %v1590_v53 = vadd.f32 %v1558_v28, %v5728_v43  ;;  %v6160_v23 = vld [vmem:[#allocation2 + $0x158] sm:$0xff] }
 0x1fd   : > { %7217 = vst [vmem:[#allocation40_spill] sm:$0xff] %v6098_v54  ;;  %v7222_v16 = vrot.slane %v6036_v26, 1  ;;  %v7003_v63 = vrot.slane %v6084_v46, 2  ;;  %v2000_v8 = vrot.slane %v1883_v31, 2  ;;  %v2309_v17 = vrot.slane %v2194_v60, 1  ;;  %v6148_v31 = vld [vmem:[#allocation2 + $0x140] sm:$0xff] }
 0x1fe   : > { %7221 = vst [vmem:[#allocation35_spill] sm:$0xff] %v6112_v21  ;;  %v1277_v33 = vadd.f32 %v1201_v25, %v999_v13  ;;  %v6122_v29 = vmul.f32 %v6025_v0, %v5966_v11  ;;  %v6126_v49 = vmul.f32 %v5796_v44, %v6107_v38  ;;  %v6130_v43 = vmul.f32 %v5808_v61, %v6107_v38 }
 0x1ff   : > { %v1756_v32 = vsel %vm1141_vm4, %v7222_v16, %v1755_v51  ;;  %v6133_v34 = vsel %vm1387_vm5, %v2556_v56, %v2557_v18  ;;  %v6137_v13 = vadd.f32 %v5833_v1, %v5826_v39  ;;  %v6139_v28 = vpop.eup %3947  ;;  %v7227_v11 = vrot.slane %v6069_v10, 2 }
 0x200   : > { %7223 = vst [vmem:[#allocation19_spill] sm:$0xff] %v6122_v29  ;;  %7224 = vst [vmem:[#allocation6_spill] sm:$0xff] %v6133_v34  ;;  %v6146_v25 = vmul.f32 %v6032_v15, %v6107_v38  ;;  %v1086_v60 = vmul.f32 %v5796_v44, %v958_v42  ;;  %v7228_v56 = vrot.slane %v5889_v19, 2  ;;  %v6158_v1 = vadd.f32 %v1756_v32, %v1590_v53 }
 0x201   : > { %7225 = vst [vmem:[#allocation52_spill] sm:$0xff] %v6137_v13  ;;  %7226 = vst [vmem:[#allocation53_spill] sm:$0xff] %v6139_v28  ;;  %v1447_v51 = vsel %vm1387_vm5, %v7227_v11, %v1446_v41  ;;  %v6163_v41 = vmul.f32 %v5808_v61, %v958_v42  ;;  %v6165_v11 = vadd.f32 %v2548_v45, %v2389_v4  ;;  %v7233_v19 = vrot.slane %v6098_v54, 1  ;;  %v6185_v4 = vld [vmem:[#allocation2 + $0x150] sm:$0xff] }
 0x202   : > { %v6154_v16 = vsel %vm1387_vm5, %v2557_v18, %v7228_v56  ;;  %v6156_v39 = vadd.f32 %v1447_v51, %v1277_v33  ;;  %7230 = vst [vmem:[#allocation55_spill] sm:$0xff] %v6158_v1  ;;  %v6170_v28 = vsel %vm1387_vm5, %v7003_v63, %v2000_v8  ;;  %v6178_v33 = vld [vmem:[#allocation2 + $0x138] sm:$0xff]  ;;  %v6181_v32 = vmul.f32 %v6032_v15, %v958_v42  ;;  %v6183_v51 = vld [vmem:[#allocation2 + $0x170] sm:$0xff] }
 0x203   : > { %7229 = vst [vmem:[#allocation54_spill] sm:$0xff] %v6154_v16  ;;  %7231 = vst [vmem:[#allocation56_spill] sm:$0xff] %v6165_v11  ;;  %v6175_v18 = vsel %vm1141_vm4, %v7233_v19, %v2309_v17  ;;  %v1215_v45 = vrot.slane %v6126_v49, 1  ;;  %v6190_v56 = vmul.f32 %v6080_v24, %v958_v42  ;;  %v6192_v17 = vld [vmem:[#allocation2 + $0x178] sm:$0x3]  ;;  %v1085_v19 = vmul.f32 %v5796_v44, %v6148_v31  ;;  %v6200_v16 = vld [vmem:[#allocation2 + $0x168] sm:$0xff] }
 0x204   : > { %7232 = vst [vmem:[#allocation57_spill] sm:$0xff] %v6170_v28  ;;  %7234 = vst [vmem:[#allocation58_spill] sm:$0xff] %v6175_v18  ;;  %v1210_v63 = vrot.slane %v1086_v60, 1  ;;  %v6198_v40 = vmul.f32 %v6094_v35, %v958_v42  ;;  %v1088_v49 = vmul.f32 %v5796_v44, %v6160_v23  ;;  %v1456_v8 = vrot.slane %v6163_v41, 2 }
 0x205   : > { %7235 = vst [vmem:[#allocation59_spill] sm:$0xff] %v6190_v56  ;;  %v6206_v34 = vmul.f32 %v6025_v0, %v958_v42  ;;  %v1084_v29 = vmul.f32 %v5796_v44, %v6178_v33  ;;  %v1091_v53 = vmul.f32 %v5796_v44, %v6183_v51  ;;  %v1002_v11 = vmul.f32 %v5848_v55, %v6178_v33 }
 0x206   : > { %7236 = vst [vmem:[#allocation60_spill] sm:$0xff] %v6198_v40  ;;  %v1087_v13 = vmul.f32 %v5796_v44, %v6185_v4  ;;  %v1092_v41 = vmul.f32 %v5796_v44, %v6192_v17  ;;  %v1003_v21 = vmul.f32 %v5848_v55, %v6148_v31  ;;  %v1090_v18 = vmul.f32 %v5796_v44, %v6200_v16 }
 0x207   : > { %v1208_v58 = vrot.slane %v1085_v19, 1  ;;  %v1004_v37 = vmul.f32 %v5848_v55, %v6185_v4  ;;  %v1005_v54 = vmul.f32 %v5848_v55, %v6160_v23  ;;  %v1213_v0 = vrot.slane %v1088_v49, 1 }
 0x208   : > { %v1006_v36 = vmul.f32 %v5848_v55, %v6200_v16  ;;  %v1007_v42 = vmul.f32 %v5848_v55, %v6183_v51  ;;  %v1207_v35 = vrot.slane %v1084_v29, 1  ;;  %v1218_v50 = vrot.slane %v1091_v53, 1 }
 0x209   : > { %v7237_v44 = vrot.slane %v5993_v22, 1  ;;  %v7238_v19 = vrot.slane %v5821_v47, 1  ;;  %v1212_v40 = vrot.slane %v1087_v13, 1  ;;  %v1220_v6 = vrot.slane %v1092_v41, 1 }
 0x20a   : > { %v1331_v30 = vmul.f32 %v5808_v61, %v6148_v31  ;;  %v1209_v49 = vsel %vm1141_vm4, %v1207_v35, %v1208_v58  ;;  %v1217_v48 = vrot.slane %v1090_v18, 1  ;;  %v1334_v52 = vmul.f32 %v5808_v61, %v6160_v23 }
 0x20b   : > { %v1199_v60 = vsel %vm1141_vm4, %v7238_v19, %v7237_v44  ;;  %v1337_v55 = vmul.f32 %v5808_v61, %v6183_v51  ;;  %v1211_v22 = vsel %vm1141_vm4, %v1208_v58, %v1210_v63  ;;  %v1214_v47 = vsel %vm1141_vm4, %v1212_v40, %v1213_v0 }
 0x20c   : > { %v1330_v29 = vmul.f32 %v5808_v61, %v6178_v33  ;;  %v1338_v13 = vmul.f32 %v5808_v61, %v6192_v17  ;;  %v1216_v53 = vsel %vm1141_vm4, %v1213_v0, %v1215_v45  ;;  %v1219_v35 = vsel %vm1141_vm4, %v1217_v48, %v1218_v50 }
 0x20d   : > { %v1333_v18 = vmul.f32 %v5808_v61, %v6185_v4  ;;  %v1336_v41 = vmul.f32 %v5808_v61, %v6200_v16  ;;  %v1221_v58 = vsel %vm1141_vm4, %v1218_v50, %v1220_v6  ;;  %v1276_v63 = vadd.f32 %v1199_v60, %v5851_v2 }
 0x20e   : > { %v1280_v40 = vadd.f32 %v1209_v49, %v1002_v11  ;;  %v1454_v44 = vrot.slane %v1331_v30, 2  ;;  %v1281_v19 = vadd.f32 %v1211_v22, %v1003_v21  ;;  %v1282_v28 = vadd.f32 %v1214_v47, %v1004_v37 }
 0x20f   : > { %v1459_v1 = vrot.slane %v1334_v52, 2  ;;  %v1464_v56 = vrot.slane %v1337_v55, 2  ;;  %v1283_v59 = vadd.f32 %v1216_v53, %v1005_v54  ;;  %v1284_v0 = vadd.f32 %v1219_v35, %v1006_v36  ;;  %v6297_v53 = vld [vmem:[#allocation2 + $0x190] sm:$0x3] }
 0x210   : > { %v1453_v45 = vrot.slane %v1330_v29, 2  ;;  %v1466_v48 = vrot.slane %v1338_v13, 2  ;;  %v1285_v46 = vadd.f32 %v1221_v58, %v1007_v42  ;;  %v7239_v38 = vrot.slane %v6069_v10, 2 }
 0x211   : > { %v7240_v24 = vrot.slane %v5836_v14, 2  ;;  %v1458_v6 = vrot.slane %v1333_v18, 2  ;;  %v1463_v50 = vrot.slane %v1336_v41, 2  ;;  %v2564_v2 = vrot.slane %v6206_v34, 2 }
 0x212   : > { %v1455_v21 = vsel %vm1387_vm5, %v1453_v45, %v1454_v44  ;;  %v1457_v37 = vsel %vm1387_vm5, %v1454_v44, %v1456_v8  ;;  %v7241_v52 = vrot.slane %v6130_v43, 2  ;;  %v1561_v14 = vmul.f32 %v5924_v3, %v6178_v33 }
 0x213   : > { %v1445_v61 = vsel %vm1387_vm5, %v7240_v24, %v7239_v38  ;;  %v1460_v36 = vsel %vm1387_vm5, %v1458_v6, %v1459_v1  ;;  %v1465_v10 = vsel %vm1387_vm5, %v1463_v50, %v1464_v56  ;;  %v6274_v38 = vld [vmem:[#allocation2 + $0x180] sm:$0xff]  ;;  %v6276_v24 = vld [vmem:[#allocation2 + $0x188] sm:$0xff]  ;;  %v1467_v11 = vsel %vm1387_vm5, %v1464_v56, %v1466_v48 }
 0x214   : > { %v1522_v30 = vadd.f32 %v1445_v61, %v1276_v63  ;;  %v1462_v54 = vsel %vm1387_vm5, %v1459_v1, %v7241_v52  ;;  %v1526_v60 = vadd.f32 %v1455_v21, %v1280_v40  ;;  %v1527_v8 = vadd.f32 %v1457_v37, %v1281_v19 }
 0x215   : > { %v1528_v42 = vadd.f32 %v1460_v36, %v1282_v28  ;;  %v1529_v49 = vadd.f32 %v1462_v54, %v1283_v59  ;;  %v1530_v55 = vadd.f32 %v1465_v10, %v1284_v0  ;;  %v1531_v22 = vadd.f32 %v1467_v11, %v1285_v46 }
 0x216   : > { %v1562_v43 = vmul.f32 %v5924_v3, %v6148_v31  ;;  %v1563_v1 = vmul.f32 %v5924_v3, %v6185_v4  ;;  %v1564_v47 = vmul.f32 %v5924_v3, %v6160_v23  ;;  %v1565_v29 = vmul.f32 %v5924_v3, %v6200_v16 }
 0x217   : > { %v1643_v56 = vmul.f32 %v6032_v15, %v6148_v31  ;;  %v1566_v59 = vmul.f32 %v5924_v3, %v6183_v51  ;;  %v1567_v46 = vmul.f32 %v5924_v3, %v6274_v38  ;;  %v1568_v28 = vmul.f32 %v5924_v3, %v6276_v24 }
 0x218   : > { %v1646_v13 = vmul.f32 %v6032_v15, %v6160_v23  ;;  %v1591_v35 = vadd.f32 %v5928_v20, %v1522_v30  ;;  %v1642_v18 = vmul.f32 %v6032_v15, %v6178_v33  ;;  %v1649_v41 = vmul.f32 %v6032_v15, %v6183_v51 }
 0x219   : > { %v1650_v58 = vmul.f32 %v6032_v15, %v6192_v17  ;;  %v1592_v63 = vadd.f32 %v5934_v57, %v6156_v39  ;;  %v1593_v3 = vadd.f32 %v1561_v14, %v5948_v5  ;;  %v1645_v40 = vmul.f32 %v6032_v15, %v6185_v4 }
 0x21a   : > { %v1652_v20 = vmul.f32 %v6032_v15, %v6276_v24  ;;  %v1594_v44 = vadd.f32 %v1562_v43, %v5950_v62  ;;  %v1595_v19 = vadd.f32 %v1563_v1, %v1526_v60  ;;  %v1648_v0 = vmul.f32 %v6032_v15, %v6200_v16 }
 0x21b   : > { %v1763_v45 = vrot.slane %v1643_v56, 1  ;;  %v1596_v48 = vadd.f32 %v1564_v47, %v1527_v8  ;;  %v1651_v61 = vmul.f32 %v6032_v15, %v6274_v38  ;;  %v1653_v57 = vmul.f32 %v6032_v15, %v6297_v53  ;;  %v7246_v56 = vld [vmem:[#allocation46_spill] sm:$0xff] }
 0x21c   : > { %v1768_v5 = vrot.slane %v1646_v13, 1  ;;  %v1597_v39 = vadd.f32 %v1565_v29, %v1528_v42  ;;  %v1762_v6 = vrot.slane %v1642_v18, 1  ;;  %v1773_v50 = vrot.slane %v1649_v41, 1 }
 0x21d   : > { %v1775_v21 = vrot.slane %v1650_v58, 1  ;;  %v1598_v37 = vadd.f32 %v1566_v59, %v1529_v49  ;;  %v7242_v62 = vrot.slane %v6036_v26, 1  ;;  %v7243_v30 = vrot.slane %v5840_v12, 1 }
 0x21e   : > { %v1767_v52 = vrot.slane %v1645_v40, 1  ;;  %v1778_v54 = vrot.slane %v1652_v20, 1  ;;  %v1599_v10 = vadd.f32 %v1567_v46, %v1530_v55  ;;  %v1600_v14 = vadd.f32 %v1568_v28, %v1531_v22  ;;  %v7247_v28 = vld [vmem:[#allocation41_spill] sm:$0xff] }
 0x21f   : > { %v1754_v36 = vsel %vm1141_vm4, %v7243_v30, %v7242_v62  ;;  %v1764_v11 = vsel %vm1141_vm4, %v1762_v6, %v1763_v45  ;;  %v1772_v60 = vrot.slane %v1648_v0, 1  ;;  %v7244_v15 = vrot.slane %v6181_v32, 1 }
 0x220   : > { %v1769_v42 = vsel %vm1141_vm4, %v1767_v52, %v1768_v5  ;;  %v1777_v49 = vrot.slane %v1651_v61, 1  ;;  %v1780_v43 = vrot.slane %v1653_v57, 1  ;;  %v7245_v26 = vrot.slane %v6146_v25, 1 }
 0x221   : > { %v1766_v8 = vsel %vm1141_vm4, %v1763_v45, %v7244_v15  ;;  %v1774_v1 = vsel %vm1141_vm4, %v1772_v60, %v1773_v50  ;;  %v1776_v55 = vsel %vm1141_vm4, %v1773_v50, %v1775_v21  ;;  %v1834_v22 = vadd.f32 %v1754_v36, %v5943_v9  ;;  %v7248_v60 = vld [vmem:[#allocation34_spill] sm:$0xff] }
 0x222   : > { %v1771_v12 = vsel %vm1141_vm4, %v1768_v5, %v7245_v26  ;;  %v1779_v47 = vsel %vm1141_vm4, %v1777_v49, %v1778_v54  ;;  %v1836_v32 = vadd.f32 %v5979_v7, %v1591_v35  ;;  %v1837_v29 = vadd.f32 %v5984_v27, %v1592_v63  ;;  %v7252_v49 = vld [vmem:[#allocation59_spill] sm:$0xff] }
 0x223   : > { %v1888_v59 = vmul.f32 %v7246_v56, %v6148_v31  ;;  %v1838_v46 = vadd.f32 %v1764_v11, %v1593_v3  ;;  %v1891_v25 = vmul.f32 %v7246_v56, %v6160_v23  ;;  %v1892_v13 = vmul.f32 %v7246_v56, %v7247_v28 }
 0x224   : > { %v1894_v18 = vmul.f32 %v7246_v56, %v6183_v51  ;;  %v1781_v9 = vsel %vm1141_vm4, %v1778_v54, %v1780_v43  ;;  %v1839_v41 = vadd.f32 %v1766_v8, %v1594_v44  ;;  %v1887_v7 = vmul.f32 %v7246_v56, %v6178_v33 }
 0x225   : > { %v1895_v27 = vmul.f32 %v7246_v56, %v6192_v17  ;;  %v1890_v35 = vmul.f32 %v7246_v56, %v6185_v4  ;;  %v1893_v58 = vmul.f32 %v7246_v56, %v6200_v16  ;;  %v1897_v63 = vmul.f32 %v7246_v56, %v6276_v24 }
 0x226   : > { %v1898_v3 = vmul.f32 %v7246_v56, %v6297_v53  ;;  %v1840_v40 = vadd.f32 %v1769_v42, %v1595_v19  ;;  %v1841_v20 = vadd.f32 %v1771_v12, %v1596_v48  ;;  %v1896_v44 = vmul.f32 %v7246_v56, %v6274_v38  ;;  %v7250_v48 = vld [vmem:[#allocation50_spill] sm:$0xff] }
 0x227   : > { %v2008_v0 = vrot.slane %v1888_v59, 2  ;;  %v1842_v45 = vadd.f32 %v1774_v1, %v1597_v39  ;;  %v2013_v61 = vrot.slane %v1891_v25, 2  ;;  %v2015_v57 = vrot.slane %v1892_v13, 2  ;;  %v7256_v59 = vld [vmem:[#allocation7_spill] sm:$0xff] }
 0x228   : > { %v2018_v5 = vrot.slane %v1894_v18, 2  ;;  %v1843_v6 = vadd.f32 %v1776_v55, %v1598_v37  ;;  %v1844_v50 = vadd.f32 %v1779_v47, %v1599_v10  ;;  %v2007_v21 = vrot.slane %v1887_v7, 2  ;;  %v7254_v55 = vld [vmem:[#allocation55_spill] sm:$0xff]  ;;  %v7255_v47 = vld [vmem:[#allocation57_spill] sm:$0xff] }
 0x229   : > { %v2020_v62 = vrot.slane %v1895_v27, 2  ;;  %v2012_v30 = vrot.slane %v1890_v35, 2  ;;  %v2017_v36 = vrot.slane %v1893_v58, 2  ;;  %v2023_v52 = vrot.slane %v1897_v63, 2 }
 0x22a   : > { %v2025_v54 = vrot.slane %v1898_v3, 2  ;;  %v1845_v11 = vadd.f32 %v1781_v9, %v1600_v14  ;;  %v7249_v19 = vrot.slane %v7248_v60, 2  ;;  %v7251_v15 = vrot.slane %v7250_v48, 2  ;;  %v7257_v9 = vld [vmem:[#allocation37_spill] sm:$0xff] }
 0x22b   : > { %v2009_v39 = vsel %vm1387_vm5, %v2007_v21, %v2008_v0  ;;  %v2022_v42 = vrot.slane %v1896_v44, 2  ;;  %v7253_v43 = vrot.slane %v7252_v49, 2  ;;  %v2014_v10 = vsel %vm1387_vm5, %v2012_v30, %v2013_v61 }
 0x22c   : > { %v1999_v8 = vsel %vm1387_vm5, %v7251_v15, %v7249_v19  ;;  %v2016_v26 = vsel %vm1387_vm5, %v2013_v61, %v2015_v57  ;;  %v2019_v12 = vsel %vm1387_vm5, %v2017_v36, %v2018_v5  ;;  %v2021_v14 = vsel %vm1387_vm5, %v2018_v5, %v2020_v62  ;;  %v7260_v62 = vld [vmem:[#allocation21_spill] sm:$0xff]  ;;  %v7261_v36 = vld [vmem:[#allocation39_spill] sm:$0xff] }
 0x22d   : > { %v2011_v37 = vsel %vm1387_vm5, %v2008_v0, %v7253_v43  ;;  %v2079_v1 = vadd.f32 %v1999_v8, %v1834_v22  ;;  %v2080_v56 = vadd.f32 %v7255_v47, %v7254_v55  ;;  %v2081_v25 = vadd.f32 %v7256_v59, %v1836_v32  ;;  %v4048_v22 = vld [vmem:[%s6947_s3 + $0x6] ss:$0 sm:$0xff]  ;;  %v7258_v32 = vld [vmem:[#allocation20_spill] sm:$0xff] }
 0x22e   : > { %v2024_v13 = vsel %vm1387_vm5, %v2022_v42, %v2023_v52  ;;  %v2026_v18 = vsel %vm1387_vm5, %v2023_v52, %v2025_v54  ;;  %v2082_v7 = vadd.f32 %v7257_v9, %v1837_v29  ;;  %v2083_v27 = vadd.f32 %v2009_v39, %v1838_v46 }
 0x22f   : > { %v2084_v35 = vadd.f32 %v2011_v37, %v1839_v41  ;;  %v2085_v58 = vadd.f32 %v2014_v10, %v1840_v40  ;;  %v2086_v63 = vadd.f32 %v2016_v26, %v1841_v20  ;;  %v2087_v3 = vadd.f32 %v2019_v12, %v1842_v45 }
 0x230   : > { %v2088_v44 = vadd.f32 %v2021_v14, %v1843_v6  ;;  %v2089_v0 = vadd.f32 %v2024_v13, %v1844_v50  ;;  %v6381_v61 = vadd.f32 %v2026_v18, %v1845_v11  ;;  %v2115_v57 = vmul.f32 %v4048_v22, %v7258_v32  ;;  %v7259_v6 = vld [vmem:[#allocation18_spill] sm:$0xff]  ;;  %v7262_v11 = vld [vmem:[#allocation24_spill] sm:$0xff] }
 0x231   : > { %v2118_v5 = vmul.f32 %v4048_v22, %v6178_v33  ;;  %v2119_v21 = vmul.f32 %v4048_v22, %v6148_v31  ;;  %v2120_v29 = vmul.f32 %v4048_v22, %v6185_v4  ;;  %v2121_v46 = vmul.f32 %v4048_v22, %v6160_v23 }
 0x232   : > { %v2122_v41 = vmul.f32 %v4048_v22, %v6200_v16  ;;  %v2123_v40 = vmul.f32 %v4048_v22, %v6183_v51  ;;  %v2124_v20 = vmul.f32 %v4048_v22, %v6274_v38  ;;  %v2125_v45 = vmul.f32 %v4048_v22, %v6276_v24 }
 0x233   : > { %v2147_v50 = vadd.f32 %v2115_v57, %v7259_v6  ;;  %v2148_v30 = vadd.f32 %v7260_v62, %v2079_v1  ;;  %v2199_v52 = vmul.f32 %v7261_v36, %v6148_v31  ;;  %v2202_v54 = vmul.f32 %v7261_v36, %v6160_v23 }
 0x234   : > { %v2149_v60 = vadd.f32 %v7262_v11, %v2080_v56  ;;  %v2150_v19 = vadd.f32 %v2118_v5, %v2081_v25  ;;  %v2203_v48 = vmul.f32 %v7261_v36, %v7247_v28  ;;  %v2205_v15 = vmul.f32 %v7261_v36, %v6183_v51  ;;  %v7263_v25 = vld [vmem:[#allocation5_spill] sm:$0xff]  ;;  %v7265_v5 = vld [vmem:[#allocation40_spill] sm:$0xff]  ;;  %v7271_v11 = vld [vmem:[#allocation31_spill] sm:$0xff] }
 0x235   : > { %v2151_v8 = vadd.f32 %v2119_v21, %v2082_v7  ;;  %v2198_v39 = vmul.f32 %v7261_v36, %v6178_v33  ;;  %v2201_v42 = vmul.f32 %v7261_v36, %v6185_v4  ;;  %v2206_v49 = vmul.f32 %v7261_v36, %v6192_v17 }
 0x236   : > { %v2152_v43 = vadd.f32 %v2120_v29, %v2083_v27  ;;  %v2153_v37 = vadd.f32 %v2121_v46, %v2084_v35  ;;  %v2154_v10 = vadd.f32 %v2122_v41, %v2085_v58  ;;  %v2204_v26 = vmul.f32 %v7261_v36, %v6200_v16  ;;  %v7267_v29 = vld [vmem:[#allocation51_spill] sm:$0xff] }
 0x237   : > { %v6414_v12 = vadd.f32 %v2123_v40, %v2086_v63  ;;  %v6418_v14 = vmul.f32 %v7261_v36, %v6274_v38  ;;  %v2317_v1 = vrot.slane %v2199_v52, 1  ;;  %v2322_v55 = vrot.slane %v2202_v54, 1  ;;  %v7264_v63 = vld [vmem:[#allocation42_spill] sm:$0xff]  ;;  %v7269_v40 = vld [vmem:[#allocation60_spill] sm:$0xff] }
 0x238   : > { %v6422_v47 = vmul.f32 %v7261_v36, %v6276_v24  ;;  %v2324_v56 = vrot.slane %v2203_v48, 1  ;;  %v2327_v59 = vrot.slane %v2205_v15, 1  ;;  %v2438_v13 = vmul.f32 %v7263_v25, %v7258_v32  ;;  %v7272_v15 = vld [vmem:[#allocation58_spill] sm:$0xff] }
 0x239   : > { %v6428_v18 = vmul.f32 %v7261_v36, %v6297_v53  ;;  %v2316_v9 = vrot.slane %v2198_v39, 1  ;;  %v2321_v7 = vrot.slane %v2201_v42, 1  ;;  %v2329_v27 = vrot.slane %v2206_v49, 1  ;;  %v7273_v42 = vld [vmem:[#allocation47_spill] sm:$0xff] }
 0x23a   : > { %v6430_v35 = vadd.f32 %v2124_v20, %v2087_v3  ;;  %v6432_v58 = vadd.f32 %v2125_v45, %v2088_v44  ;;  %v6435_v22 = vadd.f32 %v7264_v63, %v2089_v0  ;;  %v2326_v57 = vrot.slane %v2204_v26, 1  ;;  %v7274_v26 = vld [vmem:[#allocation48_spill] sm:$0xff]  ;;  %v7275_v63 = vld [vmem:[#allocation26_spill] sm:$0xff] }
 0x23b   : > { %v7266_v21 = vrot.slane %v7265_v5, 1  ;;  %v7268_v46 = vrot.slane %v7267_v29, 1  ;;  %v2318_v41 = vsel %vm1141_vm4, %v2316_v9, %v2317_v1  ;;  %v7270_v6 = vrot.slane %v7269_v40, 1 }
 0x23c   : > { %v2323_v3 = vsel %vm1141_vm4, %v2321_v7, %v2322_v55  ;;  %v2325_v44 = vsel %vm1141_vm4, %v2322_v55, %v2324_v56  ;;  %v2328_v0 = vsel %vm1141_vm4, %v2326_v57, %v2327_v59  ;;  %v2331_v20 = vrot.slane %v6418_v14, 1 }
 0x23d   : > { %v2308_v32 = vsel %vm1141_vm4, %v7268_v46, %v7266_v21  ;;  %v2320_v62 = vsel %vm1141_vm4, %v2317_v1, %v7270_v6  ;;  %v2552_v45 = vrot.slane %v2438_v13, 2  ;;  %v6451_v36 = vsel %vm1141_vm4, %v2327_v59, %v2329_v27  ;;  %v7278_v21 = vld [vmem:[#allocation11_spill] sm:$0xff]  ;;  %v7281_v46 = vld [vmem:[#allocation52_spill] sm:$0xff] }
 0x23e   : > { %v2332_v52 = vrot.slane %v6422_v47, 1  ;;  %v2334_v54 = vrot.slane %v6428_v18, 1  ;;  %v2391_v48 = vadd.f32 %v2308_v32, %v7271_v11  ;;  %v2392_v39 = vadd.f32 %v7272_v15, %v2147_v50  ;;  %v7277_v50 = vld [vmem:[#allocation17_spill] sm:$0xff]  ;;  %v7282_v32 = vld [vmem:[#allocation56_spill] sm:$0xff]  ;;  %v7283_v6 = vld [vmem:[#allocation19_spill] sm:$0xff] }
 0x23f   : > { %v2393_v49 = vadd.f32 %v7273_v42, %v2148_v30  ;;  %v2394_v1 = vadd.f32 %v7274_v26, %v2149_v60  ;;  %v2395_v55 = vadd.f32 %v2318_v41, %v2150_v19  ;;  %v2396_v56 = vadd.f32 %v2320_v62, %v2151_v8 }
 0x240   : > { %v2397_v9 = vadd.f32 %v2323_v3, %v2152_v43  ;;  %v2398_v7 = vadd.f32 %v2325_v44, %v2153_v37  ;;  %v2444_v59 = vmul.f32 %v7263_v25, %v6148_v31  ;;  %v2399_v13 = vadd.f32 %v2328_v0, %v2154_v10  ;;  %v6481_v37 = vld [vmem:[%s6948_s4] ss:$0 sm:$0xff]  ;;  %v7279_v10 = vld [vmem:[#allocation35_spill] sm:$0xff] }
 0x241   : > { %v2443_v27 = vmul.f32 %v7263_v25, %v6178_v33  ;;  %v7276_v57 = vrot.slane %v7275_v63, 2  ;;  %v2635_v30 = vadd.f32 %v7278_v21, %v7277_v50  ;;  %v2446_v60 = vmul.f32 %v7263_v25, %v6185_v4  ;;  %v7286_v21 = vld [vmem:[#allocation54_spill] sm:$0xff] }
 0x242   : > { %v2447_v19 = vmul.f32 %v7263_v25, %v6160_v23  ;;  %v2448_v31 = vmul.f32 %v7263_v25, %v7247_v28  ;;  %v2449_v33 = vmul.f32 %v7263_v25, %v6200_v16  ;;  %v2450_v43 = vmul.f32 %v7263_v25, %v6183_v51  ;;  %v7280_v23 = vld [vmem:[#allocation36_spill] sm:$0xff] }
 0x243   : > { %v2553_v5 = vsel %vm1387_vm5, %v7276_v57, %v2552_v45  ;;  %v6485_v4 = vadd.f32 %v6481_v37, %v7279_v10  ;;  %v6489_v29 = vadd.f32 %v6481_v37, %v7280_v23  ;;  %v2451_v28 = vmul.f32 %v7263_v25, %v6192_v17  ;;  %v7285_v57 = vld [vmem:[#allocation6_spill] sm:$0xff] }
 0x244   : > { %v2636_v8 = vadd.f32 %v2553_v5, %v2391_v48  ;;  %v2562_v16 = vrot.slane %v2444_v59, 2  ;;  %v6495_v51 = vadd.f32 %v6481_v37, %v7281_v46  ;;  %v6499_v41 = vadd.f32 %v6481_v37, %v7282_v32 }
 0x245   : > { %v6503_v40 = vmul.f32 %v7263_v25, %v6276_v24  ;;  %v7284_v62 = vrot.slane %v7283_v6, 2  ;;  %v2561_v44 = vrot.slane %v2443_v27, 2  ;;  %v6509_v17 = vadd.f32 %v6481_v37, %v2635_v30 }
 0x246   : > { %v2566_v0 = vrot.slane %v2446_v60, 2  ;;  %v2567_v11 = vrot.slane %v2447_v19, 2  ;;  %v6512_v15 = vadd.f32 %v6481_v37, %v2636_v8  ;;  %v2569_v42 = vrot.slane %v2448_v31, 2 }
 0x247   : > { %v2555_v3 = vsel %vm1387_vm5, %v2552_v45, %v7284_v62  ;;  %v2571_v26 = vrot.slane %v2449_v33, 2  ;;  %v3582_v59 = vmul.f32 -1.442695, %v6485_v4  ;;  %v3583_v24 = vmul.f32 -1.442695, %v6489_v29 }
 0x248   : > { %v2637_v48 = vadd.f32 %v2555_v3, %v2392_v39  ;;  %v2563_v63 = vsel %vm1387_vm5, %v2561_v44, %v2562_v16  ;;  %v2638_v45 = vadd.f32 %v7285_v57, %v2393_v49  ;;  %v3584_v27 = vmul.f32 -1.442695, %v6495_v51  ;;  %v7293_v57 = vld [vmem:[#allocation22_spill] sm:$0xff] }
 0x249   : > { %v3586_v5 = vmul.f32 -1.442695, %v6499_v41  ;;  %v2572_v50 = vrot.slane %v2450_v43, 2  ;;  %v2639_v39 = vadd.f32 %v7286_v21, %v2394_v1  ;;  %3949 = vpow2.f32 %v3582_v59 }
 0x24a   : > { %v3587_v30 = vmul.f32 -1.442695, %v6509_v17  ;;  %v2640_v60 = vadd.f32 %v2563_v63, %v2395_v55  ;;  %v6523_v19 = vadd.f32 %v6481_v37, %v2637_v48  ;;  %3951 = vpow2.f32 %v3583_v24  ;;  %v7289_v48 = vld [vmem:[#allocation45_spill] sm:$0xff] }
 0x24b   : > { %v3588_v31 = vmul.f32 -1.442695, %v6512_v15  ;;  %v2565_v49 = vsel %vm1387_vm5, %v2562_v16, %v2564_v2  ;;  %v2568_v8 = vsel %vm1387_vm5, %v2566_v0, %v2567_v11  ;;  %v2570_v33 = vsel %vm1387_vm5, %v2567_v11, %v2569_v42  ;;  %v7288_v0 = vld [vmem:[#allocation33_spill] sm:$0xff] }
 0x24c   : > { %3953 = vpow2.f32 %v3584_v27  ;;  %v2574_v1 = vrot.slane %v2451_v28, 2  ;;  %v2641_v43 = vadd.f32 %v2565_v49, %v2396_v56  ;;  %v6532_v10 = vadd.f32 %v6481_v37, %v2638_v45  ;;  %v7287_v56 = vld [vmem:[#allocation43_spill] sm:$0xff] }
 0x24d   : > { %3955 = vpow2.f32 %v3586_v5  ;;  %v2573_v55 = vsel %vm1387_vm5, %v2571_v26, %v2572_v50  ;;  %v2642_v23 = vadd.f32 %v2568_v8, %v2397_v9  ;;  %v6536_v46 = vadd.f32 %v6481_v37, %v2639_v39  ;;  %v7291_v26 = vld [vmem:[#allocation44_spill] sm:$0xff] }
 0x24e   : > { %3957 = vpow2.f32 %v3587_v30  ;;  %v2643_v34 = vadd.f32 %v2570_v33, %v2398_v7  ;;  %v6539_v2 = vadd.f32 %v6481_v37, %v2640_v60  ;;  %v3589_v16 = vmul.f32 -1.442695, %v6523_v19  ;;  %v7294_v60 = vld [vmem:[#allocation38_spill] sm:$0xff] }
 0x24f   : > { %3959 = vpow2.f32 %v3588_v31  ;;  %v2159_v28 = vadd.f32 %v7287_v56, %v6381_v61  ;;  %v2400_v32 = vadd.f32 %v6451_v36, %v6414_v12  ;;  %v2454_v9 = vmul.f32 %v7263_v25, %v6297_v53 }
 0x250   : > { %v2644_v6 = vadd.f32 %v2573_v55, %v2399_v13  ;;  %v2333_v7 = vsel %vm1141_vm4, %v2331_v20, %v2332_v52  ;;  %v2452_v62 = vmul.f32 %v7263_v25, %v6274_v38  ;;  %v6556_v3 = vadd.f32 %v6481_v37, %v2641_v43  ;;  %v7297_v55 = vld [vmem:[#allocation25_spill] sm:$0xff] }
 0x251   : > { %v3590_v61 = vmul.f32 -1.442695, %v6532_v10  ;;  %v2335_v53 = vsel %vm1141_vm4, %v2332_v52, %v2334_v54  ;;  %v2577_v12 = vrot.slane %v6503_v40, 2  ;;  %v6566_v14 = vadd.f32 %v6481_v37, %v2642_v23  ;;  %v7298_v23 = vld [vmem:[#allocation14_spill] sm:$0xff] }
 0x252   : > { %v3591_v20 = vmul.f32 -1.442695, %v6536_v46  ;;  %v2575_v38 = vsel %vm1387_vm5, %v2572_v50, %v2574_v1  ;;  %v6571_v25 = vadd.f32 %v6481_v37, %v2643_v34  ;;  %3961 = vpow2.f32 %v3589_v16 }
 0x253   : > { %v3592_v36 = vmul.f32 -1.442695, %v6539_v2  ;;  %v2401_v18 = vadd.f32 %v2333_v7, %v6430_v35  ;;  %v2579_v47 = vrot.slane %v2454_v9, 2  ;;  %v2645_v13 = vadd.f32 %v2575_v38, %v2400_v32  ;;  %v7299_v32 = vld [vmem:[#allocation8_spill] sm:$0xff]  ;;  %v7300_v9 = vld [vmem:[#allocation29_spill] sm:$0xff] }
 0x254   : > { %v6576_v52 = vadd.f32 %v6481_v37, %v2644_v6  ;;  %v2402_v54 = vadd.f32 %v2335_v53, %v6432_v58  ;;  %v2576_v40 = vrot.slane %v2452_v62, 2  ;;  %3963 = vpow2.f32 %v3590_v61 }
 0x255   : > { %v3593_v44 = vmul.f32 -1.442695, %v6556_v3  ;;  %v2403_v11 = vadd.f32 %v7288_v0, %v6435_v22  ;;  %v7290_v42 = vrot.slane %v7289_v48, 2  ;;  %v7292_v59 = vrot.slane %v7291_v26, 2  ;;  %v7303_v0 = vld [vmem:[#allocation10_spill] sm:$0xff] }
 0x256   : > { %3965 = vpow2.f32 %v3591_v20  ;;  %v3594_v24 = vmul.f32 -1.442695, %v6566_v14  ;;  %v3950_v63 = vpop.eup %3949  ;;  %v2404_v45 = vadd.f32 %v7293_v57, %v2159_v28  ;;  %v2578_v58 = vsel %vm1387_vm5, %v2576_v40, %v2577_v12  ;;  %v7301_v20 = vld [vmem:[#allocation23_spill] sm:$0xff] }
 0x257   : > { %v2583_v35 = vsel %vm1387_vm5, %v7292_v59, %v7290_v42  ;;  %3967 = vpow2.f32 %v3592_v36  ;;  %v3595_v27 = vmul.f32 -1.442695, %v6571_v25  ;;  %v3952_v5 = vpop.eup %3951  ;;  %v2580_v22 = vsel %vm1387_vm5, %v2577_v12, %v2579_v47 }
 0x258   : > { %v2646_v50 = vadd.f32 %v2578_v58, %v2401_v18  ;;  %v6593_v21 = vadd.f32 %v6481_v37, %v2645_v13  ;;  %v3596_v39 = vmul.f32 -1.442695, %v6576_v52  ;;  %v7295_v31 = vrot.slane %v7294_v60, 2 }
 0x259   : > { %v3954_v30 = vpop.eup %3953  ;;  %v7296_v49 = vmov %v7290_v42  ;;  %v2647_v33 = vadd.f32 %v2580_v22, %v2402_v54  ;;  %3969 = vpow2.f32 %v3593_v44  ;;  %v2797_v1 = vadd.f32 1.0, %v3950_v63  ;;  %v7302_v44 = vld [vmem:[#allocation28_spill] sm:$0xff]  ;;  %v7304_v22 = vld [vmem:[#allocation30_spill] sm:$0xff] }
 0x25a   : > { %v2585_v8 = vsel %vm1387_vm5, %v7296_v49, %v7295_v31  ;;  %v3956_v43 = vpop.eup %3955  ;;  %v2927_v34 = vadd.f32 %v7298_v23, %v7297_v55  ;;  %v2648_v16 = vadd.f32 %v2583_v35, %v2403_v11  ;;  %3971 = vpow2.f32 %v3594_v24 }
 0x25b   : > { %v2798_v56 = vadd.f32 1.0, %v3952_v5  ;;  %v3958_v28 = vpop.eup %3957  ;;  %v6605_v6 = vmul.f32 %v7300_v9, %v7299_v32  ;;  %3973 = vpow2.f32 %v3595_v27  ;;  %v2799_v7 = vadd.f32 1.0, %v3954_v30 }
 0x25c   : > { %v3960_v62 = vpop.eup %3959  ;;  %v2649_v61 = vadd.f32 %v2585_v8, %v2404_v45  ;;  %v6608_v53 = vadd.f32 %v6481_v37, %v2646_v50  ;;  %3975 = vpow2.f32 %v3596_v39  ;;  %v3597_v12 = vmul.f32 -1.442695, %v6593_v21  ;;  %v7305_v50 = vld [vmem:[#allocation49_spill] sm:$0xff] }
 0x25d   : > { %v2928_v38 = vsel %vm334_vm1, %v7301_v20, 0.0  ;;  %v6614_v36 = vadd.f32 %v6481_v37, %v2647_v33  ;;  %v2801_v18 = vadd.f32 1.0, %v3956_v43  ;;  %3977 = vrcp.f32 %v2797_v1 }
 0x25e   : > { %v2929_v47 = vadd.f32 %v2928_v38, %v2927_v34  ;;  %v6617_v13 = vadd.f32 %v6481_v37, %v2648_v16  ;;  %v2802_v54 = vadd.f32 1.0, %v3958_v28  ;;  %3979 = vrcp.f32 %v2798_v56 }
 0x25f   : > { %v2803_v40 = vadd.f32 1.0, %v3960_v62  ;;  %3981 = vrcp.f32 %v2799_v7  ;;  %v6621_v11 = vmul.f32 %v7303_v0, %v7302_v44  ;;  %v3962_v48 = vpop.eup %3961  ;;  %v6624_v42 = vadd.f32 %v6481_v37, %v2649_v61 }
 0x260   : > { %3983 = vpow2.f32 %v3597_v12  ;;  %v3598_v26 = vmul.f32 -1.442695, %v6608_v53  ;;  %v3599_v59 = vmul.f32 -1.442695, %v6614_v36  ;;  %v2930_v35 = vsel %vm334_vm1, %v6605_v6, 0.0 }
 0x261   : > { %3985 = vrcp.f32 %v2801_v18  ;;  %v3964_v24 = vpop.eup %3963  ;;  %v3600_v63 = vmul.f32 -1.442695, %v6617_v13  ;;  %v2931_v57 = vadd.f32 %v2930_v35, %v2929_v47  ;;  %v2804_v58 = vadd.f32 1.0, %v3962_v48  ;;  %v7306_v47 = vld [vmem:[#allocation27_spill] sm:$0xff] }
 0x262   : > { %3987 = vrcp.f32 %v2802_v54  ;;  %v2932_v37 = vsel %vm334_vm1, %v6621_v11, 0.0  ;;  %v3601_v5 = vmul.f32 -1.442695, %v6624_v42  ;;  %v6636_v39 = vmul.f32 %v7305_v50, %v7304_v22  ;;  %v7307_v54 = vld [vmem:[#allocation53_spill] sm:$0xff] }
 0x263   : > { %v3966_v45 = vpop.eup %3965  ;;  %3989 = vrcp.f32 %v2803_v40  ;;  %v2805_v30 = vadd.f32 1.0, %v3964_v24  ;;  %v2933_v49 = vadd.f32 %v2932_v37, %v2931_v57  ;;  %v6653_v40 = vmul.f32 %v7307_v54, %v7306_v47 }
 0x264   : > { %v3968_v27 = vpop.eup %3967  ;;  %3991 = vpow2.f32 %v3598_v26  ;;  %v2806_v31 = vadd.f32 1.0, %v3966_v45  ;;  %v2934_v55 = vsel %vm334_vm1, %v6636_v39, 0.0 }
 0x265   : > { %3993 = vpow2.f32 %v3599_v59  ;;  %v2807_v33 = vadd.f32 1.0, %v3968_v27  ;;  %v2935_v34 = vadd.f32 %v2934_v55, %v2933_v49  ;;  %v2942_v57 = vsel %vm334_vm1, %v6653_v40, 0.0 }
 0x266   : > { %v3970_v60 = vpop.eup %3969  ;;  %3995 = vpow2.f32 %v3600_v63 }
 0x267   : > { %v3972_v8 = vpop.eup %3971  ;;  %3997 = vrcp.f32 %v2804_v58  ;;  %v2808_v56 = vadd.f32 1.0, %v3970_v60 }
 0x268   : > { %v3974_v1 = vpop.eup %3973  ;;  %3999 = vpow2.f32 %v3601_v5  ;;  %v2809_v62 = vadd.f32 1.0, %v3972_v8 }
 0x269   : > { %v3976_v43 = vpop.eup %3975  ;;  %4001 = vrcp.f32 %v2805_v30  ;;  %v2810_v18 = vadd.f32 1.0, %v3974_v1 }
 0x26a   : > { %v3978_v23 = vpop.eup %3977  ;;  %4003 = vrcp.f32 %v2806_v31  ;;  %v2811_v0 = vadd.f32 1.0, %v3976_v43 }
 0x26b   : > { %v3980_v16 = vpop.eup %3979  ;;  %4005 = vrcp.f32 %v2807_v33  ;;  %v6641_v28 = vmul.f32 %v3978_v23, %v6485_v4 }
 0x26c   : > { %v3982_v32 = vpop.eup %3981  ;;  %v6644_v9 = vmul.f32 %v3980_v16, %v6489_v29  ;;  %4007 = vrcp.f32 %v2808_v56 }
 0x26d   : > { %v3984_v7 = vpop.eup %3983  ;;  %v6647_v61 = vmul.f32 %v3982_v32, %v6495_v51  ;;  %v2936_v12 = vsel %vm334_vm1, %v6641_v28, 0.0  ;;  %4009 = vrcp.f32 %v2809_v62 }
 0x26e   : > { %v3986_v38 = vpop.eup %3985  ;;  %v2937_v4 = vadd.f32 %v2936_v12, %v2935_v34  ;;  %v2938_v29 = vsel %vm334_vm1, %v6644_v9, 0.0  ;;  %4011 = vrcp.f32 %v2810_v18  ;;  %v2812_v58 = vadd.f32 1.0, %v3984_v7 }
 0x26f   : > { %v3988_v44 = vpop.eup %3987  ;;  %v2940_v51 = vsel %vm334_vm1, %v6647_v61, 0.0  ;;  %v6660_v35 = vmul.f32 %v3986_v38, %v6499_v41  ;;  %4013 = vrcp.f32 %v2811_v0 }
 0x270   : > { %v3990_v48 = vpop.eup %3989  ;;  %v2939_v26 = vadd.f32 %v2938_v29, %v2937_v4  ;;  %v6665_v37 = vmul.f32 %v3988_v44, %v6509_v17  ;;  %4015 = vrcp.f32 %v2812_v58 }
 0x271   : > { %v3992_v59 = vpop.eup %3991  ;;  %v6668_v27 = vmul.f32 %v3990_v48, %v6512_v15  ;;  %v2944_v30 = vsel %vm334_vm1, %v6660_v35, 0.0 }
 0x272   : > { %v3994_v24 = vpop.eup %3993  ;;  %v2941_v63 = vadd.f32 %v2940_v51, %v2939_v26  ;;  %v2813_v41 = vadd.f32 1.0, %v3992_v59  ;;  %v2946_v17 = vsel %vm334_vm1, %v6665_v37, 0.0 }
 0x273   : > { %v3996_v45 = vpop.eup %3995  ;;  %v2814_v31 = vadd.f32 1.0, %v3994_v24  ;;  %v2948_v15 = vsel %vm334_vm1, %v6668_v27, 0.0 }
 0x274   : > { %v3998_v5 = vpop.eup %3997  ;;  %v2943_v22 = vadd.f32 %v2942_v57, %v2941_v63  ;;  %v2815_v49 = vadd.f32 1.0, %v3996_v45  ;;  %4017 = vrcp.f32 %v2813_v41 }
 0x275   : > { %v4000_v50 = vpop.eup %3999  ;;  %v6673_v1 = vmul.f32 %v3998_v5, %v6523_v19  ;;  %4019 = vrcp.f32 %v2814_v31 }
 0x276   : > { %v4002_v60 = vpop.eup %4001  ;;  %v2945_v8 = vadd.f32 %v2944_v30, %v2943_v22  ;;  %v2816_v34 = vadd.f32 1.0, %v4000_v50  ;;  %4021 = vrcp.f32 %v2815_v49 }
 0x277   : > { %v4004_v33 = vpop.eup %4003  ;;  %v6680_v23 = vmul.f32 %v4002_v60, %v6532_v10  ;;  %v2950_v32 = vsel %vm334_vm1, %v6673_v1, 0.0 }
 0x278   : > { %v4006_v43 = vpop.eup %4005  ;;  %v2947_v55 = vadd.f32 %v2946_v17, %v2945_v8  ;;  %v6683_v56 = vmul.f32 %v4004_v33, %v6536_v46  ;;  %4023 = vrcp.f32 %v2816_v34 }
 0x279   : > { %v6686_v19 = vmul.f32 %v4006_v43, %v6539_v2  ;;  %v4008_v7 = vpop.eup %4007  ;;  %v2952_v12 = vsel %vm334_vm1, %v6680_v23, 0.0 }
 0x27a   : > { %v2949_v16 = vadd.f32 %v2948_v15, %v2947_v55  ;;  %v4010_v10 = vpop.eup %4009  ;;  %v6693_v47 = vmul.f32 %v4008_v7, %v6556_v3  ;;  %v2954_v46 = vsel %vm334_vm1, %v6683_v56, 0.0 }
 0x27b   : > { %v4012_v18 = vpop.eup %4011  ;;  %v2956_v2 = vsel %vm334_vm1, %v6686_v19, 0.0  ;;  %v6700_v44 = vmul.f32 %v4010_v10, %v6566_v14 }
 0x27c   : > { %v2951_v62 = vadd.f32 %v2950_v32, %v2949_v16  ;;  %v4014_v54 = vpop.eup %4013  ;;  %v6703_v29 = vmul.f32 %v4012_v18, %v6571_v25  ;;  %v2958_v3 = vsel %vm334_vm1, %v6693_v47, 0.0 }
 0x27d   : > { %v6706_v51 = vmul.f32 %v4014_v54, %v6576_v52  ;;  %v4016_v48 = vpop.eup %4015  ;;  %v2960_v59 = vsel %vm334_vm1, %v6700_v44, 0.0 }
 0x27e   : > { %v2953_v38 = vadd.f32 %v2952_v12, %v2951_v62  ;;  %v6713_v14 = vmul.f32 %v4016_v48, %v6593_v21  ;;  %v2962_v25 = vsel %vm334_vm1, %v6703_v29, 0.0  ;;  %v3046_v12 = vld [vmem:[%s6950_s6] sm:$0xf] }
 0x27f   : > { %v2964_v52 = vsel %vm334_vm1, %v6706_v51, 0.0  ;;  %v3051_v10 = vsel %vm495_vm0, %v3046_v12, 0 }
 0x280   : > { %v2955_v4 = vadd.f32 %v2954_v46, %v2953_v38  ;;  %v2966_v21 = vsel %vm334_vm1, %v6713_v14, 0.0  ;;  %3713 = vmatpush3.bf16.msra.mxu1 %v3051_v10 }
 0x281   : > { %v4018_v24 = vpop.eup %4017 }
 0x282   : > { %v2957_v0 = vadd.f32 %v2956_v2, %v2955_v4  ;;  %v4020_v57 = vpop.eup %4019  ;;  %v6720_v5 = vmul.f32 %v4018_v24, %v6608_v53 }
 0x283   : > { %v4022_v45 = vpop.eup %4021  ;;  %v6723_v50 = vmul.f32 %v4020_v57, %v6614_v36 }
 0x284   : > { %v2959_v26 = vadd.f32 %v2958_v3, %v2957_v0  ;;  %v6726_v41 = vmul.f32 %v4022_v45, %v6617_v13  ;;  %v2968_v31 = vsel %vm334_vm1, %v6720_v5, 0.0  ;;  %v3767_v0 = vld [vmem:[%s6951_s7 + $0x8] sm:$0xff]   ;;  %v3768_v3 = vld [vmem:[%s6951_s7] sm:$0xff]  }
 0x285   : > { %v4024_v30 = vpop.eup %4023  ;;  %v2970_v53 = vsel %vm334_vm1, %v6723_v50, 0.0  ;;  %3718 = vmatprep.subr.bf16.mxu1 %v3767_v0 }
 0x286   : > { %v2961_v63 = vadd.f32 %v2960_v59, %v2959_v26  ;;  %v6733_v8 = vmul.f32 %v4024_v30, %v6624_v42  ;;  %v2972_v36 = vsel %vm334_vm1, %v6726_v41, 0.0  ;;  %v7308_v30 = vld [vmem:[#allocation15_spill] sm:$0xff] }
 0x288   : > { %v2963_v58 = vadd.f32 %v2962_v25, %v2961_v63  ;;  %v2974_v17 = vsel %vm334_vm1, %v6733_v8, 0.0 }
 0x28a   : > { %v2965_v22 = vadd.f32 %v2964_v52, %v2963_v58  ;;  %v3099_v52 = vlaneseq }
 0x28c   : > { %v2967_v60 = vadd.f32 %v2966_v21, %v2965_v22  ;;  %v3100_v45 = vshrl.u32 %v3099_v52, 7 }
 0x28e   : > { %v2969_v49 = vadd.f32 %v2968_v31, %v2967_v60  ;;  %v3101_v58 = vsub.s32 0, %v3100_v45  ;;  %v7309_v31 = vld [vmem:[#allocation16_spill] sm:$0xff] }
 0x290   : > { %v2971_v13 = vadd.f32 %v2970_v53, %v2969_v49  ;;  %v7310_v53 = vld [vmem:[#allocation13_spill] sm:$0xff] }
 0x292   : > { %v2973_v33 = vadd.f32 %v2972_v36, %v2971_v13  ;;  %v7311_v13 = vld [vmem:[#allocation3_spill] sm:$0xff] }
 0x294   : > { %v2975_v15 = vadd.f32 %v2974_v17, %v2973_v33  ;;  %v7312_v17 = vld [vmem:[#allocation9_spill] sm:$0xff] }
 0x296   : > { %v2976_v43 = vrot.slane %v2975_v15, 4 }
 0x298   : > { %v2977_v55 = vadd.f32 %v2976_v43, %v2975_v15  ;;  %v7313_v43 = vld [vmem:[#allocation4_spill] sm:$0xff] }
 0x29a   : > { %v2978_v34 = vrot.slane %v2977_v55, 2 }
 0x29c   : > { %v2979_v16 = vadd.f32 %v2978_v34, %v2977_v55 }
 0x29e   : > { %v2980_v32 = vrot.slane %v2979_v16, 1 }
 0x2a0   : > { %v2981_v7 = vadd.f32 %v2980_v32, %v2979_v16 }
 0x2a2   : > { %v2983_v42 = vmul.f32 0.00390625, %v2981_v7  ;;  %v7314_v7 = vld [vmem:[#allocation32_spill] sm:$0xff] }
 0x2a4   : > { %v2984_v62 = vpack.c.bf16 %v2983_v42, %v2983_v42 }
 0x2a6   : > { %3709 = vmatmul.mubr.msk.bf16.vlgmr.msra.gmra.mxu0 %vm334_vm1, %v2984_v62  ;;  %v7315_v62 = vld [vmem:[#allocation12_spill] sm:$0xff] }
 0x366   : > { %v3038_v38 = vpop.f32.mrf.mxu0 }
 0x367   : > { %v3044_v18 = vmax.f32 %v3038_v38, 0.0 }
 0x368   : > { %v3710_v46 = vpop.f32.mrf.mxu0 }
 0x369   : > { %v3045_v2 = vpack.c.bf16 %v3044_v18, %v3044_v18 }
 0x36a   : > { %v3041_v54 = vpop.f32.mrf.mxu0 }
 0x36b   : > { %3715 = vmatmul.mubr.msk.bf16.vlgmr.msra.gmra.mxu1 %vm446_vm2, %v3045_v2 }
 0x36c   : > { %v3711_v4 = vpop.f32.mrf.mxu0  ;;  %3719 = vmatpush3.bf16.msra.mxu1 %v3767_v0 }
 0x36d   : > { %3720 = vmatprep.subr.bf16.mxu1 %v3768_v3 }
 0x370   : > { %3721 = vmatpush3.bf16.msra.mxu1 %v3768_v3 }
 0x42b   : > { %v3087_v48 = vpop.f32.mrf.mxu1 }
 0x42c   : > { %v3606_v26 = vmul.f32 -1.442695, %v3087_v48 }
 0x42d   : > { %v3716_v59 = vpop.f32.mrf.mxu1 }
 0x42e   : > { %4025 = vpow2.f32 %v3606_v26 }
 0x42f   : > { %v3090_v24 = vpop.f32.mrf.mxu1 }
 0x431   : > { %v3717_v63 = vpop.f32.mrf.mxu1 }
 0x43b   : > { %v4026_v57 = vpop.eup %4025 }
 0x43c   : > { %v3096_v25 = vadd.f32 1.0, %v4026_v57 }
 0x43e   : > { %4027 = vrcp.f32 %v3096_v25 }
 0x44b   : > { %v4028_v22 = vpop.eup %4027 }
 0x44c   : > { %v3102_v21 = vrot.slane %v4028_v22, %v3101_v58 }
 0x44e   : > { %v3103_v60 = vmul.f32 %v3102_v21, %v7308_v30  ;;  %v3104_v49 = vmul.f32 %v3102_v21, %v7309_v31  ;;  %v3105_v36 = vmul.f32 %v3102_v21, %v7310_v53  ;;  %v3106_v33 = vmul.f32 %v3102_v21, %v7311_v13  ;;  %v4051_v30 = vld [vmem:[%s4237_s16] sm:$0xff]  ;;  %v4052_v53 = vld [vmem:[%s4237_s16 + $0x18] sm:$0xff] }
 0x44f   : > { %v3107_v15 = vmul.f32 %v3102_v21, %v7312_v17  ;;  %v3108_v55 = vmul.f32 %v3102_v21, %v7313_v43  ;;  %v3109_v42 = vmul.f32 %v3102_v21, %v7314_v7  ;;  %v3110_v12 = vmul.f32 %v3102_v21, %v7315_v62  ;;  %v4053_v17 = vld [vmem:[%s4237_s16 + $0x8] sm:$0xff] }
 0x450   : > { %v3135_v34 = vpack.c.bf16 %v3104_v49, %v3103_v60  ;;  %v3136_v16 = vpack.c.bf16 %v3106_v33, %v3105_v36  ;;  %v3111_v10 = vmul.f32 %v3102_v21, %v7301_v20  ;;  %v3112_v38 = vmul.f32 %v3102_v21, %v6605_v6 }
 0x451   : > { %v3137_v32 = vpack.c.bf16 %v3108_v55, %v3107_v15  ;;  %v3138_v18 = vpack.c.bf16 %v3110_v12, %v3109_v42  ;;  %v3113_v2 = vmul.f32 %v3102_v21, %v6621_v11  ;;  %v3114_v54 = vmul.f32 %v3102_v21, %v6636_v39  ;;  %v4055_v42 = vld [vmem:[%s4237_s16 + $0x20] sm:$0xff] }
 0x452   : > { %3722 = vmatprep.mubr.msk.bf16.mxu1 %vm334_vm1, %v3135_v34  ;;  %v3139_v46 = vpack.c.bf16 %v3112_v38, %v3111_v10  ;;  %v3115_v4 = vmul.f32 %v3102_v21, %v6641_v28  ;;  %v3116_v0 = vmul.f32 %v3102_v21, %v6644_v9  ;;  %v3117_v6 = vmul.f32 %v3102_v21, %v6647_v61  ;;  %v4054_v34 = vld [vmem:[%s4237_s16 + $0x30] sm:$0xff]  ;;  %v4056_v38 = vld [vmem:[%s4237_s16 + $0x38] sm:$0xff] }
 0x453   : > { %3723 = vmatmul.mubr.msk.bf16.vlgmr.msra.gmra.mxu1 %vm334_vm1, %v3136_v16  ;;  %v3140_v3 = vpack.c.bf16 %v3114_v54, %v3113_v2  ;;  %v3118_v20 = vmul.f32 %v3102_v21, %v6653_v40  ;;  %v3119_v26 = vmul.f32 %v3102_v21, %v6660_v35  ;;  %v3120_v11 = vmul.f32 %v3102_v21, %v6665_v37  ;;  %v4057_v54 = vld [vmem:[%s4237_s16 + $0x28] sm:$0xff] }
 0x454   : > { %3726 = vmatprep.mubr.msk.bf16.mxu1 %vm334_vm1, %v3137_v32  ;;  %v3141_v48 = vpack.c.bf16 %v3116_v0, %v3115_v4  ;;  %v3121_v28 = vmul.f32 %v3102_v21, %v6668_v27  ;;  %v3122_v9 = vmul.f32 %v3102_v21, %v6673_v1  ;;  %v3123_v24 = vmul.f32 %v3102_v21, %v6680_v23 }
 0x455   : > { %v3142_v59 = vpack.c.bf16 %v3118_v20, %v3117_v6  ;;  %v3143_v39 = vpack.c.bf16 %v3120_v11, %v3119_v26  ;;  %v3124_v61 = vmul.f32 %v3102_v21, %v6683_v56  ;;  %v3125_v35 = vmul.f32 %v3102_v21, %v6686_v19  ;;  %v4059_v11 = vld [vmem:[%s4237_s16 + $0x40] sm:$0xff] }
 0x456   : > { %v3144_v63 = vpack.c.bf16 %v3122_v9, %v3121_v28  ;;  %v3126_v37 = vmul.f32 %v3102_v21, %v6693_v47  ;;  %v3127_v57 = vmul.f32 %v3102_v21, %v6700_v44  ;;  %v3128_v27 = vmul.f32 %v3102_v21, %v6703_v29  ;;  %v4060_v9 = vld [vmem:[%s4237_s16 + $0x58] sm:$0xff] }
 0x457   : > { %v3145_v40 = vpack.c.bf16 %v3124_v61, %v3123_v24  ;;  %v3129_v23 = vmul.f32 %v3102_v21, %v6706_v51  ;;  %v3130_v56 = vmul.f32 %v3102_v21, %v6713_v14  ;;  %v3131_v19 = vmul.f32 %v3102_v21, %v6720_v5  ;;  %v6804_v51 = vld [vmem:[%s6952_s8] ss:$0 sm:$0xff] }
 0x458   : > { %v3146_v25 = vpack.c.bf16 %v3126_v37, %v3125_v35  ;;  %v3147_v1 = vpack.c.bf16 %v3128_v27, %v3127_v57  ;;  %v3132_v47 = vmul.f32 %v3102_v21, %v6723_v50  ;;  %v3133_v29 = vmul.f32 %v3102_v21, %v6726_v41  ;;  %v4050_v41 = vld [vmem:[%s4237_s16 + $0x10] sm:$0xff] }
 0x459   : > { %v3148_v52 = vpack.c.bf16 %v3130_v56, %v3129_v23  ;;  %v3134_v45 = vmul.f32 %v3102_v21, %v6733_v8  ;;  %v4062_v27 = vld [vmem:[%s4237_s16 + $0x70] sm:$0xff]  ;;  %v4063_v56 = vld [vmem:[%s4237_s16 + $0x60] sm:$0xff] }
 0x45a   : > { %v3149_v44 = vpack.c.bf16 %v3132_v47, %v3131_v19 }
 0x45b   : > { %3727 = vmatmul.mubr.msk.bf16.gmra.mxu1 %vm334_vm1, %v3138_v18  ;;  %v3150_v58 = vpack.c.bf16 %v3134_v45, %v3133_v29 }
 0x45c   : > { %3730 = vmatprep.mubr.msk.bf16.mxu1 %vm334_vm1, %v3139_v46 }
 0x463   : > { %3731 = vmatmul.mubr.msk.bf16.gmra.mxu1 %vm334_vm1, %v3140_v3 }
 0x464   : > { %3734 = vmatprep.mubr.msk.bf16.mxu1 %vm334_vm1, %v3141_v48  ;;  %v4058_v48 = vld [vmem:[%s4237_s16 + $0x50] sm:$0xff] }
 0x46b   : > { %3735 = vmatmul.mubr.msk.bf16.gmra.mxu1 %vm334_vm1, %v3142_v59 }
 0x46c   : > { %3738 = vmatprep.mubr.msk.bf16.mxu1 %vm334_vm1, %v3143_v39 }
 0x473   : > { %3739 = vmatmul.mubr.msk.bf16.gmra.mxu1 %vm334_vm1, %v3144_v63 }
 0x474   : > { %3742 = vmatprep.mubr.msk.bf16.mxu1 %vm334_vm1, %v3145_v40  ;;  %v4061_v40 = vld [vmem:[%s4237_s16 + $0x48] sm:$0xff] }
 0x47b   : > { %3743 = vmatmul.mubr.msk.bf16.gmra.mxu1 %vm334_vm1, %v3146_v25 }
 0x47c   : > { %3746 = vmatprep.mubr.msk.bf16.mxu1 %vm334_vm1, %v3147_v1 }
 0x483   : > { %3747 = vmatmul.mubr.msk.bf16.gmra.mxu1 %vm334_vm1, %v3148_v52 }
 0x484   : > { %3750 = vmatprep.mubr.msk.bf16.mxu1 %vm334_vm1, %v3149_v44  ;;  %v4064_v44 = vld [vmem:[%s4237_s16 + $0x78] sm:$0xff] }
 0x48b   : > { %3751 = vmatmul.mubr.msk.bf16.gmra.mxu1 %vm334_vm1, %v3150_v58 }
 0x513   : > { %v3724_v14 = vpop.f32.mrf.mxu1 }
 0x514   : > { %v3265_v5 = vadd.f32 %v3724_v14, %v6804_v51  ;;  %v4065_v14 = vld [vmem:[%s4237_s16 + $0x68] sm:$0xff] }
 0x515   : > { %v3256_v50 = vpop.f32.mrf.mxu1 }
 0x516   : > { %v3385_v8 = vadd.f32 %v4050_v41, %v3265_v5  ;;  %v3257_v22 = vadd.f32 %v6804_v51, %v3256_v50 }
 0x517   : > { %v3725_v21 = vpop.f32.mrf.mxu1 }
 0x518   : > { %3417 = vst.msk [vmem:[%s6812_s27 + $0x10] sm:$0xff] %vm446_vm2, %v3385_v8  ;;  %v3383_v60 = vadd.f32 %v4051_v30, %v3257_v22  ;;  %v3268_v31 = vadd.f32 %v3725_v21, %v6804_v51  ;;  %v4066_v8 = vld [vmem:[%s4237_s16 + $0x90] sm:$0xff] }
 0x519   : > { %v3259_v49 = vpop.f32.mrf.mxu1 }
 0x51a   : > { %3415 = vst.msk [vmem:[%s6812_s27] sm:$0xff] %vm446_vm2, %v3383_v60  ;;  %v3386_v36 = vadd.f32 %v4052_v53, %v3268_v31  ;;  %v3260_v13 = vadd.f32 %v6804_v51, %v3259_v49  ;;  %v4067_v60 = vld [vmem:[%s4237_s16 + $0x80] sm:$0xff] }
 0x51b   : > { %v3728_v33 = vpop.f32.mrf.mxu1 }
 0x51c   : > { %3418 = vst.msk [vmem:[%s6812_s27 + $0x18] sm:$0xff] %vm446_vm2, %v3386_v36  ;;  %v3384_v15 = vadd.f32 %v4053_v17, %v3260_v13  ;;  %v3281_v43 = vadd.f32 %v3728_v33, %v6804_v51  ;;  %v4068_v36 = vld [vmem:[%s4237_s16 + $0x98] sm:$0xff] }
 0x51d   : > { %v3272_v55 = vpop.f32.mrf.mxu1 }
 0x51e   : > { %3416 = vst.msk [vmem:[%s6812_s27 + $0x8] sm:$0xff] %vm446_vm2, %v3384_v15  ;;  %v3389_v16 = vadd.f32 %v4054_v34, %v3281_v43  ;;  %v3273_v32 = vadd.f32 %v6804_v51, %v3272_v55  ;;  %v4069_v15 = vld [vmem:[%s4237_s16 + $0x88] sm:$0xff] }
 0x51f   : > { %v3729_v7 = vpop.f32.mrf.mxu1 }
 0x520   : > { %3421 = vst.msk [vmem:[%s6812_s27 + $0x30] sm:$0xff] %vm446_vm2, %v3389_v16  ;;  %v3387_v62 = vadd.f32 %v4055_v42, %v3273_v32  ;;  %v3284_v12 = vadd.f32 %v3729_v7, %v6804_v51  ;;  %v4070_v16 = vld [vmem:[%s4237_s16 + $0xb0] sm:$0xff] }
 0x521   : > { %v3275_v10 = vpop.f32.mrf.mxu1 }
 0x522   : > { %3419 = vst.msk [vmem:[%s6812_s27 + $0x20] sm:$0xff] %vm446_vm2, %v3387_v62  ;;  %v3390_v18 = vadd.f32 %v4056_v38, %v3284_v12  ;;  %v3276_v46 = vadd.f32 %v6804_v51, %v3275_v10  ;;  %v4071_v62 = vld [vmem:[%s4237_s16 + $0xa0] sm:$0xff] }
 0x523   : > { %v3732_v2 = vpop.f32.mrf.mxu1 }
 0x524   : > { %3422 = vst.msk [vmem:[%s6812_s27 + $0x38] sm:$0xff] %vm446_vm2, %v3390_v18  ;;  %v3388_v4 = vadd.f32 %v4057_v54, %v3276_v46  ;;  %v3297_v0 = vadd.f32 %v3732_v2, %v6804_v51  ;;  %v4072_v18 = vld [vmem:[%s4237_s16 + $0xb8] sm:$0xff] }
 0x525   : > { %v3288_v3 = vpop.f32.mrf.mxu1 }
 0x526   : > { %3420 = vst.msk [vmem:[%s6812_s27 + $0x28] sm:$0xff] %vm446_vm2, %v3388_v4  ;;  %v3393_v6 = vadd.f32 %v4058_v48, %v3297_v0  ;;  %v3289_v20 = vadd.f32 %v6804_v51, %v3288_v3  ;;  %v4073_v4 = vld [vmem:[%s4237_s16 + $0xa8] sm:$0xff] }
 0x527   : > { %v3733_v26 = vpop.f32.mrf.mxu1 }
 0x528   : > { %3425 = vst.msk [vmem:[%s6812_s27 + $0x50] sm:$0xff] %vm446_vm2, %v3393_v6  ;;  %v3391_v59 = vadd.f32 %v4059_v11, %v3289_v20  ;;  %v3300_v39 = vadd.f32 %v3733_v26, %v6804_v51  ;;  %v4074_v6 = vld [vmem:[%s4237_s16 + $0xd0] sm:$0xff] }
 0x529   : > { %v3291_v28 = vpop.f32.mrf.mxu1 }
 0x52a   : > { %3423 = vst.msk [vmem:[%s6812_s27 + $0x40] sm:$0xff] %vm446_vm2, %v3391_v59  ;;  %v3394_v24 = vadd.f32 %v4060_v9, %v3300_v39  ;;  %v3292_v61 = vadd.f32 %v6804_v51, %v3291_v28  ;;  %v4075_v59 = vld [vmem:[%s4237_s16 + $0xc0] sm:$0xff] }
 0x52b   : > { %v3736_v63 = vpop.f32.mrf.mxu1 }
 0x52c   : > { %3426 = vst.msk [vmem:[%s6812_s27 + $0x58] sm:$0xff] %vm446_vm2, %v3394_v24  ;;  %v3392_v35 = vadd.f32 %v4061_v40, %v3292_v61  ;;  %v3313_v37 = vadd.f32 %v3736_v63, %v6804_v51  ;;  %v4076_v24 = vld [vmem:[%s4237_s16 + $0xd8] sm:$0xff] }
 0x52d   : > { %v3304_v57 = vpop.f32.mrf.mxu1 }
 0x52e   : > { %3424 = vst.msk [vmem:[%s6812_s27 + $0x48] sm:$0xff] %vm446_vm2, %v3392_v35  ;;  %v3397_v25 = vadd.f32 %v4062_v27, %v3313_v37  ;;  %v3305_v1 = vadd.f32 %v6804_v51, %v3304_v57  ;;  %v4077_v35 = vld [vmem:[%s4237_s16 + $0xc8] sm:$0xff] }
 0x52f   : > { %v3737_v23 = vpop.f32.mrf.mxu1 }
 0x530   : > { %3429 = vst.msk [vmem:[%s6812_s27 + $0x70] sm:$0xff] %vm446_vm2, %v3397_v25  ;;  %v3395_v19 = vadd.f32 %v4063_v56, %v3305_v1  ;;  %v3316_v47 = vadd.f32 %v3737_v23, %v6804_v51  ;;  %v4078_v25 = vld [vmem:[%s4237_s16 + $0xf0] sm:$0xff] }
 0x531   : > { %v3307_v52 = vpop.f32.mrf.mxu1 }
 0x532   : > { %3427 = vst.msk [vmem:[%s6812_s27 + $0x60] sm:$0xff] %vm446_vm2, %v3395_v19  ;;  %v3398_v29 = vadd.f32 %v4064_v44, %v3316_v47  ;;  %v3308_v45 = vadd.f32 %v6804_v51, %v3307_v52  ;;  %v4079_v19 = vld [vmem:[%s4237_s16 + $0xe0] sm:$0xff] }
 0x533   : > { %v3740_v58 = vpop.f32.mrf.mxu1 }
 0x534   : > { %3430 = vst.msk [vmem:[%s6812_s27 + $0x78] sm:$0xff] %vm446_vm2, %v3398_v29  ;;  %v3396_v5 = vadd.f32 %v4065_v14, %v3308_v45  ;;  %v3329_v50 = vadd.f32 %v3740_v58, %v6804_v51  ;;  %v4080_v29 = vld [vmem:[%s4237_s16 + $0xf8] sm:$0xff]  ;;  %v4081_v14 = vld [vmem:[%s4237_s16 + $0xe8] sm:$0xff] }
 0x535   : > { %v3320_v41 = vpop.f32.mrf.mxu1 }
 0x536   : > { %3428 = vst.msk [vmem:[%s6812_s27 + $0x68] sm:$0xff] %vm446_vm2, %v3396_v5  ;;  %v3401_v22 = vadd.f32 %v4066_v8, %v3329_v50  ;;  %v3321_v21 = vadd.f32 %v6804_v51, %v3320_v41 }
 0x537   : > { %v3741_v30 = vpop.f32.mrf.mxu1 }
 0x538   : > { %3433 = vst.msk [vmem:[%s6812_s27 + $0x90] sm:$0xff] %vm446_vm2, %v3401_v22  ;;  %v3399_v31 = vadd.f32 %v4067_v60, %v3321_v21  ;;  %v3332_v49 = vadd.f32 %v3741_v30, %v6804_v51 }
 0x539   : > { %v3323_v53 = vpop.f32.mrf.mxu1 }
 0x53a   : > { %3431 = vst.msk [vmem:[%s6812_s27 + $0x80] sm:$0xff] %vm446_vm2, %v3399_v31  ;;  %v3402_v13 = vadd.f32 %v4068_v36, %v3332_v49  ;;  %v3324_v33 = vadd.f32 %v6804_v51, %v3323_v53 }
 0x53b   : > { %v3744_v17 = vpop.f32.mrf.mxu1 }
 0x53c   : > { %3434 = vst.msk [vmem:[%s6812_s27 + $0x98] sm:$0xff] %vm446_vm2, %v3402_v13  ;;  %v3400_v43 = vadd.f32 %v4069_v15, %v3324_v33  ;;  %v3345_v55 = vadd.f32 %v3744_v17, %v6804_v51 }
 0x53d   : > { %v3336_v34 = vpop.f32.mrf.mxu1 }
 0x53e   : > { %3432 = vst.msk [vmem:[%s6812_s27 + $0x88] sm:$0xff] %vm446_vm2, %v3400_v43  ;;  %v3405_v32 = vadd.f32 %v4070_v16, %v3345_v55  ;;  %v3337_v7 = vadd.f32 %v6804_v51, %v3336_v34 }
 0x53f   : > { %v3745_v42 = vpop.f32.mrf.mxu1 }
 0x540   : > { %3437 = vst.msk [vmem:[%s6812_s27 + $0xb0] sm:$0xff] %vm446_vm2, %v3405_v32  ;;  %v3403_v12 = vadd.f32 %v4071_v62, %v3337_v7  ;;  %v3348_v10 = vadd.f32 %v3745_v42, %v6804_v51 }
 0x541   : > { %v3339_v38 = vpop.f32.mrf.mxu1 }
 0x542   : > { %3435 = vst.msk [vmem:[%s6812_s27 + $0xa0] sm:$0xff] %vm446_vm2, %v3403_v12  ;;  %v3406_v46 = vadd.f32 %v4072_v18, %v3348_v10  ;;  %v3340_v2 = vadd.f32 %v6804_v51, %v3339_v38 }
 0x543   : > { %v3748_v54 = vpop.f32.mrf.mxu1 }
 0x544   : > { %3438 = vst.msk [vmem:[%s6812_s27 + $0xb8] sm:$0xff] %vm446_vm2, %v3406_v46  ;;  %v3404_v0 = vadd.f32 %v4073_v4, %v3340_v2  ;;  %v3361_v3 = vadd.f32 %v3748_v54, %v6804_v51 }
 0x545   : > { %v3352_v48 = vpop.f32.mrf.mxu1 }
 0x546   : > { %3436 = vst.msk [vmem:[%s6812_s27 + $0xa8] sm:$0xff] %vm446_vm2, %v3404_v0  ;;  %v3409_v20 = vadd.f32 %v4074_v6, %v3361_v3  ;;  %v3353_v26 = vadd.f32 %v6804_v51, %v3352_v48 }
 0x547   : > { %v3749_v11 = vpop.f32.mrf.mxu1 }
 0x548   : > { %3441 = vst.msk [vmem:[%s6812_s27 + $0xd0] sm:$0xff] %vm446_vm2, %v3409_v20  ;;  %v3407_v39 = vadd.f32 %v4075_v59, %v3353_v26  ;;  %v3364_v28 = vadd.f32 %v3749_v11, %v6804_v51 }
 0x549   : > { %v3355_v9 = vpop.f32.mrf.mxu1 }
 0x54a   : > { %3439 = vst.msk [vmem:[%s6812_s27 + $0xc0] sm:$0xff] %vm446_vm2, %v3407_v39  ;;  %v3410_v61 = vadd.f32 %v4076_v24, %v3364_v28  ;;  %v3356_v63 = vadd.f32 %v6804_v51, %v3355_v9 }
 0x54b   : > { %v3752_v40 = vpop.f32.mrf.mxu1 }
 0x54c   : > { %3442 = vst.msk [vmem:[%s6812_s27 + $0xd8] sm:$0xff] %vm446_vm2, %v3410_v61  ;;  %v3408_v37 = vadd.f32 %v4077_v35, %v3356_v63  ;;  %v3377_v57 = vadd.f32 %v3752_v40, %v6804_v51 }
 0x54d   : > { %v3368_v27 = vpop.f32.mrf.mxu1 }
 0x54e   : > { %3440 = vst.msk [vmem:[%s6812_s27 + $0xc8] sm:$0xff] %vm446_vm2, %v3408_v37  ;;  %v3413_v1 = vadd.f32 %v4078_v25, %v3377_v57  ;;  %v3369_v23 = vadd.f32 %v6804_v51, %v3368_v27 }
 0x54f   : > { %v3753_v56 = vpop.f32.mrf.mxu1 }
 0x550   : > { %3445 = vst.msk [vmem:[%s6812_s27 + $0xf0] sm:$0xff] %vm446_vm2, %v3413_v1  ;;  %v3411_v47 = vadd.f32 %v4079_v19, %v3369_v23  ;;  %v3380_v52 = vadd.f32 %v3753_v56, %v6804_v51 }
 0x551   : > { %v3371_v44 = vpop.f32.mrf.mxu1 }
 0x552   : > { %3443 = vst.msk [vmem:[%s6812_s27 + $0xe0] sm:$0xff] %vm446_vm2, %v3411_v47  ;;  %v3414_v45 = vadd.f32 %v4080_v29, %v3380_v52  ;;  %v3372_v58 = vadd.f32 %v6804_v51, %v3371_v44 }
 0x554   : > { %3446 = vst.msk [vmem:[%s6812_s27 + $0xf8] sm:$0xff] %vm446_vm2, %v3414_v45  ;;  %v3412_v5 = vadd.f32 %v4081_v14, %v3372_v58 }
 0x556   : > { %3444 = vst.msk [vmem:[%s6812_s27 + $0xe8] sm:$0xff] %vm446_vm2, %v3412_v5 }
 0x557 PF: > { %s19_s30 = sadd.s32 1, %s4088_s30  }
 0x558   : > { %p16_p4 = scmp.ge.s32.totalorder %s19_s30, 4  }
 0x55a   :  { %18 = sbr.rel (!%p16_p4) target bundleno = 1 (0x1), region = 87 }

</bundles_post_ra>
